<compile_context>
chip_gen: v6e
topology: v6e:2x2x1
jax: 0.10.0
libtpu: 0.0.40
codegen_flags: <defaults>
</compile_context>

<pallas_src>
from functools import lru_cache

import numpy as np

import jax
import jax.numpy as jnp
from jax import lax
from jax.experimental import pallas as pl
from jax.experimental.pallas import tpu as pltpu

BN_EPS = 1e-5
KH = KW = 4
STRIDE = 2


# ------------------------------ static helpers ----------------------------- #

def _conv_out(n):
    return (n - KH) // STRIDE + 1


@lru_cache(maxsize=None)
def _selection_matrix(batch, h_in, w_in, h_out, w_out):
    """Small 0/1 gather matrix for conv3's im2col (tap-major row blocks).

    Row (t, b, oy, ox) selects input row (b*h_in + 2*oy + i)*w_in + 2*ox + j,
    with (i, j) = divmod(t, KW).  Only used for conv3, where it is ~18 KB.
    (Built once per shape at trace time; harmless under jit.)
    """
    m_out = batch * h_out * w_out
    sel = np.zeros((KH * KW * m_out, batch * h_in * w_in), np.float32)
    for t in range(KH * KW):
        i, j = divmod(t, KW)
        for b in range(batch):
            for oy in range(h_out):
                for ox in range(w_out):
                    dst = t * m_out + (b * h_out + oy) * w_out + ox
                    src = (b * h_in + STRIDE * oy + i) * w_in + STRIDE * ox + j
                    sel[dst, src] = 1.0
    return sel


def im2col(x, kh, kw, stride):
    """x: [B, H, W, C] NHWC -> patches [B*Ho*Wo, kh*kw*C], tap-major columns."""
    B, H, W, C = x.shape
    Ho = (H - kh) // stride + 1
    Wo = (W - kw) // stride + 1
    cols = []
    for i in range(kh):
        for j in range(kw):
            cols.append(x[:, i:i + stride * (Ho - 1) + 1:stride,
                          j:j + stride * (Wo - 1) + 1:stride, :])
    p = jnp.stack(cols, axis=3)                         # [B, Ho, Wo, kh*kw, C]
    return p.reshape(B * Ho * Wo, kh * kw * C), Ho, Wo


def _gather_conv1_patches_for_conv2(p1_4d, h2, w2):
    """Apply conv2's im2col on the HOST to conv1's patch rows.

    p1_4d: [B, H1, W1, 48] conv1 patches.  Returns [16*B*h2*w2, 48] with rows
    ordered (tap2 = i*4+j, b, oy2, ox2).  Legal because the row gather commutes
    with the (row-wise elementwise) BatchNorm affine + ReLU applied in-kernel.
    """
    B = p1_4d.shape[0]
    K = p1_4d.shape[-1]
    blocks = []
    for i in range(KH):
        for j in range(KW):
            blk = p1_4d[:, i:i + STRIDE * (h2 - 1) + 1:STRIDE,
                        j:j + STRIDE * (w2 - 1) + 1:STRIDE, :]
            blocks.append(blk.reshape(B * h2 * w2, K))
    return jnp.concatenate(blocks, axis=0)


# ------------------------------- Pallas kernel ------------------------------ #

def _critic_kernel(p1_ref, p1g_ref, w1_ref, g1_ref, bt1_ref,
                   w2_ref, g2_ref, bt2_ref,
                   sel3_ref, w3_ref, g3_ref, bt3_ref,
                   act_ref,
                   w1f_ref, w1a_ref, b1_ref,
                   wf2_ref, b2_ref, wf3_ref, b3_ref,
                   o_ref):
    f32 = jnp.float32
    bf16 = jnp.bfloat16
    taps = KH * KW

    def bn_stats(y):
        # Training-mode BatchNorm statistics (biased variance), two-pass for
        # numerical robustness.  y: [M, C] f32.
        inv_m = 1.0 / y.shape[0]
        mean = jnp.sum(y, axis=0, keepdims=True) * inv_m
        d = y - mean
        var = jnp.sum(d * d, axis=0, keepdims=True) * inv_m
        return mean, lax.rsqrt(var + BN_EPS)

    def bn_apply_relu(y, mean, inv_std, gamma, beta):
        return jnp.maximum((y - mean) * inv_std * gamma + beta, 0.0)

    def conv_taps(p_stack_f32, w_ref):
        # p_stack_f32: [taps*M, Cin] tap-major stacked patch rows (f32).
        # 16 accumulating [M, Cin] x [Cin, Cout] bf16 GEMMs, one f32 accumulator.
        # Slices are 8-sublane aligned (M is 72 / 8 here); weight slices are
        # 16-sublane aligned (Cin = 32 / 64).
        m = p_stack_f32.shape[0] // taps
        c_in = w_ref.shape[0] // taps
        acc = jnp.zeros((m, w_ref.shape[1]), f32)
        for t in range(taps):
            lhs = p_stack_f32[t * m:(t + 1) * m, :].astype(bf16)
            rhs = w_ref[t * c_in:(t + 1) * c_in, :]
            acc = acc + jnp.dot(lhs, rhs, preferred_element_type=f32)
        return acc

    # ---- conv1: BN stats over ALL B*H1*W1 positions; activations materialized
    # ---- only at the host-gathered rows conv2 actually reads. ----------------
    w1 = w1_ref[...]
    y1_full = jnp.dot(p1_ref[...], w1, preferred_element_type=f32)  # [B*H1*W1, 32]
    mu1, inv1 = bn_stats(y1_full)
    y1g = jnp.dot(p1g_ref[...], w1, preferred_element_type=f32)     # [16*B*H2*W2, 32]
    p_stack2 = bn_apply_relu(y1g, mu1, inv1, g1_ref[...], bt1_ref[...])

    # ---- conv2 + BN + ReLU (activations never leave VMEM). -------------------
    y2 = conv_taps(p_stack2, w2_ref)                                # [B*H2*W2, 64]
    mu2, inv2 = bn_stats(y2)
    a2 = bn_apply_relu(y2, mu2, inv2, g2_ref[...], bt2_ref[...])

    # ---- conv3: tiny exact 0/1 gather GEMM + BN + ReLU. ----------------------
    p_stack3 = jnp.dot(sel3_ref[...], a2.astype(bf16),
                       preferred_element_type=f32)                  # [16*B*H3*W3, 64]
    y3 = conv_taps(p_stack3, w3_ref)                                # [B*H3*W3, 128]
    mu3, inv3 = bn_stats(y3)
    a3 = bn_apply_relu(y3, mu3, inv3, g3_ref[...], bt3_ref[...])

    # ---- AdaptiveAvgPool2d((1,1)) + Flatten: per-image row mean via an
    # ---- iota-built averaging matrix (no HBM constant, no misaligned slices).
    B = o_ref.shape[0]
    rows3 = a3.shape[0]
    spatial3 = rows3 // B
    b_idx = lax.broadcasted_iota(jnp.int32, (B, rows3), 0)
    r_idx = lax.broadcasted_iota(jnp.int32, (B, rows3), 1)
    in_img = (r_idx >= b_idx * spatial3) & (r_idx < (b_idx + 1) * spatial3)
    pool = jnp.where(in_img, 1.0 / spatial3, 0.0).astype(f32)       # [B, rows3]
    pooled = jnp.dot(pool, a3, preferred_element_type=f32)          # [B, 128]

    # ---- fc1: Linear(concat([features, action])) split into
    #   pooled @ W1f (bf16 MXU) + action @ W1a (2-wide, VPU broadcast FMAs).
    h = jnp.dot(pooled.astype(bf16), w1f_ref[...], preferred_element_type=f32)
    act = act_ref[...]
    w1a = w1a_ref[...]
    h = h + act[:, 0:1] * w1a[0:1, :] + act[:, 1:2] * w1a[1:2, :]
    h = jnp.maximum(h + b1_ref[...], 0.0)

    # ---- fc2 + ReLU, fc3. -----------------------------------------------------
    h = jnp.maximum(
        jnp.dot(h.astype(bf16), wf2_ref[...], preferred_element_type=f32)
        + b2_ref[...], 0.0)
    o_ref[...] = (jnp.dot(h.astype(bf16), wf3_ref[...], preferred_element_type=f32)
                  + b3_ref[...])


# ------------------------------ Pallas wrapper ------------------------------ #

def _vmem_specs(n):
    return [pl.BlockSpec(memory_space=pltpu.MemorySpace.VMEM) for _ in range(n)]


def critic_forward(params, state_nchw, action):
    """state_nchw: [B, 3, H, W] (PyTorch NCHW), action: [B, 2] -> [B, 1]."""
    bf = lambda a: a.astype(jnp.bfloat16)

    x = jnp.transpose(state_nchw.astype(jnp.float32), (0, 2, 3, 1))   # NHWC
    B, H, W, _ = x.shape
    H1, W1 = _conv_out(H), _conv_out(W)
    H2, W2 = _conv_out(H1), _conv_out(W1)
    H3, W3 = _conv_out(H2), _conv_out(W2)

    # conv1 im2col on the raw 3-channel image (small), plus the conv2-gathered
    # copy of those patch rows (tap-major).  This replaces the old ~1 MB dense
    # 0/1 selection GEMM entirely.
    p1, _, _ = im2col(x, KH, KW, STRIDE)                              # [B*H1*W1, 48]
    p1g = _gather_conv1_patches_for_conv2(p1.reshape(B, H1, W1, -1), H2, W2)

    # conv3's gather stays a tiny 0/1 matmul ([16*B*H3*W3, B*H2*W2] ~ 18 KB).
    sel3 = jnp.asarray(_selection_matrix(B, H2, W2, H3, W3), jnp.bfloat16)

    c1, c2, c3 = params["convs"]
    return pl.pallas_call(
        _critic_kernel,
        out_shape=jax.ShapeDtypeStruct((B, 1), jnp.float32),
        in_specs=_vmem_specs(20),
        out_specs=pl.BlockSpec(memory_space=pltpu.MemorySpace.VMEM),
        # Real footprint is ~3-4 MB; keep a margin but stay well under v7x's
        # 64 MiB physical VMEM (was 32 MiB before).
        compiler_params=pltpu.CompilerParams(vmem_limit_bytes=8 * 1024 * 1024),
    )(bf(p1), bf(p1g), bf(c1["w"]), c1["gamma"], c1["beta"],
      bf(c2["w"]), c2["gamma"], c2["beta"],
      sel3, bf(c3["w"]), c3["gamma"], c3["beta"],
      action.astype(jnp.float32),
      bf(params["w1f"]), params["w1a"], params["b1"],
      bf(params["w2"]), params["b2"],
      bf(params["w3"]), params["b3"])


# ----------------------------------- init ----------------------------------- #

def init_params(key):
    ks = jax.random.split(key, 10)
    idx = 0

    def nrm(shape, fan_in):
        nonlocal idx
        w = jax.random.normal(ks[idx], shape, jnp.float32) / jnp.sqrt(float(fan_in))
        idx += 1
        return w

    convs = []
    cin = 3
    for cout in (32, 64, 128):
        k = KH * KW * cin
        convs.append({
            # rows ordered (tap = i*4+j, cin) -> cout; conv bias omitted: it is
            # exactly cancelled by the training-mode BatchNorm that follows.
            "w": nrm((k, cout), k),
            "gamma": jnp.ones((1, cout), jnp.float32),
            "beta": jnp.zeros((1, cout), jnp.float32),
        })
        cin = cout

    n_flat = 128                      # AdaptiveAvgPool2d((1,1)) -> 128 features
    return {
        "convs": convs,
        "w1f": nrm((n_flat, 64), n_flat + 2),   # feature half of fc1 weight
        "w1a": nrm((2, 64), n_flat + 2),        # action half of fc1 weight
        "b1": 0.01 * nrm((1, 64), 1.0),
        "w2": nrm((64, 64), 64),
        "b2": 0.01 * nrm((1, 64), 1.0),
        "w3": nrm((64, 1), 64),
        "b3": 0.01 * nrm((1, 1), 1.0),
    }


# --------------------------------- reference -------------------------------- #

def reference_forward(params, state_nchw, action):
    """Pure-JAX reference (same bf16 GEMM operands, f32 accumulation)."""
    bf = lambda a: a.astype(jnp.bfloat16)
    x = jnp.transpose(state_nchw.astype(jnp.float32), (0, 2, 3, 1))
    B = x.shape[0]
    a = x
    for layer in params["convs"]:
        p, Ho, Wo = im2col(a, KH, KW, STRIDE)
        y = jnp.dot(bf(p), bf(layer["w"]), preferred_element_type=jnp.float32)
        mean = y.mean(axis=0, keepdims=True)
        var = ((y - mean) ** 2).mean(axis=0, keepdims=True)
        y = (y - mean) * lax.rsqrt(var + BN_EPS) * layer["gamma"] + layer["beta"]
        a = jnp.maximum(y, 0.0).reshape(B, Ho, Wo, -1)
    pooled = a.mean(axis=(1, 2))                                        # [B, 128]
    act = action.astype(jnp.float32)
    h = jnp.dot(bf(pooled), bf(params["w1f"]), preferred_element_type=jnp.float32)
    h = jnp.maximum(h + act @ params["w1a"] + params["b1"], 0.0)
    h = jnp.maximum(
        jnp.dot(bf(h), bf(params["w2"]), preferred_element_type=jnp.float32)
        + params["b2"], 0.0)
    return (jnp.dot(bf(h), bf(params["w3"]), preferred_element_type=jnp.float32)
            + params["b3"])


# ----------------------------------- main ------------------------------------ #

if __name__ == "__main__":
    key = jax.random.PRNGKey(0)
    kp, ks, ka = jax.random.split(key, 3)

    params = init_params(kp)
    # Small shapes consistent with the module (3-channel image, 2-dim action).
    state = jax.random.normal(ks, (2, 3, 32, 32), jnp.float32)          # NCHW
    action = jax.random.normal(ka, (2, 2), jnp.float32)

    fwd = jax.jit(critic_forward)
    out = jax.block_until_ready(fwd(params, state, action))
    ref = jax.block_until_ready(reference_forward(params, state, action))

    assert out.shape == (2, 1), out.shape
    assert bool(jnp.all(jnp.isfinite(out)))
    # bf16 GEMM operands (f32 accumulation) + different-but-equivalent op
    # grouping in the fused kernel -> compare with a bf16-appropriate tolerance.
    assert bool(jnp.allclose(out, ref, rtol=3e-2, atol=3e-2)), (out, ref)
    print("KERNEL_OK")
</pallas_src>

<mosaic_0001>
module attributes {stable_mosaic.version = 11 : i64} {
  func.func @_critic_kernel(%arg0: memref<450x48xbf16, #tpu.memory_space<vmem>>, %arg1: memref<1152x48xbf16, #tpu.memory_space<vmem>>, %arg2: memref<48x32xbf16, #tpu.memory_space<vmem>>, %arg3: memref<1x32xf32, #tpu.memory_space<vmem>>, %arg4: memref<1x32xf32, #tpu.memory_space<vmem>>, %arg5: memref<512x64xbf16, #tpu.memory_space<vmem>>, %arg6: memref<1x64xf32, #tpu.memory_space<vmem>>, %arg7: memref<1x64xf32, #tpu.memory_space<vmem>>, %arg8: memref<128x72xbf16, #tpu.memory_space<vmem>>, %arg9: memref<1024x128xbf16, #tpu.memory_space<vmem>>, %arg10: memref<1x128xf32, #tpu.memory_space<vmem>>, %arg11: memref<1x128xf32, #tpu.memory_space<vmem>>, %arg12: memref<2x2xf32, #tpu.memory_space<vmem>>, %arg13: memref<128x64xbf16, #tpu.memory_space<vmem>>, %arg14: memref<2x64xf32, #tpu.memory_space<vmem>>, %arg15: memref<1x64xf32, #tpu.memory_space<vmem>>, %arg16: memref<64x64xbf16, #tpu.memory_space<vmem>>, %arg17: memref<1x64xf32, #tpu.memory_space<vmem>>, %arg18: memref<64x1xbf16, #tpu.memory_space<vmem>>, %arg19: memref<1x1xf32, #tpu.memory_space<vmem>>, %arg20: memref<2x1xf32, #tpu.memory_space<vmem>>) attributes {dimension_semantics = [], scalar_prefetch = 0 : i64, scratch_operands = 0 : i64, tpu.core_type = #tpu.core_type<tc>} {
    %c0 = arith.constant 0 : index
    %c0_0 = arith.constant 0 : index
    %0 = vector.load %arg2[%c0, %c0_0] : memref<48x32xbf16, #tpu.memory_space<vmem>>, vector<48x32xbf16>
    %c0_1 = arith.constant 0 : index
    %c0_2 = arith.constant 0 : index
    %1 = vector.load %arg0[%c0_1, %c0_2] : memref<450x48xbf16, #tpu.memory_space<vmem>>, vector<450x48xbf16>
    %cst = arith.constant dense<0.000000e+00> : vector<450x32xf32>
    %2 = tpu.matmul %1, %0, %cst {dimension_numbers = #tpu.dot_dimension_numbers<[1], [0], [0], [1], [0, 0, 1, 1], [], []>} : vector<450x48xbf16>, vector<48x32xbf16>, vector<450x32xf32> -> vector<450x32xf32>
    %cst_3 = arith.constant dense<0.000000e+00> : vector<32xf32>
    %3 = vector.multi_reduction <add>, %2, %cst_3 [0] : vector<450x32xf32> to vector<32xf32>
    %4 = vector.shape_cast %3 : vector<32xf32> to vector<1x32xf32>
    %cst_4 = arith.constant 0.00222222228 : f32
    %5 = vector.broadcast %cst_4 : f32 to vector<1x32xf32>
    %6 = arith.mulf %4, %5 : vector<1x32xf32>
    %7 = vector.broadcast %6 : vector<1x32xf32> to vector<450x32xf32>
    %8 = arith.subf %2, %7 : vector<450x32xf32>
    %9 = arith.mulf %8, %8 : vector<450x32xf32>
    %cst_5 = arith.constant dense<0.000000e+00> : vector<32xf32>
    %10 = vector.multi_reduction <add>, %9, %cst_5 [0] : vector<450x32xf32> to vector<32xf32>
    %11 = vector.shape_cast %10 : vector<32xf32> to vector<1x32xf32>
    %cst_6 = arith.constant 0.00222222228 : f32
    %12 = vector.broadcast %cst_6 : f32 to vector<1x32xf32>
    %13 = arith.mulf %11, %12 : vector<1x32xf32>
    %cst_7 = arith.constant 9.99999974E-6 : f32
    %14 = vector.broadcast %cst_7 : f32 to vector<1x32xf32>
    %15 = arith.addf %13, %14 : vector<1x32xf32>
    %16 = math.rsqrt %15 : vector<1x32xf32>
    %c0_8 = arith.constant 0 : index
    %c0_9 = arith.constant 0 : index
    %17 = vector.load %arg1[%c0_8, %c0_9] : memref<1152x48xbf16, #tpu.memory_space<vmem>>, vector<1152x48xbf16>
    %cst_10 = arith.constant dense<0.000000e+00> : vector<1152x32xf32>
    %18 = tpu.matmul %17, %0, %cst_10 {dimension_numbers = #tpu.dot_dimension_numbers<[1], [0], [0], [1], [0, 0, 1, 1], [], []>} : vector<1152x48xbf16>, vector<48x32xbf16>, vector<1152x32xf32> -> vector<1152x32xf32>
    %c0_11 = arith.constant 0 : index
    %c0_12 = arith.constant 0 : index
    %19 = vector.load %arg3[%c0_11, %c0_12] : memref<1x32xf32, #tpu.memory_space<vmem>>, vector<1x32xf32>
    %c0_13 = arith.constant 0 : index
    %c0_14 = arith.constant 0 : index
    %20 = vector.load %arg4[%c0_13, %c0_14] : memref<1x32xf32, #tpu.memory_space<vmem>>, vector<1x32xf32>
    %21 = vector.broadcast %6 : vector<1x32xf32> to vector<1152x32xf32>
    %22 = arith.subf %18, %21 : vector<1152x32xf32>
    %23 = vector.broadcast %16 : vector<1x32xf32> to vector<1152x32xf32>
    %24 = arith.mulf %22, %23 : vector<1152x32xf32>
    %25 = vector.broadcast %19 : vector<1x32xf32> to vector<1152x32xf32>
    %26 = arith.mulf %24, %25 : vector<1152x32xf32>
    %27 = vector.broadcast %20 : vector<1x32xf32> to vector<1152x32xf32>
    %28 = arith.addf %26, %27 : vector<1152x32xf32>
    %cst_15 = arith.constant 0.000000e+00 : f32
    %29 = vector.broadcast %cst_15 : f32 to vector<1152x32xf32>
    %30 = arith.maximumf %28, %29 : vector<1152x32xf32>
    %cst_16 = arith.constant 0.000000e+00 : f32
    %31 = vector.broadcast %cst_16 : f32 to vector<72x64xf32>
    %32 = vector.extract_strided_slice %30 {offsets = [0, 0], sizes = [72, 32], strides = [1, 1]} : vector<1152x32xf32> to vector<72x32xf32>
    %33 = arith.truncf %32 : vector<72x32xf32> to vector<72x32xbf16>
    %c0_17 = arith.constant 0 : index
    %c0_18 = arith.constant 0 : index
    %34 = vector.load %arg5[%c0_17, %c0_18] : memref<512x64xbf16, #tpu.memory_space<vmem>>, vector<32x64xbf16>
    %cst_19 = arith.constant dense<0.000000e+00> : vector<72x64xf32>
    %35 = tpu.matmul %33, %34, %cst_19 {dimension_numbers = #tpu.dot_dimension_numbers<[1], [0], [0], [1], [0, 0, 1, 1], [], []>} : vector<72x32xbf16>, vector<32x64xbf16>, vector<72x64xf32> -> vector<72x64xf32>
    %36 = arith.addf %31, %35 : vector<72x64xf32>
    %37 = vector.extract_strided_slice %30 {offsets = [72, 0], sizes = [72, 32], strides = [1, 1]} : vector<1152x32xf32> to vector<72x32xf32>
    %38 = arith.truncf %37 : vector<72x32xf32> to vector<72x32xbf16>
    %c32 = arith.constant 32 : index
    %c0_20 = arith.constant 0 : index
    %39 = vector.load %arg5[%c32, %c0_20] : memref<512x64xbf16, #tpu.memory_space<vmem>>, vector<32x64xbf16>
    %cst_21 = arith.constant dense<0.000000e+00> : vector<72x64xf32>
    %40 = tpu.matmul %38, %39, %cst_21 {dimension_numbers = #tpu.dot_dimension_numbers<[1], [0], [0], [1], [0, 0, 1, 1], [], []>} : vector<72x32xbf16>, vector<32x64xbf16>, vector<72x64xf32> -> vector<72x64xf32>
    %41 = arith.addf %36, %40 : vector<72x64xf32>
    %42 = vector.extract_strided_slice %30 {offsets = [144, 0], sizes = [72, 32], strides = [1, 1]} : vector<1152x32xf32> to vector<72x32xf32>
    %43 = arith.truncf %42 : vector<72x32xf32> to vector<72x32xbf16>
    %c64 = arith.constant 64 : index
    %c0_22 = arith.constant 0 : index
    %44 = vector.load %arg5[%c64, %c0_22] : memref<512x64xbf16, #tpu.memory_space<vmem>>, vector<32x64xbf16>
    %cst_23 = arith.constant dense<0.000000e+00> : vector<72x64xf32>
    %45 = tpu.matmul %43, %44, %cst_23 {dimension_numbers = #tpu.dot_dimension_numbers<[1], [0], [0], [1], [0, 0, 1, 1], [], []>} : vector<72x32xbf16>, vector<32x64xbf16>, vector<72x64xf32> -> vector<72x64xf32>
    %46 = arith.addf %41, %45 : vector<72x64xf32>
    %47 = vector.extract_strided_slice %30 {offsets = [216, 0], sizes = [72, 32], strides = [1, 1]} : vector<1152x32xf32> to vector<72x32xf32>
    %48 = arith.truncf %47 : vector<72x32xf32> to vector<72x32xbf16>
    %c96 = arith.constant 96 : index
    %c0_24 = arith.constant 0 : index
    %49 = vector.load %arg5[%c96, %c0_24] : memref<512x64xbf16, #tpu.memory_space<vmem>>, vector<32x64xbf16>
    %cst_25 = arith.constant dense<0.000000e+00> : vector<72x64xf32>
    %50 = tpu.matmul %48, %49, %cst_25 {dimension_numbers = #tpu.dot_dimension_numbers<[1], [0], [0], [1], [0, 0, 1, 1], [], []>} : vector<72x32xbf16>, vector<32x64xbf16>, vector<72x64xf32> -> vector<72x64xf32>
    %51 = arith.addf %46, %50 : vector<72x64xf32>
    %52 = vector.extract_strided_slice %30 {offsets = [288, 0], sizes = [72, 32], strides = [1, 1]} : vector<1152x32xf32> to vector<72x32xf32>
    %53 = arith.truncf %52 : vector<72x32xf32> to vector<72x32xbf16>
    %c128 = arith.constant 128 : index
    %c0_26 = arith.constant 0 : index
    %54 = vector.load %arg5[%c128, %c0_26] : memref<512x64xbf16, #tpu.memory_space<vmem>>, vector<32x64xbf16>
    %cst_27 = arith.constant dense<0.000000e+00> : vector<72x64xf32>
    %55 = tpu.matmul %53, %54, %cst_27 {dimension_numbers = #tpu.dot_dimension_numbers<[1], [0], [0], [1], [0, 0, 1, 1], [], []>} : vector<72x32xbf16>, vector<32x64xbf16>, vector<72x64xf32> -> vector<72x64xf32>
    %56 = arith.addf %51, %55 : vector<72x64xf32>
    %57 = vector.extract_strided_slice %30 {offsets = [360, 0], sizes = [72, 32], strides = [1, 1]} : vector<1152x32xf32> to vector<72x32xf32>
    %58 = arith.truncf %57 : vector<72x32xf32> to vector<72x32xbf16>
    %c160 = arith.constant 160 : index
    %c0_28 = arith.constant 0 : index
    %59 = vector.load %arg5[%c160, %c0_28] : memref<512x64xbf16, #tpu.memory_space<vmem>>, vector<32x64xbf16>
    %cst_29 = arith.constant dense<0.000000e+00> : vector<72x64xf32>
    %60 = tpu.matmul %58, %59, %cst_29 {dimension_numbers = #tpu.dot_dimension_numbers<[1], [0], [0], [1], [0, 0, 1, 1], [], []>} : vector<72x32xbf16>, vector<32x64xbf16>, vector<72x64xf32> -> vector<72x64xf32>
    %61 = arith.addf %56, %60 : vector<72x64xf32>
    %62 = vector.extract_strided_slice %30 {offsets = [432, 0], sizes = [72, 32], strides = [1, 1]} : vector<1152x32xf32> to vector<72x32xf32>
    %63 = arith.truncf %62 : vector<72x32xf32> to vector<72x32xbf16>
    %c192 = arith.constant 192 : index
    %c0_30 = arith.constant 0 : index
    %64 = vector.load %arg5[%c192, %c0_30] : memref<512x64xbf16, #tpu.memory_space<vmem>>, vector<32x64xbf16>
    %cst_31 = arith.constant dense<0.000000e+00> : vector<72x64xf32>
    %65 = tpu.matmul %63, %64, %cst_31 {dimension_numbers = #tpu.dot_dimension_numbers<[1], [0], [0], [1], [0, 0, 1, 1], [], []>} : vector<72x32xbf16>, vector<32x64xbf16>, vector<72x64xf32> -> vector<72x64xf32>
    %66 = arith.addf %61, %65 : vector<72x64xf32>
    %67 = vector.extract_strided_slice %30 {offsets = [504, 0], sizes = [72, 32], strides = [1, 1]} : vector<1152x32xf32> to vector<72x32xf32>
    %68 = arith.truncf %67 : vector<72x32xf32> to vector<72x32xbf16>
    %c224 = arith.constant 224 : index
    %c0_32 = arith.constant 0 : index
    %69 = vector.load %arg5[%c224, %c0_32] : memref<512x64xbf16, #tpu.memory_space<vmem>>, vector<32x64xbf16>
    %cst_33 = arith.constant dense<0.000000e+00> : vector<72x64xf32>
    %70 = tpu.matmul %68, %69, %cst_33 {dimension_numbers = #tpu.dot_dimension_numbers<[1], [0], [0], [1], [0, 0, 1, 1], [], []>} : vector<72x32xbf16>, vector<32x64xbf16>, vector<72x64xf32> -> vector<72x64xf32>
    %71 = arith.addf %66, %70 : vector<72x64xf32>
    %72 = vector.extract_strided_slice %30 {offsets = [576, 0], sizes = [72, 32], strides = [1, 1]} : vector<1152x32xf32> to vector<72x32xf32>
    %73 = arith.truncf %72 : vector<72x32xf32> to vector<72x32xbf16>
    %c256 = arith.constant 256 : index
    %c0_34 = arith.constant 0 : index
    %74 = vector.load %arg5[%c256, %c0_34] : memref<512x64xbf16, #tpu.memory_space<vmem>>, vector<32x64xbf16>
    %cst_35 = arith.constant dense<0.000000e+00> : vector<72x64xf32>
    %75 = tpu.matmul %73, %74, %cst_35 {dimension_numbers = #tpu.dot_dimension_numbers<[1], [0], [0], [1], [0, 0, 1, 1], [], []>} : vector<72x32xbf16>, vector<32x64xbf16>, vector<72x64xf32> -> vector<72x64xf32>
    %76 = arith.addf %71, %75 : vector<72x64xf32>
    %77 = vector.extract_strided_slice %30 {offsets = [648, 0], sizes = [72, 32], strides = [1, 1]} : vector<1152x32xf32> to vector<72x32xf32>
    %78 = arith.truncf %77 : vector<72x32xf32> to vector<72x32xbf16>
    %c288 = arith.constant 288 : index
    %c0_36 = arith.constant 0 : index
    %79 = vector.load %arg5[%c288, %c0_36] : memref<512x64xbf16, #tpu.memory_space<vmem>>, vector<32x64xbf16>
    %cst_37 = arith.constant dense<0.000000e+00> : vector<72x64xf32>
    %80 = tpu.matmul %78, %79, %cst_37 {dimension_numbers = #tpu.dot_dimension_numbers<[1], [0], [0], [1], [0, 0, 1, 1], [], []>} : vector<72x32xbf16>, vector<32x64xbf16>, vector<72x64xf32> -> vector<72x64xf32>
    %81 = arith.addf %76, %80 : vector<72x64xf32>
    %82 = vector.extract_strided_slice %30 {offsets = [720, 0], sizes = [72, 32], strides = [1, 1]} : vector<1152x32xf32> to vector<72x32xf32>
    %83 = arith.truncf %82 : vector<72x32xf32> to vector<72x32xbf16>
    %c320 = arith.constant 320 : index
    %c0_38 = arith.constant 0 : index
    %84 = vector.load %arg5[%c320, %c0_38] : memref<512x64xbf16, #tpu.memory_space<vmem>>, vector<32x64xbf16>
    %cst_39 = arith.constant dense<0.000000e+00> : vector<72x64xf32>
    %85 = tpu.matmul %83, %84, %cst_39 {dimension_numbers = #tpu.dot_dimension_numbers<[1], [0], [0], [1], [0, 0, 1, 1], [], []>} : vector<72x32xbf16>, vector<32x64xbf16>, vector<72x64xf32> -> vector<72x64xf32>
    %86 = arith.addf %81, %85 : vector<72x64xf32>
    %87 = vector.extract_strided_slice %30 {offsets = [792, 0], sizes = [72, 32], strides = [1, 1]} : vector<1152x32xf32> to vector<72x32xf32>
    %88 = arith.truncf %87 : vector<72x32xf32> to vector<72x32xbf16>
    %c352 = arith.constant 352 : index
    %c0_40 = arith.constant 0 : index
    %89 = vector.load %arg5[%c352, %c0_40] : memref<512x64xbf16, #tpu.memory_space<vmem>>, vector<32x64xbf16>
    %cst_41 = arith.constant dense<0.000000e+00> : vector<72x64xf32>
    %90 = tpu.matmul %88, %89, %cst_41 {dimension_numbers = #tpu.dot_dimension_numbers<[1], [0], [0], [1], [0, 0, 1, 1], [], []>} : vector<72x32xbf16>, vector<32x64xbf16>, vector<72x64xf32> -> vector<72x64xf32>
    %91 = arith.addf %86, %90 : vector<72x64xf32>
    %92 = vector.extract_strided_slice %30 {offsets = [864, 0], sizes = [72, 32], strides = [1, 1]} : vector<1152x32xf32> to vector<72x32xf32>
    %93 = arith.truncf %92 : vector<72x32xf32> to vector<72x32xbf16>
    %c384 = arith.constant 384 : index
    %c0_42 = arith.constant 0 : index
    %94 = vector.load %arg5[%c384, %c0_42] : memref<512x64xbf16, #tpu.memory_space<vmem>>, vector<32x64xbf16>
    %cst_43 = arith.constant dense<0.000000e+00> : vector<72x64xf32>
    %95 = tpu.matmul %93, %94, %cst_43 {dimension_numbers = #tpu.dot_dimension_numbers<[1], [0], [0], [1], [0, 0, 1, 1], [], []>} : vector<72x32xbf16>, vector<32x64xbf16>, vector<72x64xf32> -> vector<72x64xf32>
    %96 = arith.addf %91, %95 : vector<72x64xf32>
    %97 = vector.extract_strided_slice %30 {offsets = [936, 0], sizes = [72, 32], strides = [1, 1]} : vector<1152x32xf32> to vector<72x32xf32>
    %98 = arith.truncf %97 : vector<72x32xf32> to vector<72x32xbf16>
    %c416 = arith.constant 416 : index
    %c0_44 = arith.constant 0 : index
    %99 = vector.load %arg5[%c416, %c0_44] : memref<512x64xbf16, #tpu.memory_space<vmem>>, vector<32x64xbf16>
    %cst_45 = arith.constant dense<0.000000e+00> : vector<72x64xf32>
    %100 = tpu.matmul %98, %99, %cst_45 {dimension_numbers = #tpu.dot_dimension_numbers<[1], [0], [0], [1], [0, 0, 1, 1], [], []>} : vector<72x32xbf16>, vector<32x64xbf16>, vector<72x64xf32> -> vector<72x64xf32>
    %101 = arith.addf %96, %100 : vector<72x64xf32>
    %102 = vector.extract_strided_slice %30 {offsets = [1008, 0], sizes = [72, 32], strides = [1, 1]} : vector<1152x32xf32> to vector<72x32xf32>
    %103 = arith.truncf %102 : vector<72x32xf32> to vector<72x32xbf16>
    %c448 = arith.constant 448 : index
    %c0_46 = arith.constant 0 : index
    %104 = vector.load %arg5[%c448, %c0_46] : memref<512x64xbf16, #tpu.memory_space<vmem>>, vector<32x64xbf16>
    %cst_47 = arith.constant dense<0.000000e+00> : vector<72x64xf32>
    %105 = tpu.matmul %103, %104, %cst_47 {dimension_numbers = #tpu.dot_dimension_numbers<[1], [0], [0], [1], [0, 0, 1, 1], [], []>} : vector<72x32xbf16>, vector<32x64xbf16>, vector<72x64xf32> -> vector<72x64xf32>
    %106 = arith.addf %101, %105 : vector<72x64xf32>
    %107 = vector.extract_strided_slice %30 {offsets = [1080, 0], sizes = [72, 32], strides = [1, 1]} : vector<1152x32xf32> to vector<72x32xf32>
    %108 = arith.truncf %107 : vector<72x32xf32> to vector<72x32xbf16>
    %c480 = arith.constant 480 : index
    %c0_48 = arith.constant 0 : index
    %109 = vector.load %arg5[%c480, %c0_48] : memref<512x64xbf16, #tpu.memory_space<vmem>>, vector<32x64xbf16>
    %cst_49 = arith.constant dense<0.000000e+00> : vector<72x64xf32>
    %110 = tpu.matmul %108, %109, %cst_49 {dimension_numbers = #tpu.dot_dimension_numbers<[1], [0], [0], [1], [0, 0, 1, 1], [], []>} : vector<72x32xbf16>, vector<32x64xbf16>, vector<72x64xf32> -> vector<72x64xf32>
    %111 = arith.addf %106, %110 : vector<72x64xf32>
    %cst_50 = arith.constant dense<0.000000e+00> : vector<64xf32>
    %112 = vector.multi_reduction <add>, %111, %cst_50 [0] : vector<72x64xf32> to vector<64xf32>
    %113 = vector.shape_cast %112 : vector<64xf32> to vector<1x64xf32>
    %cst_51 = arith.constant 0.013888889 : f32
    %114 = vector.broadcast %cst_51 : f32 to vector<1x64xf32>
    %115 = arith.mulf %113, %114 : vector<1x64xf32>
    %116 = vector.broadcast %115 : vector<1x64xf32> to vector<72x64xf32>
    %117 = arith.subf %111, %116 : vector<72x64xf32>
    %118 = arith.mulf %117, %117 : vector<72x64xf32>
    %cst_52 = arith.constant dense<0.000000e+00> : vector<64xf32>
    %119 = vector.multi_reduction <add>, %118, %cst_52 [0] : vector<72x64xf32> to vector<64xf32>
    %120 = vector.shape_cast %119 : vector<64xf32> to vector<1x64xf32>
    %cst_53 = arith.constant 0.013888889 : f32
    %121 = vector.broadcast %cst_53 : f32 to vector<1x64xf32>
    %122 = arith.mulf %120, %121 : vector<1x64xf32>
    %cst_54 = arith.constant 9.99999974E-6 : f32
    %123 = vector.broadcast %cst_54 : f32 to vector<1x64xf32>
    %124 = arith.addf %122, %123 : vector<1x64xf32>
    %125 = math.rsqrt %124 : vector<1x64xf32>
    %c0_55 = arith.constant 0 : index
    %c0_56 = arith.constant 0 : index
    %126 = vector.load %arg6[%c0_55, %c0_56] : memref<1x64xf32, #tpu.memory_space<vmem>>, vector<1x64xf32>
    %c0_57 = arith.constant 0 : index
    %c0_58 = arith.constant 0 : index
    %127 = vector.load %arg7[%c0_57, %c0_58] : memref<1x64xf32, #tpu.memory_space<vmem>>, vector<1x64xf32>
    %128 = vector.broadcast %115 : vector<1x64xf32> to vector<72x64xf32>
    %129 = arith.subf %111, %128 : vector<72x64xf32>
    %130 = vector.broadcast %125 : vector<1x64xf32> to vector<72x64xf32>
    %131 = arith.mulf %129, %130 : vector<72x64xf32>
    %132 = vector.broadcast %126 : vector<1x64xf32> to vector<72x64xf32>
    %133 = arith.mulf %131, %132 : vector<72x64xf32>
    %134 = vector.broadcast %127 : vector<1x64xf32> to vector<72x64xf32>
    %135 = arith.addf %133, %134 : vector<72x64xf32>
    %cst_59 = arith.constant 0.000000e+00 : f32
    %136 = vector.broadcast %cst_59 : f32 to vector<72x64xf32>
    %137 = arith.maximumf %135, %136 : vector<72x64xf32>
    %c0_60 = arith.constant 0 : index
    %c0_61 = arith.constant 0 : index
    %138 = vector.load %arg8[%c0_60, %c0_61] : memref<128x72xbf16, #tpu.memory_space<vmem>>, vector<128x72xbf16>
    %139 = arith.truncf %137 : vector<72x64xf32> to vector<72x64xbf16>
    %cst_62 = arith.constant dense<0.000000e+00> : vector<128x64xf32>
    %140 = tpu.matmul %138, %139, %cst_62 {dimension_numbers = #tpu.dot_dimension_numbers<[1], [0], [0], [1], [0, 0, 1, 1], [], []>} : vector<128x72xbf16>, vector<72x64xbf16>, vector<128x64xf32> -> vector<128x64xf32>
    %cst_63 = arith.constant 0.000000e+00 : f32
    %141 = vector.broadcast %cst_63 : f32 to vector<8x128xf32>
    %142 = vector.extract_strided_slice %140 {offsets = [0, 0], sizes = [8, 64], strides = [1, 1]} : vector<128x64xf32> to vector<8x64xf32>
    %143 = arith.truncf %142 : vector<8x64xf32> to vector<8x64xbf16>
    %c0_64 = arith.constant 0 : index
    %c0_65 = arith.constant 0 : index
    %144 = vector.load %arg9[%c0_64, %c0_65] : memref<1024x128xbf16, #tpu.memory_space<vmem>>, vector<64x128xbf16>
    %cst_66 = arith.constant dense<0.000000e+00> : vector<8x128xf32>
    %145 = tpu.matmul %143, %144, %cst_66 {dimension_numbers = #tpu.dot_dimension_numbers<[1], [0], [0], [1], [0, 0, 1, 1], [], []>} : vector<8x64xbf16>, vector<64x128xbf16>, vector<8x128xf32> -> vector<8x128xf32>
    %146 = arith.addf %141, %145 : vector<8x128xf32>
    %147 = vector.extract_strided_slice %140 {offsets = [8, 0], sizes = [8, 64], strides = [1, 1]} : vector<128x64xf32> to vector<8x64xf32>
    %148 = arith.truncf %147 : vector<8x64xf32> to vector<8x64xbf16>
    %c64_67 = arith.constant 64 : index
    %c0_68 = arith.constant 0 : index
    %149 = vector.load %arg9[%c64_67, %c0_68] : memref<1024x128xbf16, #tpu.memory_space<vmem>>, vector<64x128xbf16>
    %cst_69 = arith.constant dense<0.000000e+00> : vector<8x128xf32>
    %150 = tpu.matmul %148, %149, %cst_69 {dimension_numbers = #tpu.dot_dimension_numbers<[1], [0], [0], [1], [0, 0, 1, 1], [], []>} : vector<8x64xbf16>, vector<64x128xbf16>, vector<8x128xf32> -> vector<8x128xf32>
    %151 = arith.addf %146, %150 : vector<8x128xf32>
    %152 = vector.extract_strided_slice %140 {offsets = [16, 0], sizes = [8, 64], strides = [1, 1]} : vector<128x64xf32> to vector<8x64xf32>
    %153 = arith.truncf %152 : vector<8x64xf32> to vector<8x64xbf16>
    %c128_70 = arith.constant 128 : index
    %c0_71 = arith.constant 0 : index
    %154 = vector.load %arg9[%c128_70, %c0_71] : memref<1024x128xbf16, #tpu.memory_space<vmem>>, vector<64x128xbf16>
    %cst_72 = arith.constant dense<0.000000e+00> : vector<8x128xf32>
    %155 = tpu.matmul %153, %154, %cst_72 {dimension_numbers = #tpu.dot_dimension_numbers<[1], [0], [0], [1], [0, 0, 1, 1], [], []>} : vector<8x64xbf16>, vector<64x128xbf16>, vector<8x128xf32> -> vector<8x128xf32>
    %156 = arith.addf %151, %155 : vector<8x128xf32>
    %157 = vector.extract_strided_slice %140 {offsets = [24, 0], sizes = [8, 64], strides = [1, 1]} : vector<128x64xf32> to vector<8x64xf32>
    %158 = arith.truncf %157 : vector<8x64xf32> to vector<8x64xbf16>
    %c192_73 = arith.constant 192 : index
    %c0_74 = arith.constant 0 : index
    %159 = vector.load %arg9[%c192_73, %c0_74] : memref<1024x128xbf16, #tpu.memory_space<vmem>>, vector<64x128xbf16>
    %cst_75 = arith.constant dense<0.000000e+00> : vector<8x128xf32>
    %160 = tpu.matmul %158, %159, %cst_75 {dimension_numbers = #tpu.dot_dimension_numbers<[1], [0], [0], [1], [0, 0, 1, 1], [], []>} : vector<8x64xbf16>, vector<64x128xbf16>, vector<8x128xf32> -> vector<8x128xf32>
    %161 = arith.addf %156, %160 : vector<8x128xf32>
    %162 = vector.extract_strided_slice %140 {offsets = [32, 0], sizes = [8, 64], strides = [1, 1]} : vector<128x64xf32> to vector<8x64xf32>
    %163 = arith.truncf %162 : vector<8x64xf32> to vector<8x64xbf16>
    %c256_76 = arith.constant 256 : index
    %c0_77 = arith.constant 0 : index
    %164 = vector.load %arg9[%c256_76, %c0_77] : memref<1024x128xbf16, #tpu.memory_space<vmem>>, vector<64x128xbf16>
    %cst_78 = arith.constant dense<0.000000e+00> : vector<8x128xf32>
    %165 = tpu.matmul %163, %164, %cst_78 {dimension_numbers = #tpu.dot_dimension_numbers<[1], [0], [0], [1], [0, 0, 1, 1], [], []>} : vector<8x64xbf16>, vector<64x128xbf16>, vector<8x128xf32> -> vector<8x128xf32>
    %166 = arith.addf %161, %165 : vector<8x128xf32>
    %167 = vector.extract_strided_slice %140 {offsets = [40, 0], sizes = [8, 64], strides = [1, 1]} : vector<128x64xf32> to vector<8x64xf32>
    %168 = arith.truncf %167 : vector<8x64xf32> to vector<8x64xbf16>
    %c320_79 = arith.constant 320 : index
    %c0_80 = arith.constant 0 : index
    %169 = vector.load %arg9[%c320_79, %c0_80] : memref<1024x128xbf16, #tpu.memory_space<vmem>>, vector<64x128xbf16>
    %cst_81 = arith.constant dense<0.000000e+00> : vector<8x128xf32>
    %170 = tpu.matmul %168, %169, %cst_81 {dimension_numbers = #tpu.dot_dimension_numbers<[1], [0], [0], [1], [0, 0, 1, 1], [], []>} : vector<8x64xbf16>, vector<64x128xbf16>, vector<8x128xf32> -> vector<8x128xf32>
    %171 = arith.addf %166, %170 : vector<8x128xf32>
    %172 = vector.extract_strided_slice %140 {offsets = [48, 0], sizes = [8, 64], strides = [1, 1]} : vector<128x64xf32> to vector<8x64xf32>
    %173 = arith.truncf %172 : vector<8x64xf32> to vector<8x64xbf16>
    %c384_82 = arith.constant 384 : index
    %c0_83 = arith.constant 0 : index
    %174 = vector.load %arg9[%c384_82, %c0_83] : memref<1024x128xbf16, #tpu.memory_space<vmem>>, vector<64x128xbf16>
    %cst_84 = arith.constant dense<0.000000e+00> : vector<8x128xf32>
    %175 = tpu.matmul %173, %174, %cst_84 {dimension_numbers = #tpu.dot_dimension_numbers<[1], [0], [0], [1], [0, 0, 1, 1], [], []>} : vector<8x64xbf16>, vector<64x128xbf16>, vector<8x128xf32> -> vector<8x128xf32>
    %176 = arith.addf %171, %175 : vector<8x128xf32>
    %177 = vector.extract_strided_slice %140 {offsets = [56, 0], sizes = [8, 64], strides = [1, 1]} : vector<128x64xf32> to vector<8x64xf32>
    %178 = arith.truncf %177 : vector<8x64xf32> to vector<8x64xbf16>
    %c448_85 = arith.constant 448 : index
    %c0_86 = arith.constant 0 : index
    %179 = vector.load %arg9[%c448_85, %c0_86] : memref<1024x128xbf16, #tpu.memory_space<vmem>>, vector<64x128xbf16>
    %cst_87 = arith.constant dense<0.000000e+00> : vector<8x128xf32>
    %180 = tpu.matmul %178, %179, %cst_87 {dimension_numbers = #tpu.dot_dimension_numbers<[1], [0], [0], [1], [0, 0, 1, 1], [], []>} : vector<8x64xbf16>, vector<64x128xbf16>, vector<8x128xf32> -> vector<8x128xf32>
    %181 = arith.addf %176, %180 : vector<8x128xf32>
    %182 = vector.extract_strided_slice %140 {offsets = [64, 0], sizes = [8, 64], strides = [1, 1]} : vector<128x64xf32> to vector<8x64xf32>
    %183 = arith.truncf %182 : vector<8x64xf32> to vector<8x64xbf16>
    %c512 = arith.constant 512 : index
    %c0_88 = arith.constant 0 : index
    %184 = vector.load %arg9[%c512, %c0_88] : memref<1024x128xbf16, #tpu.memory_space<vmem>>, vector<64x128xbf16>
    %cst_89 = arith.constant dense<0.000000e+00> : vector<8x128xf32>
    %185 = tpu.matmul %183, %184, %cst_89 {dimension_numbers = #tpu.dot_dimension_numbers<[1], [0], [0], [1], [0, 0, 1, 1], [], []>} : vector<8x64xbf16>, vector<64x128xbf16>, vector<8x128xf32> -> vector<8x128xf32>
    %186 = arith.addf %181, %185 : vector<8x128xf32>
    %187 = vector.extract_strided_slice %140 {offsets = [72, 0], sizes = [8, 64], strides = [1, 1]} : vector<128x64xf32> to vector<8x64xf32>
    %188 = arith.truncf %187 : vector<8x64xf32> to vector<8x64xbf16>
    %c576 = arith.constant 576 : index
    %c0_90 = arith.constant 0 : index
    %189 = vector.load %arg9[%c576, %c0_90] : memref<1024x128xbf16, #tpu.memory_space<vmem>>, vector<64x128xbf16>
    %cst_91 = arith.constant dense<0.000000e+00> : vector<8x128xf32>
    %190 = tpu.matmul %188, %189, %cst_91 {dimension_numbers = #tpu.dot_dimension_numbers<[1], [0], [0], [1], [0, 0, 1, 1], [], []>} : vector<8x64xbf16>, vector<64x128xbf16>, vector<8x128xf32> -> vector<8x128xf32>
    %191 = arith.addf %186, %190 : vector<8x128xf32>
    %192 = vector.extract_strided_slice %140 {offsets = [80, 0], sizes = [8, 64], strides = [1, 1]} : vector<128x64xf32> to vector<8x64xf32>
    %193 = arith.truncf %192 : vector<8x64xf32> to vector<8x64xbf16>
    %c640 = arith.constant 640 : index
    %c0_92 = arith.constant 0 : index
    %194 = vector.load %arg9[%c640, %c0_92] : memref<1024x128xbf16, #tpu.memory_space<vmem>>, vector<64x128xbf16>
    %cst_93 = arith.constant dense<0.000000e+00> : vector<8x128xf32>
    %195 = tpu.matmul %193, %194, %cst_93 {dimension_numbers = #tpu.dot_dimension_numbers<[1], [0], [0], [1], [0, 0, 1, 1], [], []>} : vector<8x64xbf16>, vector<64x128xbf16>, vector<8x128xf32> -> vector<8x128xf32>
    %196 = arith.addf %191, %195 : vector<8x128xf32>
    %197 = vector.extract_strided_slice %140 {offsets = [88, 0], sizes = [8, 64], strides = [1, 1]} : vector<128x64xf32> to vector<8x64xf32>
    %198 = arith.truncf %197 : vector<8x64xf32> to vector<8x64xbf16>
    %c704 = arith.constant 704 : index
    %c0_94 = arith.constant 0 : index
    %199 = vector.load %arg9[%c704, %c0_94] : memref<1024x128xbf16, #tpu.memory_space<vmem>>, vector<64x128xbf16>
    %cst_95 = arith.constant dense<0.000000e+00> : vector<8x128xf32>
    %200 = tpu.matmul %198, %199, %cst_95 {dimension_numbers = #tpu.dot_dimension_numbers<[1], [0], [0], [1], [0, 0, 1, 1], [], []>} : vector<8x64xbf16>, vector<64x128xbf16>, vector<8x128xf32> -> vector<8x128xf32>
    %201 = arith.addf %196, %200 : vector<8x128xf32>
    %202 = vector.extract_strided_slice %140 {offsets = [96, 0], sizes = [8, 64], strides = [1, 1]} : vector<128x64xf32> to vector<8x64xf32>
    %203 = arith.truncf %202 : vector<8x64xf32> to vector<8x64xbf16>
    %c768 = arith.constant 768 : index
    %c0_96 = arith.constant 0 : index
    %204 = vector.load %arg9[%c768, %c0_96] : memref<1024x128xbf16, #tpu.memory_space<vmem>>, vector<64x128xbf16>
    %cst_97 = arith.constant dense<0.000000e+00> : vector<8x128xf32>
    %205 = tpu.matmul %203, %204, %cst_97 {dimension_numbers = #tpu.dot_dimension_numbers<[1], [0], [0], [1], [0, 0, 1, 1], [], []>} : vector<8x64xbf16>, vector<64x128xbf16>, vector<8x128xf32> -> vector<8x128xf32>
    %206 = arith.addf %201, %205 : vector<8x128xf32>
    %207 = vector.extract_strided_slice %140 {offsets = [104, 0], sizes = [8, 64], strides = [1, 1]} : vector<128x64xf32> to vector<8x64xf32>
    %208 = arith.truncf %207 : vector<8x64xf32> to vector<8x64xbf16>
    %c832 = arith.constant 832 : index
    %c0_98 = arith.constant 0 : index
    %209 = vector.load %arg9[%c832, %c0_98] : memref<1024x128xbf16, #tpu.memory_space<vmem>>, vector<64x128xbf16>
    %cst_99 = arith.constant dense<0.000000e+00> : vector<8x128xf32>
    %210 = tpu.matmul %208, %209, %cst_99 {dimension_numbers = #tpu.dot_dimension_numbers<[1], [0], [0], [1], [0, 0, 1, 1], [], []>} : vector<8x64xbf16>, vector<64x128xbf16>, vector<8x128xf32> -> vector<8x128xf32>
    %211 = arith.addf %206, %210 : vector<8x128xf32>
    %212 = vector.extract_strided_slice %140 {offsets = [112, 0], sizes = [8, 64], strides = [1, 1]} : vector<128x64xf32> to vector<8x64xf32>
    %213 = arith.truncf %212 : vector<8x64xf32> to vector<8x64xbf16>
    %c896 = arith.constant 896 : index
    %c0_100 = arith.constant 0 : index
    %214 = vector.load %arg9[%c896, %c0_100] : memref<1024x128xbf16, #tpu.memory_space<vmem>>, vector<64x128xbf16>
    %cst_101 = arith.constant dense<0.000000e+00> : vector<8x128xf32>
    %215 = tpu.matmul %213, %214, %cst_101 {dimension_numbers = #tpu.dot_dimension_numbers<[1], [0], [0], [1], [0, 0, 1, 1], [], []>} : vector<8x64xbf16>, vector<64x128xbf16>, vector<8x128xf32> -> vector<8x128xf32>
    %216 = arith.addf %211, %215 : vector<8x128xf32>
    %217 = vector.extract_strided_slice %140 {offsets = [120, 0], sizes = [8, 64], strides = [1, 1]} : vector<128x64xf32> to vector<8x64xf32>
    %218 = arith.truncf %217 : vector<8x64xf32> to vector<8x64xbf16>
    %c960 = arith.constant 960 : index
    %c0_102 = arith.constant 0 : index
    %219 = vector.load %arg9[%c960, %c0_102] : memref<1024x128xbf16, #tpu.memory_space<vmem>>, vector<64x128xbf16>
    %cst_103 = arith.constant dense<0.000000e+00> : vector<8x128xf32>
    %220 = tpu.matmul %218, %219, %cst_103 {dimension_numbers = #tpu.dot_dimension_numbers<[1], [0], [0], [1], [0, 0, 1, 1], [], []>} : vector<8x64xbf16>, vector<64x128xbf16>, vector<8x128xf32> -> vector<8x128xf32>
    %221 = arith.addf %216, %220 : vector<8x128xf32>
    %cst_104 = arith.constant dense<0.000000e+00> : vector<128xf32>
    %222 = vector.multi_reduction <add>, %221, %cst_104 [0] : vector<8x128xf32> to vector<128xf32>
    %223 = vector.shape_cast %222 : vector<128xf32> to vector<1x128xf32>
    %cst_105 = arith.constant 1.250000e-01 : f32
    %224 = vector.broadcast %cst_105 : f32 to vector<1x128xf32>
    %225 = arith.mulf %223, %224 : vector<1x128xf32>
    %226 = vector.broadcast %225 : vector<1x128xf32> to vector<8x128xf32>
    %227 = arith.subf %221, %226 : vector<8x128xf32>
    %228 = arith.mulf %227, %227 : vector<8x128xf32>
    %cst_106 = arith.constant dense<0.000000e+00> : vector<128xf32>
    %229 = vector.multi_reduction <add>, %228, %cst_106 [0] : vector<8x128xf32> to vector<128xf32>
    %230 = vector.shape_cast %229 : vector<128xf32> to vector<1x128xf32>
    %cst_107 = arith.constant 1.250000e-01 : f32
    %231 = vector.broadcast %cst_107 : f32 to vector<1x128xf32>
    %232 = arith.mulf %230, %231 : vector<1x128xf32>
    %cst_108 = arith.constant 9.99999974E-6 : f32
    %233 = vector.broadcast %cst_108 : f32 to vector<1x128xf32>
    %234 = arith.addf %232, %233 : vector<1x128xf32>
    %235 = math.rsqrt %234 : vector<1x128xf32>
    %c0_109 = arith.constant 0 : index
    %c0_110 = arith.constant 0 : index
    %236 = vector.load %arg10[%c0_109, %c0_110] : memref<1x128xf32, #tpu.memory_space<vmem>>, vector<1x128xf32>
    %c0_111 = arith.constant 0 : index
    %c0_112 = arith.constant 0 : index
    %237 = vector.load %arg11[%c0_111, %c0_112] : memref<1x128xf32, #tpu.memory_space<vmem>>, vector<1x128xf32>
    %238 = vector.broadcast %225 : vector<1x128xf32> to vector<8x128xf32>
    %239 = arith.subf %221, %238 : vector<8x128xf32>
    %240 = vector.broadcast %235 : vector<1x128xf32> to vector<8x128xf32>
    %241 = arith.mulf %239, %240 : vector<8x128xf32>
    %242 = vector.broadcast %236 : vector<1x128xf32> to vector<8x128xf32>
    %243 = arith.mulf %241, %242 : vector<8x128xf32>
    %244 = vector.broadcast %237 : vector<1x128xf32> to vector<8x128xf32>
    %245 = arith.addf %243, %244 : vector<8x128xf32>
    %cst_113 = arith.constant 0.000000e+00 : f32
    %246 = vector.broadcast %cst_113 : f32 to vector<8x128xf32>
    %247 = arith.maximumf %245, %246 : vector<8x128xf32>
    %248 = tpu.iota {dimensions = array<i32: 0>} : vector<2x8xi32>
    %249 = tpu.iota {dimensions = array<i32: 1>} : vector<2x8xi32>
    %c4_i32 = arith.constant 4 : i32
    %250 = vector.broadcast %c4_i32 : i32 to vector<2x8xi32>
    %251 = arith.muli %248, %250 : vector<2x8xi32>
    %252 = arith.cmpi sge, %249, %251 : vector<2x8xi32>
    %c1_i32 = arith.constant 1 : i32
    %253 = vector.broadcast %c1_i32 : i32 to vector<2x8xi32>
    %254 = arith.addi %248, %253 : vector<2x8xi32>
    %c4_i32_114 = arith.constant 4 : i32
    %255 = vector.broadcast %c4_i32_114 : i32 to vector<2x8xi32>
    %256 = arith.muli %254, %255 : vector<2x8xi32>
    %257 = arith.cmpi slt, %249, %256 : vector<2x8xi32>
    %258 = arith.andi %252, %257 : vector<2x8xi1>
    %cst_115 = arith.constant 2.500000e-01 : f32
    %cst_116 = arith.constant 0.000000e+00 : f32
    %259 = vector.broadcast %cst_115 : f32 to vector<2x8xf32>
    %260 = vector.broadcast %cst_116 : f32 to vector<2x8xf32>
    %261 = arith.select %258, %259, %260 : vector<2x8xi1>, vector<2x8xf32>
    %cst_117 = arith.constant dense<0.000000e+00> : vector<2x128xf32>
    %262 = tpu.matmul %261, %247, %cst_117 {dimension_numbers = #tpu.dot_dimension_numbers<[1], [0], [0], [1], [0, 0, 1, 1], [], []>} : vector<2x8xf32>, vector<8x128xf32>, vector<2x128xf32> -> vector<2x128xf32>
    %263 = arith.truncf %262 : vector<2x128xf32> to vector<2x128xbf16>
    %c0_118 = arith.constant 0 : index
    %c0_119 = arith.constant 0 : index
    %264 = vector.load %arg13[%c0_118, %c0_119] : memref<128x64xbf16, #tpu.memory_space<vmem>>, vector<128x64xbf16>
    %cst_120 = arith.constant dense<0.000000e+00> : vector<2x64xf32>
    %265 = tpu.matmul %263, %264, %cst_120 {dimension_numbers = #tpu.dot_dimension_numbers<[1], [0], [0], [1], [0, 0, 1, 1], [], []>} : vector<2x128xbf16>, vector<128x64xbf16>, vector<2x64xf32> -> vector<2x64xf32>
    %c0_121 = arith.constant 0 : index
    %c0_122 = arith.constant 0 : index
    %266 = vector.load %arg12[%c0_121, %c0_122] : memref<2x2xf32, #tpu.memory_space<vmem>>, vector<2x2xf32>
    %c0_123 = arith.constant 0 : index
    %c0_124 = arith.constant 0 : index
    %267 = vector.load %arg14[%c0_123, %c0_124] : memref<2x64xf32, #tpu.memory_space<vmem>>, vector<2x64xf32>
    %268 = vector.extract_strided_slice %266 {offsets = [0, 0], sizes = [2, 1], strides = [1, 1]} : vector<2x2xf32> to vector<2x1xf32>
    %269 = vector.extract_strided_slice %267 {offsets = [0, 0], sizes = [1, 64], strides = [1, 1]} : vector<2x64xf32> to vector<1x64xf32>
    %270 = vector.broadcast %268 : vector<2x1xf32> to vector<2x64xf32>
    %271 = vector.broadcast %269 : vector<1x64xf32> to vector<2x64xf32>
    %272 = arith.mulf %270, %271 : vector<2x64xf32>
    %273 = arith.addf %265, %272 : vector<2x64xf32>
    %274 = vector.extract_strided_slice %266 {offsets = [0, 1], sizes = [2, 1], strides = [1, 1]} : vector<2x2xf32> to vector<2x1xf32>
    %275 = vector.extract_strided_slice %267 {offsets = [1, 0], sizes = [1, 64], strides = [1, 1]} : vector<2x64xf32> to vector<1x64xf32>
    %276 = vector.broadcast %274 : vector<2x1xf32> to vector<2x64xf32>
    %277 = vector.broadcast %275 : vector<1x64xf32> to vector<2x64xf32>
    %278 = arith.mulf %276, %277 : vector<2x64xf32>
    %279 = arith.addf %273, %278 : vector<2x64xf32>
    %c0_125 = arith.constant 0 : index
    %c0_126 = arith.constant 0 : index
    %280 = vector.load %arg15[%c0_125, %c0_126] : memref<1x64xf32, #tpu.memory_space<vmem>>, vector<1x64xf32>
    %281 = vector.broadcast %280 : vector<1x64xf32> to vector<2x64xf32>
    %282 = arith.addf %279, %281 : vector<2x64xf32>
    %cst_127 = arith.constant 0.000000e+00 : f32
    %283 = vector.broadcast %cst_127 : f32 to vector<2x64xf32>
    %284 = arith.maximumf %282, %283 : vector<2x64xf32>
    %285 = arith.truncf %284 : vector<2x64xf32> to vector<2x64xbf16>
    %c0_128 = arith.constant 0 : index
    %c0_129 = arith.constant 0 : index
    %286 = vector.load %arg16[%c0_128, %c0_129] : memref<64x64xbf16, #tpu.memory_space<vmem>>, vector<64x64xbf16>
    %cst_130 = arith.constant dense<0.000000e+00> : vector<2x64xf32>
    %287 = tpu.matmul %285, %286, %cst_130 {dimension_numbers = #tpu.dot_dimension_numbers<[1], [0], [0], [1], [0, 0, 1, 1], [], []>} : vector<2x64xbf16>, vector<64x64xbf16>, vector<2x64xf32> -> vector<2x64xf32>
    %c0_131 = arith.constant 0 : index
    %c0_132 = arith.constant 0 : index
    %288 = vector.load %arg17[%c0_131, %c0_132] : memref<1x64xf32, #tpu.memory_space<vmem>>, vector<1x64xf32>
    %289 = vector.broadcast %288 : vector<1x64xf32> to vector<2x64xf32>
    %290 = arith.addf %287, %289 : vector<2x64xf32>
    %cst_133 = arith.constant 0.000000e+00 : f32
    %291 = vector.broadcast %cst_133 : f32 to vector<2x64xf32>
    %292 = arith.maximumf %290, %291 : vector<2x64xf32>
    %293 = arith.truncf %292 : vector<2x64xf32> to vector<2x64xbf16>
    %c0_134 = arith.constant 0 : index
    %c0_135 = arith.constant 0 : index
    %294 = vector.load %arg18[%c0_134, %c0_135] : memref<64x1xbf16, #tpu.memory_space<vmem>>, vector<64x1xbf16>
    %cst_136 = arith.constant dense<0.000000e+00> : vector<2x1xf32>
    %295 = tpu.matmul %293, %294, %cst_136 {dimension_numbers = #tpu.dot_dimension_numbers<[1], [0], [0], [1], [0, 0, 1, 1], [], []>} : vector<2x64xbf16>, vector<64x1xbf16>, vector<2x1xf32> -> vector<2x1xf32>
    %c0_137 = arith.constant 0 : index
    %c0_138 = arith.constant 0 : index
    %296 = vector.load %arg19[%c0_137, %c0_138] : memref<1x1xf32, #tpu.memory_space<vmem>>, vector<1x1xf32>
    %297 = vector.broadcast %296 : vector<1x1xf32> to vector<2x1xf32>
    %298 = arith.addf %295, %297 : vector<2x1xf32>
    %c0_139 = arith.constant 0 : index
    %c0_140 = arith.constant 0 : index
    %299 = vector.load %arg20[%c0_139, %c0_140] : memref<2x1xf32, #tpu.memory_space<vmem>>, vector<2x1xf32>
    tpu.vector_store %arg20[%c0_139, %c0_140], %298 {strides = array<i32>} : memref<2x1xf32, #tpu.memory_space<vmem>>, vector<2x1xf32>,
    return
  }
}

</mosaic_0001>

<bundles_post_ra>
// kernel: critic_forward.1
= control target key start
LH: loop header
LB: loop body
LE: loop exit
PB: predicated region body
PF: predicated region fallthrough
CT: control target
= control target key end

     0   :  { %v11998_v0 = vmov 0.0   ;;  %vm8824_vm0 = vmmov 0   ;;  %vm292_vm1 = vcmask 392192   ;;  %vm644_vm2 = vcmask 261120   ;;  %s11972_s2 = inlined_call_operand.vmem [shape: bf16[48,32], index: 2, kind: input, shape index: {}]   ;;  %s11973_s1 = inlined_call_operand.vmem [shape: bf16[1152,48], index: 1, kind: input, shape index: {}]   ;;  %s11974_s0 = inlined_call_operand.vmem [shape: bf16[450,48], index: 0, kind: input, shape index: {}]   ;;  %s11975_s5 = inlined_call_operand.vmem [shape: bf16[512,64], index: 5, kind: input, shape index: {}]   ;;  %s11976_s3 = inlined_call_operand.vmem [shape: f32[1,32], index: 3, kind: input, shape index: {}]   ;;  %s11977_s4 = inlined_call_operand.vmem [shape: f32[1,32], index: 4, kind: input, shape index: {}]   ;;  %s11978_s8 = inlined_call_operand.vmem [shape: bf16[128,72], index: 8, kind: input, shape index: {}]   ;;  %s11979_s9 = inlined_call_operand.vmem [shape: bf16[1024,128], index: 9, kind: input, shape index: {}]   ;;  %s11980_s6 = inlined_call_operand.vmem [shape: f32[1,64], index: 6, kind: input, shape index: {}]   ;;  %s11981_s7 = inlined_call_operand.vmem [shape: f32[1,64], index: 7, kind: input, shape index: {}]   ;;  %s11982_s13 = inlined_call_operand.vmem [shape: bf16[128,64], index: 13, kind: input, shape index: {}]   ;;  %s11983_s10 = inlined_call_operand.vmem [shape: f32[1,128], index: 10, kind: input, shape index: {}]   ;;  %s11984_s11 = inlined_call_operand.vmem [shape: f32[1,128], index: 11, kind: input, shape index: {}]   ;;  %s11985_s12 = inlined_call_operand.vmem [shape: f32[2,2], index: 12, kind: input, shape index: {}]   ;;  %s11986_s16 = inlined_call_operand.vmem [shape: bf16[64,64], index: 16, kind: input, shape index: {}]   ;;  %s11987_s18 = inlined_call_operand.vmem [shape: bf16[64,1], index: 18, kind: input, shape index: {}]   ;;  %s11988_s14 = inlined_call_operand.vmem [shape: f32[2,64], index: 14, kind: input, shape index: {}]   ;;  %s11989_s15 = inlined_call_operand.vmem [shape: f32[1,64], index: 15, kind: input, shape index: {}]   ;;  %s11990_s19 = inlined_call_operand.<no memory space> [shape: f32[1,1], index: 19, kind: input, shape index: {}]   ;;  %s11991_s17 = inlined_call_operand.vmem [shape: f32[1,64], index: 17, kind: input, shape index: {}]   ;;  %s11992_s20 = inlined_call_operand.vmem [shape: f32[2,1], index: 20, kind: output, shape index: {}]  }
   0x1   :  { %12022 = sst [smem:[#allocation109_spill]] %s11972_s2  ;;  %7659 = vmatprep.subr.bf16.mxu0 %v11998_v0  ;;  %7665 = vmatprep.mubr.msk.bf16.mxu0 %vm8824_vm0, %v11998_v0  ;;  %vm756_vm3 = vcmask 254976   ;;  %vm5099_vm4 = vcmask 588800   ;;  %vm4919_vm5 = vcmask 523264   ;;  %vm5124_vm6 = vcmask 1043456  }
   0x2   :  { %12023 = sst [smem:[#allocation110_spill]] %s11973_s1  ;;  %vm6502_vm10 = vcmask 64512   ;;  %vm6879_vm11 = vcmask 1024  }
   0x3   :  { %12024 = sst [smem:[#allocation111_spill]] %s11974_s0 }
   0x4   :  { %12025 = sst [smem:[#allocation112_spill]] %s11975_s5 }
   0x5   :  { %12026 = sst [smem:[#allocation113_spill]] %s11976_s3 }
   0x6   :  { %s12027_s23 = sld [smem:[#allocation109_spill]] }
   0x7   :  { %s12028_s28 = sld [smem:[#allocation110_spill]] }
   0x8   :  { %s12029_s30 = sld [smem:[#allocation111_spill]] }
   0x9   :  { %s12055_s0 = sld [smem:[#allocation112_spill]] }
   0xa   :  { %s12161_s3 = sld [smem:[#allocation113_spill]] }
   0xc   :  { %v8589_v1 = vld [vmem:[%s12027_s23 + $0x10] sm:$0xff]   ;;  %v8590_v2 = vld [vmem:[%s12027_s23 + $0x8] sm:$0xff]   ;;  %v8591_v3 = vld [vmem:[%s12027_s23] sm:$0xff]  }
   0xd   :  { %7660 = vmatpush3.bf16.msra.mxu0 %v8589_v1  ;;  %7781 = vmatprep.subr.bf16.mxu1 %v8589_v1  ;;  %v8593_v4 = vld [vmem:[%s12028_s28] sm:$0xff]   ;;  %v8594_v6 = vld [vmem:[%s12028_s28 + $0x8] sm:$0xff]   ;;  %v8596_v7 = vld [vmem:[%s12028_s28 + $0x10] sm:$0xff]  }
   0xe   :  { %7782 = vmatpush3.bf16.msra.mxu1 %v8589_v1  ;;  %7661 = vmatprep.subr.bf16.mxu0 %v11998_v0  ;;  %v8592_v5 = vld [vmem:[%s12029_s30] sm:$0xff]   ;;  %v8595_v8 = vld [vmem:[%s12029_s30 + $0x8] sm:$0xff]   ;;  %v8597_v9 = vld [vmem:[%s12028_s28 + $0x18] sm:$0xff]  }
   0xf   :  { %7783 = vmatprep.subr.bf16.mxu1 %v8590_v2  ;;  %7787 = vmatprep.mubr.msk.bf16.mxu1 %vm292_vm1, %v8593_v4  ;;  %v8599_v10 = vld [vmem:[%s12028_s28 + $0x20] sm:$0xff]   ;;  %v8598_v11 = vld [vmem:[%s12029_s30 + $0x10] sm:$0xff]   ;;  %v8600_v12 = vld [vmem:[%s12028_s28 + $0x28] sm:$0xff]  }
  0x10   :  { %v8602_v13 = vld [vmem:[%s12028_s28 + $0x30] sm:$0xff]   ;;  %v8601_v14 = vld [vmem:[%s12029_s30 + $0x18] sm:$0xff]   ;;  %v8605_v16 = vld [vmem:[%s12028_s28 + $0x40] sm:$0xff]  }
  0x11   :  { %7662 = vmatpush3.bf16.msra.mxu0 %v8590_v2  ;;  %v8603_v15 = vld [vmem:[%s12028_s28 + $0x38] sm:$0xff]   ;;  %v8604_v17 = vld [vmem:[%s12029_s30 + $0x20] sm:$0xff]   ;;  %v8606_v18 = vld [vmem:[%s12028_s28 + $0x48] sm:$0xff]  }
  0x12   :  { %7784 = vmatpush3.bf16.msra.mxu1 %v8590_v2  ;;  %7663 = vmatprep.subr.bf16.mxu0 %v11998_v0  ;;  %v8608_v19 = vld [vmem:[%s12028_s28 + $0x50] sm:$0xff]   ;;  %v8607_v20 = vld [vmem:[%s12029_s30 + $0x28] sm:$0xff]   ;;  %v8609_v21 = vld [vmem:[%s12028_s28 + $0x58] sm:$0xff]  }
  0x13   :  { %7785 = vmatprep.subr.bf16.mxu1 %v8591_v3  ;;  %v8611_v22 = vld [vmem:[%s12028_s28 + $0x60] sm:$0xff]   ;;  %v8610_v23 = vld [vmem:[%s12029_s30 + $0x30] sm:$0xff]   ;;  %v8612_v24 = vld [vmem:[%s12028_s28 + $0x68] sm:$0xff]  }
  0x14   :  { %v8614_v25 = vld [vmem:[%s12028_s28 + $0x70] sm:$0xff]   ;;  %v8613_v26 = vld [vmem:[%s12029_s30 + $0x38] sm:$0xff]   ;;  %v8617_v28 = vld [vmem:[%s12028_s28 + $0x80] sm:$0xff]  }
  0x15   :  { %7664 = vmatpush3.bf16.msra.mxu0 %v8591_v3  ;;  %v8615_v27 = vld [vmem:[%s12028_s28 + $0x78] sm:$0xff]   ;;  %v8616_v29 = vld [vmem:[%s12029_s30 + $0x40] sm:$0xff]   ;;  %v8618_v30 = vld [vmem:[%s12028_s28 + $0x88] sm:$0xff]  }
  0x16   :  { %7786 = vmatpush3.bf16.msra.mxu1 %v8591_v3  ;;  %7931 = vmatprep.subr.bf16.mxu0 %v11998_v0  ;;  %v8620_v31 = vld [vmem:[%s12028_s28 + $0x90] sm:$0xff]   ;;  %v8619_v32 = vld [vmem:[%s12029_s30 + $0x48] sm:$0xff]   ;;  %v8621_v33 = vld [vmem:[%s12028_s28 + $0x98] sm:$0xff]  }
  0x17   :  { %7979 = vmatprep.subr.bf16.mxu1 %v11998_v0  ;;  %v8623_v34 = vld [vmem:[%s12028_s28 + $0xa0] sm:$0xff]   ;;  %v8622_v35 = vld [vmem:[%s12029_s30 + $0x50] sm:$0xff]   ;;  %v8624_v36 = vld [vmem:[%s12028_s28 + $0xa8] sm:$0xff]  }
  0x18   :  { %7666 = vmatmul.mubr.msk.bf16.vlgmr.msra.gmra.mxu0 %vm292_vm1, %v8592_v5  ;;  %v8626_v37 = vld [vmem:[%s12028_s28 + $0xb0] sm:$0xff]   ;;  %v8625_v38 = vld [vmem:[%s12029_s30 + $0x58] sm:$0xff]   ;;  %v8629_v40 = vld [vmem:[%s12028_s28 + $0xc0] sm:$0xff]  }
  0x19   :  { %7788 = vmatmul.mubr.msk.bf16.vlgmr.msra.gmra.mxu1 %vm292_vm1, %v8594_v6  ;;  %7669 = vmatprep.mubr.msk.bf16.mxu0 %vm8824_vm0, %v11998_v0  ;;  %v8627_v39 = vld [vmem:[%s12028_s28 + $0xb8] sm:$0xff]   ;;  %v8628_v41 = vld [vmem:[%s12029_s30 + $0x60] sm:$0xff]   ;;  %v8630_v42 = vld [vmem:[%s12028_s28 + $0xc8] sm:$0xff]  }
  0x1a   :  { %7791 = vmatprep.mubr.msk.bf16.mxu1 %vm292_vm1, %v8596_v7  ;;  %v8632_v43 = vld [vmem:[%s12028_s28 + $0xd0] sm:$0xff]   ;;  %v8631_v44 = vld [vmem:[%s12029_s30 + $0x68] sm:$0xff]   ;;  %v8633_v45 = vld [vmem:[%s12028_s28 + $0xd8] sm:$0xff]  }
  0x1b   :  { %v8635_v46 = vld [vmem:[%s12028_s28 + $0xe0] sm:$0xff]   ;;  %v8634_v47 = vld [vmem:[%s12029_s30 + $0x70] sm:$0xff]   ;;  %v8636_v48 = vld [vmem:[%s12028_s28 + $0xe8] sm:$0xff]  }
  0x1c   :  { %v8638_v49 = vld [vmem:[%s12028_s28 + $0xf0] sm:$0xff]   ;;  %v8637_v50 = vld [vmem:[%s12029_s30 + $0x78] sm:$0xff]   ;;  %v8641_v52 = vld [vmem:[%s12028_s28 + $0x100] sm:$0xff]  }
  0x1d   :  { %v8639_v51 = vld [vmem:[%s12028_s28 + $0xf8] sm:$0xff]   ;;  %v8640_v53 = vld [vmem:[%s12029_s30 + $0x80] sm:$0xff]   ;;  %v8642_v54 = vld [vmem:[%s12028_s28 + $0x108] sm:$0xff]  }
  0x1e   :  { %v8644_v55 = vld [vmem:[%s12028_s28 + $0x110] sm:$0xff]   ;;  %v8643_v56 = vld [vmem:[%s12029_s30 + $0x88] sm:$0xff]   ;;  %v8645_v57 = vld [vmem:[%s12028_s28 + $0x118] sm:$0xff]  }
  0x1f   :  { %v8647_v58 = vld [vmem:[%s12028_s28 + $0x120] sm:$0xff]   ;;  %v8646_v59 = vld [vmem:[%s12029_s30 + $0x90] sm:$0xff]   ;;  %v8648_v60 = vld [vmem:[%s12028_s28 + $0x128] sm:$0xff]  }
  0x20   :  { %7670 = vmatmul.mubr.msk.bf16.gmra.mxu0 %vm292_vm1, %v8595_v8  ;;  %v8650_v61 = vld [vmem:[%s12028_s28 + $0x130] sm:$0xff]   ;;  %v8649_v62 = vld [vmem:[%s12029_s30 + $0x98] sm:$0xff]   ;;  %v8653_v1 = vld [vmem:[%s12028_s28 + $0x140] sm:$0xff]  }
  0x21   :  { %7792 = vmatmul.mubr.msk.bf16.gmra.mxu1 %vm292_vm1, %v8597_v9  ;;  %7673 = vmatprep.mubr.msk.bf16.mxu0 %vm8824_vm0, %v11998_v0  ;;  %v8651_v63 = vld [vmem:[%s12028_s28 + $0x138] sm:$0xff]   ;;  %v8652_v2 = vld [vmem:[%s12029_s30 + $0xa0] sm:$0xff]   ;;  %v8654_v3 = vld [vmem:[%s12028_s28 + $0x148] sm:$0xff]  }
  0x22   :  { %7795 = vmatprep.mubr.msk.bf16.mxu1 %vm292_vm1, %v8599_v10  ;;  %v8656_v4 = vld [vmem:[%s12028_s28 + $0x150] sm:$0xff]   ;;  %v8655_v5 = vld [vmem:[%s12029_s30 + $0xa8] sm:$0xff]   ;;  %v8657_v6 = vld [vmem:[%s12028_s28 + $0x158] sm:$0xff]  }
  0x23   :  { %v8659_v7 = vld [vmem:[%s12028_s28 + $0x160] sm:$0xff]   ;;  %v8658_v8 = vld [vmem:[%s12029_s30 + $0xb0] sm:$0xff]   ;;  %v8660_v9 = vld [vmem:[%s12028_s28 + $0x168] sm:$0xff]  }
  0x24   :  { %v8662_v10 = vld [vmem:[%s12028_s28 + $0x170] sm:$0xff]  }
  0x28   :  { %7674 = vmatmul.mubr.msk.bf16.gmra.mxu0 %vm292_vm1, %v8598_v11  ;;  %v8661_v11 = vld [vmem:[%s12029_s30 + $0xb8] sm:$0xff]  }
  0x29   :  { %7796 = vmatmul.mubr.msk.bf16.gmra.mxu1 %vm292_vm1, %v8600_v12  ;;  %7677 = vmatprep.mubr.msk.bf16.mxu0 %vm8824_vm0, %v11998_v0  ;;  %v8663_v12 = vld [vmem:[%s12028_s28 + $0x178] sm:$0xff]  }
  0x2a   :  { %7799 = vmatprep.mubr.msk.bf16.mxu1 %vm292_vm1, %v8602_v13  ;;  %v8665_v13 = vld [vmem:[%s12028_s28 + $0x180] sm:$0xff]  }
  0x30   :  { %7678 = vmatmul.mubr.msk.bf16.gmra.mxu0 %vm292_vm1, %v8601_v14  ;;  %v8664_v14 = vld [vmem:[%s12029_s30 + $0xc0] sm:$0xff]  }
  0x31   :  { %7800 = vmatmul.mubr.msk.bf16.gmra.mxu1 %vm292_vm1, %v8603_v15  ;;  %7681 = vmatprep.mubr.msk.bf16.mxu0 %vm8824_vm0, %v11998_v0  ;;  %v8666_v15 = vld [vmem:[%s12028_s28 + $0x188] sm:$0xff]  }
  0x32   :  { %7803 = vmatprep.mubr.msk.bf16.mxu1 %vm292_vm1, %v8605_v16  ;;  %v8668_v16 = vld [vmem:[%s12028_s28 + $0x190] sm:$0xff]  }
  0x38   :  { %7682 = vmatmul.mubr.msk.bf16.gmra.mxu0 %vm292_vm1, %v8604_v17 }
  0x39   :  { %7804 = vmatmul.mubr.msk.bf16.gmra.mxu1 %vm292_vm1, %v8606_v18  ;;  %7685 = vmatprep.mubr.msk.bf16.mxu0 %vm8824_vm0, %v11998_v0 }
  0x3a   :  { %7807 = vmatprep.mubr.msk.bf16.mxu1 %vm292_vm1, %v8608_v19 }
  0x40   :  { %7686 = vmatmul.mubr.msk.bf16.gmra.mxu0 %vm292_vm1, %v8607_v20 }
  0x41   :  { %7808 = vmatmul.mubr.msk.bf16.gmra.mxu1 %vm292_vm1, %v8609_v21  ;;  %7689 = vmatprep.mubr.msk.bf16.mxu0 %vm8824_vm0, %v11998_v0 }
  0x42   :  { %7811 = vmatprep.mubr.msk.bf16.mxu1 %vm292_vm1, %v8611_v22  ;;  %v8667_v22 = vld [vmem:[%s12029_s30 + $0xc8] sm:$0xff]  }
  0x48   :  { %7690 = vmatmul.mubr.msk.bf16.gmra.mxu0 %vm292_vm1, %v8610_v23 }
  0x49   :  { %7812 = vmatmul.mubr.msk.bf16.gmra.mxu1 %vm292_vm1, %v8612_v24  ;;  %7693 = vmatprep.mubr.msk.bf16.mxu0 %vm8824_vm0, %v11998_v0  ;;  %v8669_v24 = vld [vmem:[%s12028_s28 + $0x198] sm:$0xff]  }
  0x4a   :  { %7815 = vmatprep.mubr.msk.bf16.mxu1 %vm292_vm1, %v8614_v25 }
  0x50   :  { %7694 = vmatmul.mubr.msk.bf16.gmra.mxu0 %vm292_vm1, %v8613_v26  ;;  %v8671_v26 = vld [vmem:[%s12028_s28 + $0x1a0] sm:$0xff]  }
  0x51   :  { %7816 = vmatmul.mubr.msk.bf16.gmra.mxu1 %vm292_vm1, %v8615_v27  ;;  %7697 = vmatprep.mubr.msk.bf16.mxu0 %vm8824_vm0, %v11998_v0 }
  0x52   :  { %7819 = vmatprep.mubr.msk.bf16.mxu1 %vm292_vm1, %v8617_v28 }
  0x58   :  { %7698 = vmatmul.mubr.msk.bf16.gmra.mxu0 %vm292_vm1, %v8616_v29 }
  0x59   :  { %7820 = vmatmul.mubr.msk.bf16.gmra.mxu1 %vm292_vm1, %v8618_v30  ;;  %7701 = vmatprep.mubr.msk.bf16.mxu0 %vm8824_vm0, %v11998_v0 }
  0x5a   :  { %7823 = vmatprep.mubr.msk.bf16.mxu1 %vm292_vm1, %v8620_v31 }
  0x60   :  { %7702 = vmatmul.mubr.msk.bf16.gmra.mxu0 %vm292_vm1, %v8619_v32 }
  0x61   :  { %7824 = vmatmul.mubr.msk.bf16.gmra.mxu1 %vm292_vm1, %v8621_v33  ;;  %7705 = vmatprep.mubr.msk.bf16.mxu0 %vm8824_vm0, %v11998_v0  ;;  %v8670_v33 = vld [vmem:[%s12029_s30 + $0xd0] sm:$0xff]  }
  0x62   :  { %7827 = vmatprep.mubr.msk.bf16.mxu1 %vm292_vm1, %v8623_v34 }
  0x68   :  { %7706 = vmatmul.mubr.msk.bf16.gmra.mxu0 %vm292_vm1, %v8622_v35  ;;  %v8672_v35 = vld [vmem:[%s12028_s28 + $0x1a8] sm:$0xff]  }
  0x69   :  { %7828 = vmatmul.mubr.msk.bf16.gmra.mxu1 %vm292_vm1, %v8624_v36  ;;  %7709 = vmatprep.mubr.msk.bf16.mxu0 %vm8824_vm0, %v11998_v0 }
  0x6a   :  { %7831 = vmatprep.mubr.msk.bf16.mxu1 %vm292_vm1, %v8626_v37  ;;  %v8674_v37 = vld [vmem:[%s12028_s28 + $0x1b0] sm:$0xff]  }
  0x70   :  { %7710 = vmatmul.mubr.msk.bf16.gmra.mxu0 %vm292_vm1, %v8625_v38 }
  0x71   :  { %7832 = vmatmul.mubr.msk.bf16.gmra.mxu1 %vm292_vm1, %v8627_v39  ;;  %7713 = vmatprep.mubr.msk.bf16.mxu0 %vm8824_vm0, %v11998_v0 }
  0x72   :  { %7835 = vmatprep.mubr.msk.bf16.mxu1 %vm292_vm1, %v8629_v40 }
  0x78   :  { %7714 = vmatmul.mubr.msk.bf16.gmra.mxu0 %vm292_vm1, %v8628_v41 }
  0x79   :  { %7836 = vmatmul.mubr.msk.bf16.gmra.mxu1 %vm292_vm1, %v8630_v42  ;;  %7717 = vmatprep.mubr.msk.bf16.mxu0 %vm8824_vm0, %v11998_v0 }
  0x7a   :  { %7839 = vmatprep.mubr.msk.bf16.mxu1 %vm292_vm1, %v8632_v43 }
  0x80   :  { %7718 = vmatmul.mubr.msk.bf16.gmra.mxu0 %vm292_vm1, %v8631_v44  ;;  %v8673_v44 = vld [vmem:[%s12029_s30 + $0xd8] sm:$0xff]  }
  0x81   :  { %7840 = vmatmul.mubr.msk.bf16.gmra.mxu1 %vm292_vm1, %v8633_v45  ;;  %7721 = vmatprep.mubr.msk.bf16.mxu0 %vm8824_vm0, %v11998_v0 }
  0x82   :  { %7843 = vmatprep.mubr.msk.bf16.mxu1 %vm292_vm1, %v8635_v46  ;;  %v8675_v46 = vld [vmem:[%s12028_s28 + $0x1b8] sm:$0xff]  }
  0x88   :  { %7722 = vmatmul.mubr.msk.bf16.gmra.mxu0 %vm292_vm1, %v8634_v47 }
  0x89   :  { %7844 = vmatmul.mubr.msk.bf16.gmra.mxu1 %vm292_vm1, %v8636_v48  ;;  %7725 = vmatprep.mubr.msk.bf16.mxu0 %vm8824_vm0, %v11998_v0  ;;  %v8677_v48 = vld [vmem:[%s12028_s28 + $0x1c0] sm:$0xff]  }
  0x8a   :  { %7847 = vmatprep.mubr.msk.bf16.mxu1 %vm292_vm1, %v8638_v49 }
  0x90   :  { %7726 = vmatmul.mubr.msk.bf16.gmra.mxu0 %vm292_vm1, %v8637_v50 }
  0x91   :  { %7848 = vmatmul.mubr.msk.bf16.gmra.mxu1 %vm292_vm1, %v8639_v51  ;;  %7729 = vmatprep.mubr.msk.bf16.mxu0 %vm8824_vm0, %v11998_v0 }
  0x92   :  { %7851 = vmatprep.mubr.msk.bf16.mxu1 %vm292_vm1, %v8641_v52 }
  0x98   :  { %7730 = vmatmul.mubr.msk.bf16.gmra.mxu0 %vm292_vm1, %v8640_v53 }
  0x99   :  { %7852 = vmatmul.mubr.msk.bf16.gmra.mxu1 %vm292_vm1, %v8642_v54  ;;  %7733 = vmatprep.mubr.msk.bf16.mxu0 %vm8824_vm0, %v11998_v0 }
  0x9a   :  { %7855 = vmatprep.mubr.msk.bf16.mxu1 %vm292_vm1, %v8644_v55  ;;  %v8676_v55 = vld [vmem:[%s12029_s30 + $0xe0] ss:$0 sps:$4 sm:$0x11]  }
  0xa0   :  { %7734 = vmatmul.mubr.msk.bf16.gmra.mxu0 %vm292_vm1, %v8643_v56 }
  0xa1   :  { %7856 = vmatmul.mubr.msk.bf16.gmra.mxu1 %vm292_vm1, %v8645_v57  ;;  %7737 = vmatprep.mubr.msk.bf16.mxu0 %vm8824_vm0, %v11998_v0  ;;  %v8678_v57 = vld [vmem:[%s12028_s28 + $0x1c8] sm:$0xff]  }
  0xa2   :  { %7859 = vmatprep.mubr.msk.bf16.mxu1 %vm292_vm1, %v8647_v58 }
  0xa8   :  { %7738 = vmatmul.mubr.msk.bf16.gmra.mxu0 %vm292_vm1, %v8646_v59  ;;  %v8679_v59 = vld [vmem:[%s12028_s28 + $0x1d0] sm:$0xff]  }
  0xa9   :  { %7860 = vmatmul.mubr.msk.bf16.gmra.mxu1 %vm292_vm1, %v8648_v60  ;;  %7741 = vmatprep.mubr.msk.bf16.mxu0 %vm8824_vm0, %v11998_v0 }
  0xaa   :  { %7863 = vmatprep.mubr.msk.bf16.mxu1 %vm292_vm1, %v8650_v61 }
  0xb0   :  { %7742 = vmatmul.mubr.msk.bf16.gmra.mxu0 %vm292_vm1, %v8649_v62 }
  0xb1   :  { %7864 = vmatmul.mubr.msk.bf16.gmra.mxu1 %vm292_vm1, %v8651_v63  ;;  %7745 = vmatprep.mubr.msk.bf16.mxu0 %vm8824_vm0, %v11998_v0 }
  0xb2   :  { %7867 = vmatprep.mubr.msk.bf16.mxu1 %vm292_vm1, %v8653_v1 }
  0xb8   :  { %7746 = vmatmul.mubr.msk.bf16.gmra.mxu0 %vm292_vm1, %v8652_v2 }
  0xb9   :  { %7868 = vmatmul.mubr.msk.bf16.gmra.mxu1 %vm292_vm1, %v8654_v3  ;;  %7749 = vmatprep.mubr.msk.bf16.mxu0 %vm8824_vm0, %v11998_v0 }
  0xba   :  { %7871 = vmatprep.mubr.msk.bf16.mxu1 %vm292_vm1, %v8656_v4  ;;  %v8680_v4 = vld [vmem:[%s12028_s28 + $0x1d8] sm:$0xff]  }
  0xc0   :  { %7750 = vmatmul.mubr.msk.bf16.gmra.mxu0 %vm292_vm1, %v8655_v5 }
  0xc1   :  { %7872 = vmatmul.mubr.msk.bf16.gmra.mxu1 %vm292_vm1, %v8657_v6  ;;  %7753 = vmatprep.mubr.msk.bf16.mxu0 %vm8824_vm0, %v11998_v0  ;;  %v8681_v6 = vld [vmem:[%s12028_s28 + $0x1e0] sm:$0xff]  }
  0xc2   :  { %7875 = vmatprep.mubr.msk.bf16.mxu1 %vm292_vm1, %v8659_v7 }
  0xc8   :  { %7754 = vmatmul.mubr.msk.bf16.gmra.mxu0 %vm292_vm1, %v8658_v8 }
  0xc9   :  { %7876 = vmatmul.mubr.msk.bf16.gmra.mxu1 %vm292_vm1, %v8660_v9  ;;  %7757 = vmatprep.mubr.msk.bf16.mxu0 %vm8824_vm0, %v11998_v0 }
  0xca   :  { %7879 = vmatprep.mubr.msk.bf16.mxu1 %vm292_vm1, %v8662_v10 }
  0xd0   :  { %7758 = vmatmul.mubr.msk.bf16.gmra.mxu0 %vm292_vm1, %v8661_v11 }
  0xd1   :  { %7880 = vmatmul.mubr.msk.bf16.gmra.mxu1 %vm292_vm1, %v8663_v12  ;;  %7761 = vmatprep.mubr.msk.bf16.mxu0 %vm8824_vm0, %v11998_v0  ;;  %v8682_v12 = vld [vmem:[%s12028_s28 + $0x1e8] sm:$0xff]  }
  0xd2   :  { %7883 = vmatprep.mubr.msk.bf16.mxu1 %vm292_vm1, %v8665_v13 }
  0xd8   :  { %v9297_v17 = vpop.f32.mrf.mxu0  ;;  %7762 = vmatmul.mubr.msk.bf16.gmra.mxu0 %vm292_vm1, %v8664_v14  ;;  %v8683_v14 = vld [vmem:[%s12028_s28 + $0x1f0] sm:$0xff]  }
  0xd9   :  { %v9300_v18 = vpop.f32.mrf.mxu1  ;;  %7884 = vmatmul.mubr.msk.bf16.gmra.mxu1 %vm292_vm1, %v8666_v15  ;;  %7765 = vmatprep.mubr.msk.bf16.mxu0 %vm8824_vm0, %v11998_v0 }
  0xda   :  { %12030 = vst [vmem:[#allocation3_spill] sm:$0xff] %v9300_v18  ;;  %v7667_v19 = vpop.f32.mrf.mxu0  ;;  %7887 = vmatprep.mubr.msk.bf16.mxu1 %vm292_vm1, %v8668_v16 }
  0xdb   :  { %v9306_v20 = vpop.f32.mrf.mxu1 }
  0xdc   :  { %12031 = vst [vmem:[#allocation4_spill] sm:$0xff] %v9306_v20  ;;  %v9308_v21 = vpop.f32.mrf.mxu0 }
  0xdd   :  { %v9313_v23 = vpop.f32.mrf.mxu1 }
  0xde   :  { %12032 = vst [vmem:[#allocation5_spill] sm:$0xff] %v9313_v23  ;;  %v7668_v25 = vpop.f32.mrf.mxu0 }
  0xdf   :  { %v9321_v27 = vpop.f32.mrf.mxu1  ;;  %v8684_v25 = vld [vmem:[%s12028_s28 + $0x1f8] sm:$0xff]  }
  0xe0   :  { %12033 = vst [vmem:[#allocation6_spill] sm:$0xff] %v9321_v27  ;;  %v9323_v28 = vpop.f32.mrf.mxu0  ;;  %7766 = vmatmul.mubr.msk.bf16.gmra.mxu0 %vm292_vm1, %v8667_v22 }
  0xe1   :  { %v9326_v29 = vpop.f32.mrf.mxu1  ;;  %7888 = vmatmul.mubr.msk.bf16.gmra.mxu1 %vm292_vm1, %v8669_v24  ;;  %7769 = vmatprep.mubr.msk.bf16.mxu0 %vm8824_vm0, %v11998_v0 }
  0xe2   :  { %12034 = vst [vmem:[#allocation7_spill] sm:$0xff] %v9326_v29  ;;  %v7671_v30 = vpop.f32.mrf.mxu0  ;;  %7891 = vmatprep.mubr.msk.bf16.mxu1 %vm292_vm1, %v8671_v26 }
  0xe3   :  { %v9332_v31 = vpop.f32.mrf.mxu1  ;;  %v8685_v30 = vld [vmem:[%s12028_s28 + $0x200] sm:$0xff]  }
  0xe4   :  { %12035 = vst [vmem:[#allocation8_spill] sm:$0xff] %v9332_v31  ;;  %v9334_v32 = vpop.f32.mrf.mxu0 }
  0xe5   :  { %v9339_v34 = vpop.f32.mrf.mxu1 }
  0xe6   :  { %12036 = vst [vmem:[#allocation9_spill] sm:$0xff] %v9339_v34  ;;  %v7672_v36 = vpop.f32.mrf.mxu0 }
  0xe7   :  { %v9347_v38 = vpop.f32.mrf.mxu1 }
  0xe8   :  { %12037 = vst [vmem:[#allocation10_spill] sm:$0xff] %v9347_v38  ;;  %v9349_v39 = vpop.f32.mrf.mxu0  ;;  %7770 = vmatmul.mubr.msk.bf16.gmra.mxu0 %vm292_vm1, %v8670_v33 }
  0xe9   :  { %v9352_v40 = vpop.f32.mrf.mxu1  ;;  %7892 = vmatmul.mubr.msk.bf16.gmra.mxu1 %vm292_vm1, %v8672_v35  ;;  %7773 = vmatprep.mubr.msk.bf16.mxu0 %vm8824_vm0, %v11998_v0 }
  0xea   :  { %12038 = vst [vmem:[#allocation11_spill] sm:$0xff] %v9352_v40  ;;  %v7675_v41 = vpop.f32.mrf.mxu0  ;;  %7895 = vmatprep.mubr.msk.bf16.mxu1 %vm292_vm1, %v8674_v37 }
  0xeb   :  { %v9358_v42 = vpop.f32.mrf.mxu1 }
  0xec   :  { %12039 = vst [vmem:[#allocation12_spill] sm:$0xff] %v9358_v42  ;;  %v9360_v43 = vpop.f32.mrf.mxu0 }
  0xed   :  { %v9365_v45 = vpop.f32.mrf.mxu1 }
  0xee   :  { %12040 = vst [vmem:[#allocation13_spill] sm:$0xff] %v9365_v45  ;;  %v7676_v47 = vpop.f32.mrf.mxu0 }
  0xef   :  { %v9373_v49 = vpop.f32.mrf.mxu1  ;;  %v8687_v47 = vld [vmem:[%s12028_s28 + $0x210] sm:$0xff]  }
  0xf0   :  { %12041 = vst [vmem:[#allocation14_spill] sm:$0xff] %v9373_v49  ;;  %v9375_v50 = vpop.f32.mrf.mxu0  ;;  %7774 = vmatmul.mubr.msk.bf16.gmra.mxu0 %vm292_vm1, %v8673_v44  ;;  %v8686_v44 = vld [vmem:[%s12028_s28 + $0x208] sm:$0xff]  }
  0xf1   :  { %v9378_v51 = vpop.f32.mrf.mxu1  ;;  %7896 = vmatmul.mubr.msk.bf16.gmra.mxu1 %vm292_vm1, %v8675_v46  ;;  %7777 = vmatprep.mubr.msk.bf16.mxu0 %vm8824_vm0, %v11998_v0 }
  0xf2   :  { %12042 = vst [vmem:[#allocation15_spill] sm:$0xff] %v9378_v51  ;;  %v7679_v52 = vpop.f32.mrf.mxu0  ;;  %7899 = vmatprep.mubr.msk.bf16.mxu1 %vm292_vm1, %v8677_v48  ;;  %v8693_v48 = vld [vmem:[%s12055_s0 + $0x18] sm:$0xff]  }
  0xf3   :  { %v9384_v53 = vpop.f32.mrf.mxu1  ;;  %7932 = vmatpush3.bf16.msra.mxu0 %v8693_v48 }
  0xf4   :  { %12043 = vst [vmem:[#allocation16_spill] sm:$0xff] %v9384_v53  ;;  %v9386_v54 = vpop.f32.mrf.mxu0  ;;  %7933 = vmatprep.subr.bf16.mxu0 %v11998_v0 }
  0xf5   :  { %v9391_v56 = vpop.f32.mrf.mxu1 }
  0xf6   :  { %12044 = vst [vmem:[#allocation17_spill] sm:$0xff] %v9391_v56  ;;  %v7680_v58 = vpop.f32.mrf.mxu0 }
  0xf7   :  { %v9399_v60 = vpop.f32.mrf.mxu1  ;;  %v8688_v58 = vld [vmem:[%s12028_s28 + $0x218] sm:$0xff]  }
  0xf8   :  { %12045 = vst [vmem:[#allocation18_spill] sm:$0xff] %v9399_v60  ;;  %v9401_v61 = vpop.f32.mrf.mxu0  ;;  %7778 = vmatmul.mubr.msk.bf16.gmra.mxu0 %vm292_vm1, %v8676_v55 }
  0xf9   :  { %v9404_v62 = vpop.f32.mrf.mxu1  ;;  %7900 = vmatmul.mubr.msk.bf16.gmra.mxu1 %vm292_vm1, %v8678_v57  ;;  %7935 = vmatprep.mubr.msk.bf16.mxu0 %vm8824_vm0, %v11998_v0 }
  0xfa   :  { %12046 = vst [vmem:[#allocation19_spill] sm:$0xff] %v9404_v62  ;;  %v7683_v63 = vpop.f32.mrf.mxu0  ;;  %7903 = vmatprep.mubr.msk.bf16.mxu1 %vm292_vm1, %v8679_v59 }
  0xfb   :  { %v9410_v1 = vpop.f32.mrf.mxu1 }
  0xfc   :  { %12047 = vst [vmem:[#allocation20_spill] sm:$0xff] %v9410_v1  ;;  %v9412_v2 = vpop.f32.mrf.mxu0 }
  0xfd   :  { %v9414_v3 = vpop.f32.mrf.mxu1 }
  0xfe   :  { %12048 = vst [vmem:[#allocation21_spill] sm:$0xff] %v9414_v3  ;;  %v7684_v5 = vpop.f32.mrf.mxu0 }
  0xff   :  { %v9424_v8 = vpop.f32.mrf.mxu1 }
 0x100   :  { %v9422_v7 = vpop.f32.mrf.mxu0  ;;  %12049 = vst [vmem:[#allocation22_spill] sm:$0xff] %v9424_v8 }
 0x101   :  { %7904 = vmatmul.mubr.msk.bf16.gmra.mxu1 %vm292_vm1, %v8680_v4  ;;  %v9430_v11 = vpop.f32.mrf.mxu1  ;;  %v8689_v4 = vld [vmem:[%s12028_s28 + $0x220] sm:$0xff]  }
 0x102   :  { %v7687_v9 = vpop.f32.mrf.mxu0  ;;  %7907 = vmatprep.mubr.msk.bf16.mxu1 %vm292_vm1, %v8681_v6  ;;  %12050 = vst [vmem:[#allocation23_spill] sm:$0xff] %v9430_v11 }
 0x103   :  { %v9440_v16 = vpop.f32.mrf.mxu1 }
 0x104   :  { %v9428_v10 = vpop.f32.mrf.mxu0  ;;  %12051 = vst [vmem:[#allocation24_spill] sm:$0xff] %v9440_v16 }
 0x105   :  { %v9446_v24 = vpop.f32.mrf.mxu1 }
 0x106   :  { %v7688_v13 = vpop.f32.mrf.mxu0  ;;  %12052 = vst [vmem:[#allocation25_spill] sm:$0xff] %v9446_v24 }
 0x107   :  { %v9456_v35 = vpop.f32.mrf.mxu1  ;;  %v8690_v13 = vld [vmem:[%s12028_s28 + $0x228] sm:$0xff]  }
 0x108   :  { %v9438_v15 = vpop.f32.mrf.mxu0  ;;  %12053 = vst [vmem:[#allocation26_spill] sm:$0xff] %v9456_v35 }
 0x109   :  { %7908 = vmatmul.mubr.msk.bf16.gmra.mxu1 %vm292_vm1, %v8682_v12  ;;  %v9462_v41 = vpop.f32.mrf.mxu1 }
 0x10a   :  { %v7691_v19 = vpop.f32.mrf.mxu0  ;;  %7911 = vmatprep.mubr.msk.bf16.mxu1 %vm292_vm1, %v8683_v14  ;;  %12054 = vst [vmem:[#allocation27_spill] sm:$0xff] %v9462_v41 }
 0x10b   :  { %v9475_v55 = vpop.f32.mrf.mxu1 }
 0x10c   :  { %v9444_v22 = vpop.f32.mrf.mxu0  ;;  %12056 = vst [vmem:[#allocation28_spill] sm:$0xff] %v9475_v55 }
 0x10d   :  { %v9485_v63 = vpop.f32.mrf.mxu1 }
 0x10e   :  { %v7692_v26 = vpop.f32.mrf.mxu0  ;;  %12057 = vst [vmem:[#allocation29_spill] sm:$0xff] %v9485_v63 }
 0x10f   :  { %v9492_v9 = vpop.f32.mrf.mxu1 }
 0x110   :  { %v9454_v33 = vpop.f32.mrf.mxu0  ;;  %12058 = vst [vmem:[#allocation30_spill] sm:$0xff] %v9492_v9 }
 0x111   :  { %7912 = vmatmul.mubr.msk.bf16.gmra.mxu1 %vm292_vm1, %v8684_v25  ;;  %v9501_v19 = vpop.f32.mrf.mxu1  ;;  %v8691_v25 = vld [vmem:[%s12028_s28 + $0x230] sm:$0xff]  }
 0x112   :  { %v7695_v36 = vpop.f32.mrf.mxu0  ;;  %7915 = vmatprep.mubr.msk.bf16.mxu1 %vm292_vm1, %v8685_v30  ;;  %12059 = vst [vmem:[#allocation31_spill] sm:$0xff] %v9501_v19 }
 0x113   :  { %v9508_v36 = vpop.f32.mrf.mxu1 }
 0x114   :  { %v9460_v37 = vpop.f32.mrf.mxu0  ;;  %12060 = vst [vmem:[#allocation32_spill] sm:$0xff] %v9508_v36 }
 0x115   :  { %v9517_v48 = vpop.f32.mrf.mxu1 }
 0x116   :  { %v7696_v46 = vpop.f32.mrf.mxu0  ;;  %12061 = vst [vmem:[#allocation33_spill] sm:$0xff] %v9517_v48 }
 0x117   :  { %v8694_v46 = vld [vmem:[%s12055_s0 + $0x28] sm:$0xff]  }
 0x118   :  { %v9473_v52 = vpop.f32.mrf.mxu0  ;;  %7980 = vmatpush3.bf16.msra.mxu1 %v8694_v46 }
 0x119   :  { %7916 = vmatmul.mubr.msk.bf16.gmra.mxu1 %vm292_vm1, %v8686_v44  ;;  %7981 = vmatprep.subr.bf16.mxu1 %v11998_v0 }
 0x11a   :  { %v7699_v57 = vpop.f32.mrf.mxu0  ;;  %7919 = vmatprep.mubr.msk.bf16.mxu1 %vm292_vm1, %v8687_v47 }
 0x11b   :  { %v8692_v57 = vld [vmem:[%s12028_s28 + $0x238] sm:$0xff]  }
 0x11c   :  { %v9483_v59 = vpop.f32.mrf.mxu0 }
 0x11e   :  { %v7700_v5 = vpop.f32.mrf.mxu0 }
 0x11f   :  { %v9525_v5 = vpop.f32.mrf.mxu1 }
 0x120   :  { %v9490_v6 = vpop.f32.mrf.mxu0  ;;  %12062 = vst [vmem:[#allocation34_spill] sm:$0xff] %v9525_v5  ;;  %v652_v5 = vsel %vm644_vm2, %v9349_v39, 0.0 }
 0x121   :  { %7920 = vmatmul.mubr.msk.bf16.gmra.mxu1 %vm292_vm1, %v8688_v58  ;;  %v9576_v1 = vpop.f32.mrf.mxu1 }
 0x122   :  { %v7703_v12 = vpop.f32.mrf.mxu0  ;;  %7923 = vmatprep.mubr.msk.bf16.mxu1 %vm292_vm1, %v8689_v4  ;;  %12063 = vst [vmem:[#allocation35_spill] sm:$0xff] %v9576_v1 }
 0x123   :  { %v9584_v29 = vpop.f32.mrf.mxu1 }
 0x124   :  { %v9499_v14 = vpop.f32.mrf.mxu0  ;;  %12064 = vst [vmem:[#allocation36_spill] sm:$0xff] %v9584_v29 }
 0x125   :  { %v9592_v38 = vpop.f32.mrf.mxu1 }
 0x126   :  { %v7704_v26 = vpop.f32.mrf.mxu0  ;;  %12065 = vst [vmem:[#allocation37_spill] sm:$0xff] %v9592_v38 }
 0x127   :  { %v9600_v29 = vpop.f32.mrf.mxu1 }
 0x128   :  { %v9506_v30 = vpop.f32.mrf.mxu0  ;;  %12066 = vst [vmem:[#allocation38_spill] sm:$0xff] %v9600_v29 }
 0x129   :  { %7924 = vmatmul.mubr.msk.bf16.gmra.mxu1 %vm292_vm1, %v8690_v13  ;;  %v9608_v31 = vpop.f32.mrf.mxu1 }
 0x12a   :  { %v7707_v44 = vpop.f32.mrf.mxu0  ;;  %7927 = vmatprep.mubr.msk.bf16.mxu1 %vm292_vm1, %v8691_v25  ;;  %12067 = vst [vmem:[#allocation39_spill] sm:$0xff] %v9608_v31 }
 0x12b   :  { %v646_v44 = vsel %vm644_vm2, %v9308_v21, 0.0  ;;  %v9616_v23 = vpop.f32.mrf.mxu1 }
 0x12c   :  { %v9515_v47 = vpop.f32.mrf.mxu0  ;;  %12068 = vst [vmem:[#allocation40_spill] sm:$0xff] %v9616_v23 }
 0x12d   :  { %v9624_v18 = vpop.f32.mrf.mxu1 }
 0x12e   :  { %v7708_v58 = vpop.f32.mrf.mxu0  ;;  %12069 = vst [vmem:[#allocation41_spill] sm:$0xff] %v9624_v18 }
 0x12f   :  { %v645_v58 = vsel %vm644_vm2, %v9297_v17, 0.0  ;;  %v9632_v27 = vpop.f32.mrf.mxu1 }
 0x130   :  { %v9523_v4 = vpop.f32.mrf.mxu0  ;;  %12070 = vst [vmem:[#allocation42_spill] sm:$0xff] %v9632_v27 }
 0x131   :  { %7928 = vmatmul.mubr.msk.bf16.gmra.mxu1 %vm292_vm1, %v8692_v57  ;;  %v648_v57 = vsel %vm644_vm2, %v9323_v28, 0.0  ;;  %v688_v38 = vsel %vm644_vm2, %v9523_v4, 0.0  ;;  %v9640_v20 = vpop.f32.mrf.mxu1 }
 0x132   :  { %v7711_v12 = vpop.f32.mrf.mxu0  ;;  %7983 = vmatprep.mubr.msk.bf16.mxu1 %vm8824_vm0, %v11998_v0  ;;  %v650_v0 = vsel %vm644_vm2, %v9334_v32, 0.0  ;;  %12071 = vst [vmem:[#allocation43_spill] sm:$0xff] %v9640_v20 }
 0x133   :  { %v647_v12 = vadd.f32 %v646_v44, %v645_v58  ;;  %v656_v44 = vsel %vm644_vm2, %v9375_v50, 0.0  ;;  %v9648_v24 = vpop.f32.mrf.mxu1 }
 0x134   :  { %v9530_v13 = vpop.f32.mrf.mxu0  ;;  %12072 = vst [vmem:[#allocation44_spill] sm:$0xff] %v9648_v24 }
 0x135   :  { %v9656_v11 = vpop.f32.mrf.mxu1 }
 0x136   :  { %v7712_v25 = vpop.f32.mrf.mxu0  ;;  %12073 = vst [vmem:[#allocation45_spill] sm:$0xff] %v9656_v11 }
 0x137   :  { %v649_v25 = vadd.f32 %v648_v57, %v647_v12  ;;  %v9664_v51 = vpop.f32.mrf.mxu1 }
 0x138   :  { %v9532_v26 = vpop.f32.mrf.mxu0  ;;  %12074 = vst [vmem:[#allocation46_spill] sm:$0xff] %v9664_v51 }
 0x139   :  { %v651_v36 = vadd.f32 %v650_v0, %v649_v25  ;;  %v660_v0 = vsel %vm644_vm2, %v9401_v61, 0.0  ;;  %v9672_v60 = vpop.f32.mrf.mxu1 }
 0x13a   :  { %v7715_v46 = vpop.f32.mrf.mxu0  ;;  %12075 = vst [vmem:[#allocation47_spill] sm:$0xff] %v9672_v60 }
 0x13b   :  { %v654_v46 = vsel %vm644_vm2, %v9360_v43, 0.0  ;;  %v653_v42 = vadd.f32 %v652_v5, %v651_v36  ;;  %v9680_v35 = vpop.f32.mrf.mxu1 }
 0x13c   :  { %v9540_v48 = vpop.f32.mrf.mxu0  ;;  %12076 = vst [vmem:[#allocation48_spill] sm:$0xff] %v9680_v35 }
 0x13d   :  { %v655_v58 = vadd.f32 %v654_v46, %v653_v42  ;;  %v664_v42 = vsel %vm644_vm2, %v9422_v7, 0.0  ;;  %v9688_v16 = vpop.f32.mrf.mxu1 }
 0x13e   :  { %v7716_v19 = vpop.f32.mrf.mxu0  ;;  %12077 = vst [vmem:[#allocation49_spill] sm:$0xff] %v9688_v16 }
 0x13f   :  { %v658_v19 = vsel %vm644_vm2, %v9386_v54, 0.0  ;;  %v657_v57 = vadd.f32 %v656_v44, %v655_v58  ;;  %v666_v44 = vsel %vm644_vm2, %v9428_v10, 0.0  ;;  %v9696_v53 = vpop.f32.mrf.mxu1 }
 0x140   :  { %v9546_v63 = vpop.f32.mrf.mxu0  ;;  %12078 = vst [vmem:[#allocation50_spill] sm:$0xff] %v9696_v53 }
 0x141   :  { %v659_v25 = vadd.f32 %v658_v19, %v657_v57  ;;  %v668_v19 = vsel %vm644_vm2, %v9438_v15, 0.0  ;;  %v9704_v45 = vpop.f32.mrf.mxu1 }
 0x142   :  { %v7719_v34 = vpop.f32.mrf.mxu0  ;;  %12079 = vst [vmem:[#allocation51_spill] sm:$0xff] %v9704_v45 }
 0x143   :  { %v662_v34 = vsel %vm644_vm2, %v9412_v2, 0.0  ;;  %v661_v36 = vadd.f32 %v660_v0, %v659_v25  ;;  %v670_v0 = vsel %vm644_vm2, %v9444_v22, 0.0 }
 0x144   :  { %v9552_v41 = vpop.f32.mrf.mxu0 }
 0x145   :  { %v663_v46 = vadd.f32 %v662_v34, %v661_v36  ;;  %v672_v34 = vsel %vm644_vm2, %v9454_v33, 0.0 }
 0x146   :  { %v7720_v12 = vpop.f32.mrf.mxu0 }
 0x147   :  { %v665_v58 = vadd.f32 %v664_v42, %v663_v46  ;;  %v674_v42 = vsel %vm644_vm2, %v9460_v37, 0.0 }
 0x148   :  { %v9558_v9 = vpop.f32.mrf.mxu0 }
 0x149   :  { %v667_v57 = vadd.f32 %v666_v44, %v665_v58  ;;  %v676_v58 = vsel %vm644_vm2, %v9473_v52, 0.0 }
 0x14a   :  { %v7723_v5 = vpop.f32.mrf.mxu0 }
 0x14b   :  { %v669_v25 = vadd.f32 %v668_v19, %v667_v57  ;;  %v678_v57 = vsel %vm644_vm2, %v9483_v59, 0.0 }
 0x14c   :  { %v9564_v55 = vpop.f32.mrf.mxu0 }
 0x14d   :  { %v671_v36 = vadd.f32 %v670_v0, %v669_v25 }
 0x14e   :  { %v7724_v12 = vpop.f32.mrf.mxu0 }
 0x14f   :  { %v673_v46 = vadd.f32 %v672_v34, %v671_v36  ;;  %v682_v36 = vsel %vm644_vm2, %v9499_v14, 0.0 }
 0x150   :  { %v9570_v8 = vpop.f32.mrf.mxu0 }
 0x151   :  { %v675_v12 = vadd.f32 %v674_v42, %v673_v46 }
 0x152   :  { %v7727_v5 = vpop.f32.mrf.mxu0 }
 0x153   :  { %v677_v0 = vadd.f32 %v676_v58, %v675_v12  ;;  %v680_v5 = vsel %vm644_vm2, %v9490_v6, 0.0 }
 0x154   :  { %v9578_v56 = vpop.f32.mrf.mxu0 }
 0x155   :  { %v679_v1 = vadd.f32 %v678_v57, %v677_v0  ;;  %v686_v57 = vsel %vm644_vm2, %v9515_v47, 0.0 }
 0x156   :  { %v7728_v44 = vpop.f32.mrf.mxu0 }
 0x157   :  { %v681_v42 = vadd.f32 %v680_v5, %v679_v1  ;;  %v684_v44 = vsel %vm644_vm2, %v9506_v30, 0.0 }
 0x158   :  { %v9586_v19 = vpop.f32.mrf.mxu0 }
 0x159   :  { %v683_v58 = vadd.f32 %v682_v36, %v681_v42  ;;  %v692_v42 = vsel %vm644_vm2, %v9532_v26, 0.0 }
 0x15a   :  { %v7731_v25 = vpop.f32.mrf.mxu0 }
 0x15b   :  { %v685_v0 = vadd.f32 %v684_v44, %v683_v58 }
 0x15c   :  { %v9594_v34 = vpop.f32.mrf.mxu0 }
 0x15d   :  { %v687_v1 = vadd.f32 %v686_v57, %v685_v0  ;;  %v696_v0 = vsel %vm644_vm2, %v9546_v63, 0.0 }
 0x15e   :  { %v7732_v46 = vpop.f32.mrf.mxu0 }
 0x15f   :  { %v690_v46 = vsel %vm644_vm2, %v9530_v13, 0.0  ;;  %v689_v29 = vadd.f32 %v688_v38, %v687_v1 }
 0x160   :  { %v9602_v12 = vpop.f32.mrf.mxu0 }
 0x161   :  { %v691_v44 = vadd.f32 %v690_v46, %v689_v29  ;;  %v700_v46 = vsel %vm644_vm2, %v9558_v9, 0.0 }
 0x162   :  { %v7735_v25 = vpop.f32.mrf.mxu0 }
 0x163   :  { %v694_v25 = vsel %vm644_vm2, %v9540_v48, 0.0  ;;  %v693_v31 = vadd.f32 %v692_v42, %v691_v44 }
 0x164   :  { %v9610_v5 = vpop.f32.mrf.mxu0 }
 0x165   :  { %v695_v38 = vadd.f32 %v694_v25, %v693_v31  ;;  %v704_v25 = vsel %vm644_vm2, %v9570_v8, 0.0 }
 0x166   :  { %v7736_v36 = vpop.f32.mrf.mxu0 }
 0x167   :  { %v698_v36 = vsel %vm644_vm2, %v9552_v41, 0.0  ;;  %v697_v23 = vadd.f32 %v696_v0, %v695_v38 }
 0x168   :  { %v9618_v58 = vpop.f32.mrf.mxu0 }
 0x169   :  { %v699_v42 = vadd.f32 %v698_v36, %v697_v23  ;;  %v708_v36 = vsel %vm644_vm2, %v9586_v19, 0.0 }
 0x16a   :  { %v7739_v57 = vpop.f32.mrf.mxu0 }
 0x16b   :  { %v702_v57 = vsel %vm644_vm2, %v9564_v55, 0.0  ;;  %v701_v18 = vadd.f32 %v700_v46, %v699_v42 }
 0x16c   :  { %v9626_v1 = vpop.f32.mrf.mxu0 }
 0x16d   :  { %v703_v0 = vadd.f32 %v702_v57, %v701_v18  ;;  %v712_v57 = vsel %vm644_vm2, %v9602_v12, 0.0 }
 0x16e   :  { %v7740_v29 = vpop.f32.mrf.mxu0 }
 0x16f   :  { %v706_v29 = vsel %vm644_vm2, %v9578_v56, 0.0  ;;  %v705_v27 = vadd.f32 %v704_v25, %v703_v0 }
 0x170   :  { %v9634_v44 = vpop.f32.mrf.mxu0 }
 0x171   :  { %v707_v46 = vadd.f32 %v706_v29, %v705_v27  ;;  %v716_v29 = vsel %vm644_vm2, %v9618_v58, 0.0 }
 0x172   :  { %v7743_v31 = vpop.f32.mrf.mxu0 }
 0x173   :  { %v710_v31 = vsel %vm644_vm2, %v9594_v34, 0.0  ;;  %v709_v20 = vadd.f32 %v708_v36, %v707_v46 }
 0x174   :  { %v9642_v38 = vpop.f32.mrf.mxu0 }
 0x175   :  { %v711_v25 = vadd.f32 %v710_v31, %v709_v20  ;;  %v720_v31 = vsel %vm644_vm2, %v9634_v44, 0.0 }
 0x176   :  { %v7744_v23 = vpop.f32.mrf.mxu0 }
 0x177   :  { %v714_v23 = vsel %vm644_vm2, %v9610_v5, 0.0  ;;  %v713_v24 = vadd.f32 %v712_v57, %v711_v25 }
 0x178   :  { %v9650_v42 = vpop.f32.mrf.mxu0 }
 0x179   :  { %v715_v36 = vadd.f32 %v714_v23, %v713_v24  ;;  %v724_v23 = vsel %vm644_vm2, %v9650_v42, 0.0 }
 0x17a   :  { %v7747_v18 = vpop.f32.mrf.mxu0 }
 0x17b   :  { %v718_v18 = vsel %vm644_vm2, %v9626_v1, 0.0  ;;  %v717_v11 = vadd.f32 %v716_v29, %v715_v36 }
 0x17c   :  { %v9658_v0 = vpop.f32.mrf.mxu0 }
 0x17d   :  { %v719_v57 = vadd.f32 %v718_v18, %v717_v11 }
 0x17e   :  { %v7748_v27 = vpop.f32.mrf.mxu0 }
 0x17f   :  { %v722_v27 = vsel %vm644_vm2, %v9642_v38, 0.0  ;;  %v721_v51 = vadd.f32 %v720_v31, %v719_v57 }
 0x180   :  { %v9666_v46 = vpop.f32.mrf.mxu0 }
 0x181   :  { %v723_v29 = vadd.f32 %v722_v27, %v721_v51  ;;  %v728_v18 = vsel %vm644_vm2, %v9666_v46, 0.0 }
 0x182   :  { %v7751_v20 = vpop.f32.mrf.mxu0 }
 0x183   :  { %v726_v20 = vsel %vm644_vm2, %v9658_v0, 0.0  ;;  %v725_v60 = vadd.f32 %v724_v23, %v723_v29 }
 0x184   :  { %v9674_v25 = vpop.f32.mrf.mxu0 }
 0x185   :  { %v727_v31 = vadd.f32 %v726_v20, %v725_v60 }
 0x186   :  { %v7752_v24 = vpop.f32.mrf.mxu0 }
 0x187   :  { %v730_v24 = vsel %vm644_vm2, %v9674_v25, 0.0  ;;  %v729_v35 = vadd.f32 %v728_v18, %v727_v31 }
 0x188   :  { %v9682_v36 = vpop.f32.mrf.mxu0 }
 0x189   :  { %v732_v27 = vsel %vm644_vm2, %v9682_v36, 0.0  ;;  %v731_v23 = vadd.f32 %v730_v24, %v729_v35  ;;  %v9710_v24 = vpop.f32.mrf.mxu1 }
 0x18a   :  { %v7755_v11 = vpop.f32.mrf.mxu0  ;;  %12081 = vst [vmem:[#allocation53_spill] sm:$0xff] %v9710_v24 }
 0x18b   :  { %v733_v16 = vadd.f32 %v732_v27, %v731_v23  ;;  %v9716_v40 = vpop.f32.mrf.mxu1 }
 0x18c   :  { %v9690_v57 = vpop.f32.mrf.mxu0  ;;  %12083 = vst [vmem:[#allocation55_spill] sm:$0xff] %v9716_v40 }
 0x18d   :  { %v734_v11 = vsel %vm644_vm2, %v9690_v57, 0.0 }
 0x18e   :  { %v7756_v51 = vpop.f32.mrf.mxu0  ;;  %v735_v18 = vadd.f32 %v734_v11, %v733_v16 }
 0x190   :  { %v9698_v29 = vpop.f32.mrf.mxu0 }
 0x191   :  { %v736_v20 = vsel %vm644_vm2, %v9698_v29, 0.0 }
 0x192   :  { %v7759_v60 = vpop.f32.mrf.mxu0  ;;  %v737_v53 = vadd.f32 %v736_v20, %v735_v18  ;;  %v9722_v18 = vpop.f32.mrf.mxu1 }
 0x193   :  { %12085 = vst [vmem:[#allocation57_spill] sm:$0xff] %v9722_v18 }
 0x194   :  { %v9706_v31 = vpop.f32.mrf.mxu0 }
 0x195   :  { %12080 = vst [vmem:[#allocation52_spill] sm:$0xff] %v9706_v31  ;;  %v738_v51 = vsel %vm644_vm2, %v9706_v31, 0.0 }
 0x196   :  { %v7760_v35 = vpop.f32.mrf.mxu0  ;;  %v739_v3 = vadd.f32 %v738_v51, %v737_v53 }
 0x198   :  { %v9712_v62 = vpop.f32.mrf.mxu0 }
 0x199   :  { %12082 = vst [vmem:[#allocation54_spill] sm:$0xff] %v9712_v62  ;;  %v740_v27 = vsel %vm644_vm2, %v9712_v62, 0.0 }
 0x19a   :  { %v741_v23 = vadd.f32 %v740_v27, %v739_v3  ;;  %v7763_v60 = vpop.f32.mrf.mxu0  ;;  %v9728_v3 = vpop.f32.mrf.mxu1 }
 0x19b   :  { %12087 = vst [vmem:[#allocation59_spill] sm:$0xff] %v9728_v3 }
 0x19c   :  { %v9718_v16 = vpop.f32.mrf.mxu0 }
 0x19d   :  { %12084 = vst [vmem:[#allocation56_spill] sm:$0xff] %v9718_v16  ;;  %v742_v11 = vsel %vm644_vm2, %v9718_v16, 0.0 }
 0x19e   :  { %v743_v45 = vadd.f32 %v742_v11, %v741_v23  ;;  %v7764_v20 = vpop.f32.mrf.mxu0  ;;  %v9734_v23 = vpop.f32.mrf.mxu1 }
 0x19f   :  { %12089 = vst [vmem:[#allocation61_spill] sm:$0xff] %v9734_v23 }
 0x1a0   :  { %v9724_v35 = vpop.f32.mrf.mxu0 }
 0x1a1   :  { %12086 = vst [vmem:[#allocation58_spill] sm:$0xff] %v9724_v35  ;;  %v744_v53 = vsel %vm644_vm2, %v9724_v35, 0.0 }
 0x1a2   :  { %v745_v51 = vadd.f32 %v744_v53, %v743_v45  ;;  %v7767_v24 = vpop.f32.mrf.mxu0  ;;  %v9740_v45 = vpop.f32.mrf.mxu1 }
 0x1a3   :  { %12091 = vst [vmem:[#allocation63_spill] sm:$0xff] %v9740_v45 }
 0x1a4   :  { %v9730_v27 = vpop.f32.mrf.mxu0 }
 0x1a5   :  { %12088 = vst [vmem:[#allocation60_spill] sm:$0xff] %v9730_v27  ;;  %v746_v60 = vsel %vm644_vm2, %v9730_v27, 0.0 }
 0x1a6   :  { %v747_v40 = vadd.f32 %v746_v60, %v745_v51  ;;  %v7768_v49 = vpop.f32.mrf.mxu0  ;;  %v9746_v51 = vpop.f32.mrf.mxu1 }
 0x1a7   :  { %12093 = vst [vmem:[#allocation65_spill] sm:$0xff] %v9746_v51 }
 0x1a8   :  { %v9736_v11 = vpop.f32.mrf.mxu0 }
 0x1a9   :  { %12090 = vst [vmem:[#allocation62_spill] sm:$0xff] %v9736_v11  ;;  %v748_v20 = vsel %vm644_vm2, %v9736_v11, 0.0 }
 0x1aa   :  { %v749_v18 = vadd.f32 %v748_v20, %v747_v40  ;;  %v7771_v35 = vpop.f32.mrf.mxu0  ;;  %v9752_v40 = vpop.f32.mrf.mxu1 }
 0x1ab   :  { %12095 = vst [vmem:[#allocation67_spill] sm:$0xff] %v9752_v40 }
 0x1ac   :  { %v9742_v24 = vpop.f32.mrf.mxu0 }
 0x1ad   :  { %12092 = vst [vmem:[#allocation64_spill] sm:$0xff] %v9742_v24  ;;  %v750_v53 = vsel %vm644_vm2, %v9742_v24, 0.0 }
 0x1ae   :  { %v751_v3 = vadd.f32 %v750_v53, %v749_v18  ;;  %v7772_v27 = vpop.f32.mrf.mxu0  ;;  %v9758_v18 = vpop.f32.mrf.mxu1 }
 0x1af   :  { %12097 = vst [vmem:[#allocation69_spill] sm:$0xff] %v9758_v18 }
 0x1b0   :  { %v9748_v49 = vpop.f32.mrf.mxu0 }
 0x1b1   :  { %12094 = vst [vmem:[#allocation66_spill] sm:$0xff] %v9748_v49  ;;  %v752_v60 = vsel %vm644_vm2, %v9748_v49, 0.0  ;;  %v9761_v49 = vpop.f32.mrf.mxu1 }
 0x1b2   :  { %v753_v23 = vadd.f32 %v752_v60, %v751_v3  ;;  %v7775_v11 = vpop.f32.mrf.mxu0  ;;  %12098 = vst [vmem:[#allocation70_spill] sm:$0xff] %v9761_v49 }
 0x1b3   :  { %v9763_v60 = vpop.f32.mrf.mxu1 }
 0x1b4   :  { %v9754_v35 = vpop.f32.mrf.mxu0 }
 0x1b5   :  { %12096 = vst [vmem:[#allocation68_spill] sm:$0xff] %v9754_v35  ;;  %v754_v20 = vsel %vm644_vm2, %v9754_v35, 0.0  ;;  %v9765_v62 = vpop.f32.mrf.mxu1 }
 0x1b6   :  { %v755_v45 = vadd.f32 %v754_v20, %v753_v23  ;;  %v7776_v24 = vpop.f32.mrf.mxu0  ;;  %12099 = vst [vmem:[#allocation71_spill] sm:$0xff] %v9765_v62 }
 0x1b7   :  { %v9767_v23 = vpop.f32.mrf.mxu1 }
 0x1b8   :  { %v638_v27 = vpop.f32.mrf.mxu0 }
 0x1b9   :  { %v757_v53 = vsel %vm756_vm3, %v638_v27, 0.0  ;;  %v9769_v20 = vpop.f32.mrf.mxu1 }
 0x1ba   :  { %v758_v51 = vadd.f32 %v757_v53, %v755_v45  ;;  %v7779_v16 = vpop.f32.mrf.mxu0  ;;  %12100 = vst [vmem:[#allocation72_spill] sm:$0xff] %v9769_v20 }
 0x1bb   :  { %v9771_v31 = vpop.f32.mrf.mxu1 }
 0x1bc   :  { %v641_v3 = vpop.f32.mrf.mxu0  ;;  %v759_v40 = vrot.slane %v758_v51, 4 }
 0x1bd   :  { %v9773_v16 = vpop.f32.mrf.mxu1 }
 0x1be   :  { %v7780_v11 = vpop.f32.mrf.mxu0  ;;  %v760_v35 = vadd.f32 %v759_v40, %v758_v51  ;;  %12101 = vst [vmem:[#allocation73_spill] sm:$0xff] %v9773_v16 }
 0x1bf   :  { %v9775_v3 = vpop.f32.mrf.mxu1 }
 0x1c0   :  { %v761_v24 = vrot.slane %v760_v35, 2  ;;  %12102 = vst [vmem:[#allocation74_spill] sm:$0xff] %v9775_v3 }
 0x1c1   :  { %v9779_v49 = vpop.f32.mrf.mxu1 }
 0x1c2   :  { %v762_v18 = vadd.f32 %v761_v24, %v760_v35  ;;  %12103 = vst [vmem:[#allocation75_spill] sm:$0xff] %v9779_v49 }
 0x1c3   :  { %v9785_v20 = vpop.f32.mrf.mxu1 }
 0x1c4   :  { %v763_v45 = vrot.slane %v762_v18, 1  ;;  %12104 = vst [vmem:[#allocation76_spill] sm:$0xff] %v9785_v20 }
 0x1c6   :  { %v764_v53 = vadd.f32 %v763_v45, %v762_v18 }
 0x1c8   :  { %v9777_v11 = vmul.f32 0.0022222223, %v764_v53  ;;  %v9791_v53 = vpop.f32.mrf.mxu1 }
 0x1c9   :  { %12105 = vst [vmem:[#allocation77_spill] sm:$0xff] %v9791_v53 }
 0x1ca   :  { %v766_v51 = vsub.f32 %v9297_v17, %v9777_v11  ;;  %v767_v40 = vsub.f32 %v9308_v21, %v9777_v11  ;;  %v768_v35 = vsub.f32 %v9323_v28, %v9777_v11  ;;  %v769_v18 = vsub.f32 %v9334_v32, %v9777_v11  ;;  %v9799_v62 = vpop.f32.mrf.mxu1 }
 0x1cb   :  { %v770_v49 = vsub.f32 %v9349_v39, %v9777_v11  ;;  %v771_v17 = vsub.f32 %v9360_v43, %v9777_v11  ;;  %12106 = vst [vmem:[#allocation78_spill] sm:$0xff] %v9799_v62  ;;  %v772_v32 = vsub.f32 %v9375_v50, %v9777_v11  ;;  %v773_v39 = vsub.f32 %v9386_v54, %v9777_v11 }
 0x1cc   :  { %v823_v24 = vmul.f32 %v766_v51, %v766_v51  ;;  %v824_v45 = vmul.f32 %v767_v40, %v767_v40  ;;  %v825_v16 = vmul.f32 %v768_v35, %v768_v35  ;;  %v826_v21 = vmul.f32 %v769_v18, %v769_v18 }
 0x1cd   :  { %v827_v51 = vmul.f32 %v770_v49, %v770_v49  ;;  %v828_v35 = vmul.f32 %v771_v17, %v771_v17  ;;  %v775_v49 = vsub.f32 %v9412_v2, %v9777_v11 }
 0x1ce   :  { %v880_v20 = vsel %vm644_vm2, %v823_v24, 0.0  ;;  %v881_v3 = vsel %vm644_vm2, %v824_v45, 0.0  ;;  %v883_v40 = vsel %vm644_vm2, %v825_v16, 0.0  ;;  %v885_v43 = vsel %vm644_vm2, %v826_v21, 0.0  ;;  %v9807_v24 = vpop.f32.mrf.mxu1 }
 0x1cf   :  { %v882_v28 = vadd.f32 %v881_v3, %v880_v20  ;;  %12107 = vst [vmem:[#allocation79_spill] sm:$0xff] %v9807_v24  ;;  %v774_v20 = vsub.f32 %v9401_v61, %v9777_v11  ;;  %v829_v3 = vmul.f32 %v772_v32, %v772_v32  ;;  %v887_v45 = vsel %vm644_vm2, %v827_v51, 0.0 }
 0x1d0   :  { %v822_v16 = vsub.f32 %v638_v27, %v9777_v11  ;;  %v889_v54 = vsel %vm644_vm2, %v828_v35, 0.0  ;;  %v9816_v21 = vpop.f32.mrf.mxu1  ;;  %v777_v51 = vsub.f32 %v9428_v10, %v9777_v11  ;;  %v778_v35 = vsub.f32 %v9438_v15, %v9777_v11 }
 0x1d1   :  { %v884_v53 = vadd.f32 %v883_v40, %v882_v28  ;;  %v830_v28 = vmul.f32 %v773_v39, %v773_v39  ;;  %12108 = vst [vmem:[#allocation80_spill] sm:$0xff] %v9816_v21  ;;  %v831_v40 = vmul.f32 %v774_v20, %v774_v20  ;;  %v891_v61 = vsel %vm644_vm2, %v829_v3, 0.0  ;;  %v12189_v21 = vld [vmem:[#allocation39_spill] sm:$0xff] }
 0x1d2   :  { %v879_v2 = vmul.f32 %v822_v16, %v822_v16  ;;  %v779_v3 = vsub.f32 %v9444_v22, %v9777_v11  ;;  %v835_v15 = vmul.f32 %v778_v35, %v778_v35 }
 0x1d3   :  { %v886_v18 = vadd.f32 %v885_v43, %v884_v53  ;;  %v776_v53 = vsub.f32 %v9422_v7, %v9777_v11  ;;  %v832_v43 = vmul.f32 %v775_v49, %v775_v49  ;;  %v893_v27 = vsel %vm644_vm2, %v830_v28, 0.0 }
 0x1d4   :  { %v895_v7 = vsel %vm644_vm2, %v831_v40, 0.0  ;;  %v9833_v49 = vsel %vm756_vm3, %v879_v2, 0.0  ;;  %v781_v40 = vsub.f32 %v9460_v37, %v9777_v11  ;;  %v836_v22 = vmul.f32 %v779_v3, %v779_v3 }
 0x1d5   :  { %v888_v50 = vadd.f32 %v887_v45, %v886_v18  ;;  %v9824_v18 = vpop.f32.mrf.mxu1  ;;  %v833_v45 = vmul.f32 %v776_v53, %v776_v53  ;;  %v897_v10 = vsel %vm644_vm2, %v832_v43, 0.0  ;;  %v782_v43 = vsub.f32 %v9473_v52, %v9777_v11 }
 0x1d6   :  { %v838_v35 = vmul.f32 %v781_v40, %v781_v40 }
 0x1d7   :  { %v890_v17 = vadd.f32 %v889_v54, %v888_v50  ;;  %v834_v50 = vmul.f32 %v777_v51, %v777_v51  ;;  %v9835_v28 = vpop.f32.mrf.mxu1  ;;  %v780_v54 = vsub.f32 %v9454_v33, %v9777_v11  ;;  %v839_v3 = vmul.f32 %v782_v43, %v782_v43 }
 0x1d9   :  { %v892_v32 = vadd.f32 %v891_v61, %v890_v17  ;;  %v899_v17 = vsel %vm644_vm2, %v833_v45, 0.0  ;;  %v901_v61 = vsel %vm644_vm2, %v834_v50, 0.0  ;;  %v9843_v51 = vpop.f32.mrf.mxu1  ;;  %v837_v2 = vmul.f32 %v780_v54, %v780_v54 }
 0x1da   :  { %v905_v45 = vsel %vm644_vm2, %v836_v22, 0.0  ;;  %v909_v54 = vsel %vm644_vm2, %v838_v35, 0.0  ;;  %v911_v40 = vsel %vm644_vm2, %v839_v3, 0.0  ;;  %v787_v22 = vsub.f32 %v9515_v47, %v9777_v11 }
 0x1db   :  { %v894_v39 = vadd.f32 %v893_v27, %v892_v32  ;;  %v903_v27 = vsel %vm644_vm2, %v835_v15, 0.0  ;;  %v907_v50 = vsel %vm644_vm2, %v837_v2, 0.0  ;;  %v788_v2 = vsub.f32 %v9523_v4, %v9777_v11 }
 0x1dc   :  { %v844_v35 = vmul.f32 %v787_v22, %v787_v22 }
 0x1dd   :  { %v896_v20 = vadd.f32 %v895_v7, %v894_v39  ;;  %v783_v39 = vsub.f32 %v9483_v59, %v9777_v11  ;;  %v9851_v7 = vpop.f32.mrf.mxu1  ;;  %v845_v3 = vmul.f32 %v788_v2, %v788_v2 }
 0x1df   :  { %v898_v16 = vadd.f32 %v897_v10, %v896_v20  ;;  %v784_v20 = vsub.f32 %v9490_v6, %v9777_v11  ;;  %v785_v10 = vsub.f32 %v9499_v14, %v9777_v11  ;;  %v9859_v15 = vpop.f32.mrf.mxu1 }
 0x1e1   :  { %v900_v53 = vadd.f32 %v899_v17, %v898_v16  ;;  %v840_v16 = vmul.f32 %v783_v39, %v783_v39  ;;  %v786_v17 = vsub.f32 %v9506_v30, %v9777_v11  ;;  %v9867_v43 = vpop.f32.mrf.mxu1  ;;  %v789_v39 = vsub.f32 %v9530_v13, %v9777_v11 }
 0x1e3   :  { %v902_v32 = vadd.f32 %v901_v61, %v900_v53  ;;  %v841_v53 = vmul.f32 %v784_v20, %v784_v20  ;;  %v842_v61 = vmul.f32 %v785_v10, %v785_v10  ;;  %v790_v20 = vsub.f32 %v9532_v26, %v9777_v11 }
 0x1e4   :  { %v846_v10 = vmul.f32 %v789_v39, %v789_v39 }
 0x1e5   :  { %v904_v33 = vadd.f32 %v903_v27, %v902_v32  ;;  %v913_v32 = vsel %vm644_vm2, %v840_v16, 0.0  ;;  %v843_v27 = vmul.f32 %v786_v17, %v786_v17  ;;  %v921_v16 = vsel %vm644_vm2, %v844_v35, 0.0 }
 0x1e6   :  { %v847_v17 = vmul.f32 %v790_v20, %v790_v20  ;;  %v925_v22 = vsel %vm644_vm2, %v846_v10, 0.0  ;;  %v796_v35 = vsub.f32 %v9570_v8, %v9777_v11  ;;  %v797_v20 = vsub.f32 %v9578_v56, %v9777_v11 }
 0x1e7   :  { %v906_v37 = vadd.f32 %v905_v45, %v904_v33  ;;  %v915_v33 = vsel %vm644_vm2, %v841_v53, 0.0  ;;  %v917_v45 = vsel %vm644_vm2, %v842_v61, 0.0  ;;  %v923_v53 = vsel %vm644_vm2, %v845_v3, 0.0 }
 0x1e8   :  { %v927_v2 = vsel %vm644_vm2, %v847_v17, 0.0  ;;  %v853_v10 = vmul.f32 %v796_v35, %v796_v35 }
 0x1e9   :  { %v908_v52 = vadd.f32 %v907_v50, %v906_v37  ;;  %v9875_v37 = vpop.f32.mrf.mxu1  ;;  %v919_v50 = vsel %vm644_vm2, %v843_v27, 0.0  ;;  %v795_v27 = vsub.f32 %v9564_v55, %v9777_v11 }
 0x1eb   :  { %v910_v59 = vadd.f32 %v909_v54, %v908_v52  ;;  %v791_v52 = vsub.f32 %v9540_v48, %v9777_v11  ;;  %v9883_v54 = vpop.f32.mrf.mxu1  ;;  %v852_v3 = vmul.f32 %v795_v27, %v795_v27 }
 0x1ed   :  { %v912_v6 = vadd.f32 %v911_v40, %v910_v59  ;;  %v792_v59 = vsub.f32 %v9546_v63, %v9777_v11  ;;  %v793_v40 = vsub.f32 %v9552_v41, %v9777_v11  ;;  %v9891_v61 = vpop.f32.mrf.mxu1  ;;  %v937_v17 = vsel %vm644_vm2, %v852_v3, 0.0 }
 0x1ee   :  { %12109 = vst [vmem:[#allocation81_spill] sm:$0xff] %v9891_v61 }
 0x1ef   :  { %v914_v14 = vadd.f32 %v913_v32, %v912_v6  ;;  %v848_v6 = vmul.f32 %v791_v52, %v791_v52  ;;  %v794_v32 = vsub.f32 %v9558_v9, %v9777_v11  ;;  %v9899_v39 = vpop.f32.mrf.mxu1  ;;  %v798_v52 = vsub.f32 %v9586_v19, %v9777_v11 }
 0x1f1   :  { %v916_v30 = vadd.f32 %v915_v33, %v914_v14  ;;  %v849_v14 = vmul.f32 %v792_v59, %v792_v59  ;;  %v850_v33 = vmul.f32 %v793_v40, %v793_v40  ;;  %v854_v59 = vmul.f32 %v797_v20, %v797_v20 }
 0x1f2   :  { %v855_v40 = vmul.f32 %v798_v52, %v798_v52  ;;  %v805_v20 = vsub.f32 %v9642_v38, %v9777_v11  ;;  %v806_v52 = vsub.f32 %v9650_v42, %v9777_v11 }
 0x1f3   :  { %v918_v47 = vadd.f32 %v917_v45, %v916_v30  ;;  %v929_v30 = vsel %vm644_vm2, %v848_v6, 0.0  ;;  %v851_v45 = vmul.f32 %v794_v32, %v794_v32  ;;  %v939_v6 = vsel %vm644_vm2, %v853_v10, 0.0 }
 0x1f4   :  { %v941_v32 = vsel %vm644_vm2, %v854_v59, 0.0  ;;  %v943_v27 = vsel %vm644_vm2, %v855_v40, 0.0 }
 0x1f5   :  { %v920_v4 = vadd.f32 %v919_v50, %v918_v47  ;;  %v931_v47 = vsel %vm644_vm2, %v849_v14, 0.0  ;;  %v933_v50 = vsel %vm644_vm2, %v850_v33, 0.0  ;;  %v803_v33 = vsub.f32 %v9626_v1, %v9777_v11 }
 0x1f7   :  { %v922_v13 = vadd.f32 %v921_v16, %v920_v4  ;;  %v9907_v4 = vpop.f32.mrf.mxu1  ;;  %v935_v16 = vsel %vm644_vm2, %v851_v45, 0.0  ;;  %v804_v45 = vsub.f32 %v9634_v44, %v9777_v11  ;;  %v860_v3 = vmul.f32 %v803_v33, %v803_v33 }
 0x1f8   :  { %12110 = vst [vmem:[#allocation82_spill] sm:$0xff] %v9907_v4 }
 0x1f9   :  { %v924_v26 = vadd.f32 %v923_v53, %v922_v13  ;;  %v799_v13 = vsub.f32 %v9594_v34, %v9777_v11  ;;  %v9915_v53 = vpop.f32.mrf.mxu1  ;;  %v861_v10 = vmul.f32 %v804_v45, %v804_v45  ;;  %v953_v59 = vsel %vm644_vm2, %v860_v3, 0.0  ;;  %v12117_v45 = vld [vmem:[#allocation52_spill] sm:$0xff]  ;;  %v12118_v3 = vld [vmem:[#allocation54_spill] sm:$0xff] }
 0x1fa   :  { %12111 = vst [vmem:[#allocation83_spill] sm:$0xff] %v9915_v53 }
 0x1fb   :  { %v926_v48 = vadd.f32 %v925_v22, %v924_v26  ;;  %v800_v26 = vsub.f32 %v9602_v12, %v9777_v11  ;;  %v801_v22 = vsub.f32 %v9610_v5, %v9777_v11  ;;  %v9923_v14 = vpop.f32.mrf.mxu1  ;;  %v955_v40 = vsel %vm644_vm2, %v861_v10, 0.0  ;;  %v12119_v10 = vld [vmem:[#allocation56_spill] sm:$0xff] }
 0x1fc   :  { %12112 = vst [vmem:[#allocation84_spill] sm:$0xff] %v9923_v14 }
 0x1fd   :  { %v928_v63 = vadd.f32 %v927_v2, %v926_v48  ;;  %v856_v48 = vmul.f32 %v799_v13, %v799_v13  ;;  %v802_v2 = vsub.f32 %v9618_v58, %v9777_v11  ;;  %v9931_v35 = vpop.f32.mrf.mxu1  ;;  %v862_v13 = vmul.f32 %v805_v20, %v805_v20 }
 0x1fe   :  { %12113 = vst [vmem:[#allocation85_spill] sm:$0xff] %v9931_v35 }
 0x1ff   :  { %v930_v41 = vadd.f32 %v929_v30, %v928_v63  ;;  %v857_v63 = vmul.f32 %v800_v26, %v800_v26  ;;  %v858_v30 = vmul.f32 %v801_v22, %v801_v22  ;;  %v863_v26 = vmul.f32 %v806_v52, %v806_v52 }
 0x200   :  { %v957_v22 = vsel %vm644_vm2, %v862_v13, 0.0 }
 0x201   :  { %v932_v9 = vadd.f32 %v931_v47, %v930_v41  ;;  %v945_v41 = vsel %vm644_vm2, %v856_v48, 0.0  ;;  %v859_v47 = vmul.f32 %v802_v2, %v802_v2  ;;  %v959_v2 = vsel %vm644_vm2, %v863_v26, 0.0 }
 0x203   :  { %v934_v55 = vadd.f32 %v933_v50, %v932_v9  ;;  %v947_v9 = vsel %vm644_vm2, %v857_v63, 0.0  ;;  %v949_v50 = vsel %vm644_vm2, %v858_v30, 0.0  ;;  %v811_v63 = vsub.f32 %v9690_v57, %v9777_v11 }
 0x204   :  { %v812_v30 = vsub.f32 %v9698_v29, %v9777_v11 }
 0x205   :  { %v936_v8 = vadd.f32 %v935_v16, %v934_v55  ;;  %v9939_v55 = vpop.f32.mrf.mxu1  ;;  %v951_v16 = vsel %vm644_vm2, %v859_v47, 0.0  ;;  %v813_v47 = vsub.f32 %v12117_v45, %v9777_v11 }
 0x206   :  { %12114 = vst [vmem:[#allocation86_spill] sm:$0xff] %v9939_v55 }
 0x207   :  { %v938_v56 = vadd.f32 %v937_v17, %v936_v8  ;;  %v807_v8 = vsub.f32 %v9658_v0, %v9777_v11  ;;  %v9947_v17 = vpop.f32.mrf.mxu1 }
 0x208   :  { %12115 = vst [vmem:[#allocation87_spill] sm:$0xff] %v9947_v17 }
 0x209   :  { %v940_v19 = vadd.f32 %v939_v6, %v938_v56  ;;  %v808_v56 = vsub.f32 %v9666_v46, %v9777_v11  ;;  %v809_v6 = vsub.f32 %v9674_v25, %v9777_v11  ;;  %v9955_v48 = vpop.f32.mrf.mxu1 }
 0x20b   :  { %v942_v34 = vadd.f32 %v941_v32, %v940_v19  ;;  %v864_v19 = vmul.f32 %v807_v8, %v807_v8  ;;  %v810_v32 = vsub.f32 %v9682_v36, %v9777_v11  ;;  %v9963_v33 = vpop.f32.mrf.mxu1 }
 0x20c   :  { %12116 = vst [vmem:[#allocation88_spill] sm:$0xff] %v9963_v33 }
 0x20d   :  { %v944_v12 = vadd.f32 %v943_v27, %v942_v34  ;;  %v865_v34 = vmul.f32 %v808_v56, %v808_v56  ;;  %v866_v27 = vmul.f32 %v809_v6, %v809_v6  ;;  %v9971_v20 = vpop.f32.mrf.mxu1  ;;  %v12122_v6 = vld [vmem:[#allocation60_spill] sm:$0xff] }
 0x20f   :  { %v946_v5 = vadd.f32 %v945_v41, %v944_v12  ;;  %v961_v12 = vsel %vm644_vm2, %v864_v19, 0.0  ;;  %v867_v41 = vmul.f32 %v810_v32, %v810_v32  ;;  %v817_v19 = vsub.f32 %v12122_v6, %v9777_v11 }
 0x211   :  { %v948_v58 = vadd.f32 %v947_v9, %v946_v5  ;;  %v963_v5 = vsel %vm644_vm2, %v865_v34, 0.0  ;;  %v868_v9 = vmul.f32 %v811_v63, %v811_v63  ;;  %v967_v52 = vsel %vm644_vm2, %v867_v41, 0.0 }
 0x212   :  { %v874_v41 = vmul.f32 %v817_v19, %v817_v19 }
 0x213   :  { %v950_v1 = vadd.f32 %v949_v50, %v948_v58  ;;  %v965_v58 = vsel %vm644_vm2, %v866_v27, 0.0  ;;  %v814_v50 = vsub.f32 %v12118_v3, %v9777_v11  ;;  %v969_v8 = vsel %vm644_vm2, %v868_v9, 0.0 }
 0x215   :  { %v952_v44 = vadd.f32 %v951_v16, %v950_v1  ;;  %v869_v1 = vmul.f32 %v812_v30, %v812_v30  ;;  %v815_v16 = vsub.f32 %v12119_v10, %v9777_v11  ;;  %v871_v26 = vmul.f32 %v814_v50, %v814_v50  ;;  %v12127_v50 = vld [vmem:[#allocation68_spill] sm:$0xff] }
 0x217   :  { %v954_v38 = vadd.f32 %v953_v59, %v952_v44  ;;  %v870_v44 = vmul.f32 %v813_v47, %v813_v47  ;;  %v9979_v59 = vpop.f32.mrf.mxu1  ;;  %v975_v27 = vsel %vm644_vm2, %v871_v26, 0.0  ;;  %v12126_v47 = vld [vmem:[#allocation66_spill] sm:$0xff] }
 0x218   :  { %12120 = vst [vmem:[#allocation52_spill] sm:$0xff] %v9979_v59  ;;  %v820_v9 = vsub.f32 %v12126_v47, %v9777_v11  ;;  %v12163_v59 = vld [vmem:[#allocation16_spill] sm:$0xff] }
 0x219   :  { %v956_v42 = vadd.f32 %v955_v40, %v954_v38  ;;  %v12121_v38 = vld [vmem:[#allocation58_spill] sm:$0xff]  ;;  %v971_v40 = vsel %vm644_vm2, %v869_v1, 0.0  ;;  %v9987_v34 = vpop.f32.mrf.mxu1  ;;  %v821_v1 = vsub.f32 %v12127_v50, %v9777_v11 }
 0x21a   :  { %v816_v56 = vsub.f32 %v12121_v38, %v9777_v11  ;;  %12123 = vst [vmem:[#allocation54_spill] sm:$0xff] %v9987_v34 }
 0x21b   :  { %v958_v0 = vadd.f32 %v957_v22, %v956_v42  ;;  %v872_v22 = vmul.f32 %v815_v16, %v815_v16  ;;  %v9995_v45 = vpop.f32.mrf.mxu1  ;;  %v878_v38 = vmul.f32 %v821_v1, %v821_v1  ;;  %v8695_v1 = vld [vmem:[%s12055_s0 + $0x10] sm:$0xff]  }
 0x21c   :  { %v873_v63 = vmul.f32 %v816_v56, %v816_v56  ;;  %7934 = vmatpush3.bf16.msra.mxu0 %v8695_v1 }
 0x21d   :  { %v960_v46 = vadd.f32 %v959_v2, %v958_v0  ;;  %v973_v0 = vsel %vm644_vm2, %v870_v44, 0.0  ;;  %v12124_v2 = vld [vmem:[#allocation62_spill] sm:$0xff]  ;;  %v10003_v16 = vpop.f32.mrf.mxu1  ;;  %v877_v44 = vmul.f32 %v820_v9, %v820_v9  ;;  %v989_v19 = vsel %vm644_vm2, %v878_v38, 0.0 }
 0x21e   :  { %12128 = vst [vmem:[#allocation56_spill] sm:$0xff] %v10003_v16  ;;  %v12190_v16 = vld [vmem:[#allocation41_spill] sm:$0xff] }
 0x21f   :  { %v962_v25 = vadd.f32 %v961_v12, %v960_v46  ;;  %v818_v46 = vsub.f32 %v12124_v2, %v9777_v11 }
 0x221   :  { %v964_v36 = vadd.f32 %v963_v5, %v962_v25  ;;  %v12125_v25 = vld [vmem:[#allocation64_spill] sm:$0xff]  ;;  %v977_v5 = vsel %vm644_vm2, %v872_v22, 0.0 }
 0x222   :  { %v819_v30 = vsub.f32 %v12125_v25, %v9777_v11 }
 0x223   :  { %v966_v57 = vadd.f32 %v965_v58, %v964_v36  ;;  %v875_v58 = vmul.f32 %v818_v46, %v818_v46 }
 0x225   :  { %v968_v29 = vadd.f32 %v967_v52, %v966_v57  ;;  %v979_v57 = vsel %vm644_vm2, %v873_v63, 0.0  ;;  %v876_v52 = vmul.f32 %v819_v30, %v819_v30 }
 0x227   :  { %v970_v13 = vadd.f32 %v969_v8, %v968_v29  ;;  %v981_v29 = vsel %vm644_vm2, %v874_v41, 0.0  ;;  %v983_v8 = vsel %vm644_vm2, %v875_v58, 0.0  ;;  %v985_v56 = vsel %vm644_vm2, %v876_v52, 0.0  ;;  %v8696_v52 = vld [vmem:[%s12055_s0 + $0x20] sm:$0xff]  }
 0x228   :  { %7982 = vmatpush3.bf16.msra.mxu1 %v8696_v52 }
 0x229   :  { %v972_v42 = vadd.f32 %v971_v40, %v970_v13  ;;  %v10007_v40 = vpop.f32.mrf.mxu1 }
 0x22b   :  { %v974_v32 = vadd.f32 %v973_v0, %v972_v42  ;;  %v987_v42 = vsel %vm644_vm2, %v877_v44, 0.0  ;;  %v10011_v0 = vpop.f32.mrf.mxu1 }
 0x22c   :  { %12129 = vst [vmem:[#allocation58_spill] sm:$0xff] %v10011_v0 }
 0x22d   :  { %v976_v12 = vadd.f32 %v975_v27, %v974_v32  ;;  %v10014_v2 = vpop.f32.mrf.mxu1 }
 0x22e   :  { %12130 = vst [vmem:[#allocation60_spill] sm:$0xff] %v10014_v2 }
 0x22f   :  { %v978_v36 = vadd.f32 %v977_v5, %v976_v12  ;;  %v10016_v46 = vpop.f32.mrf.mxu1 }
 0x230   :  { %12131 = vst [vmem:[#allocation62_spill] sm:$0xff] %v10016_v46  ;;  %v10103_v46 = vld [vmem:[%s12161_s3] ss:$0 sm:$0xff] }
 0x231   :  { %v980_v3 = vadd.f32 %v979_v57, %v978_v36  ;;  %v10018_v63 = vpop.f32.mrf.mxu1 }
 0x232   :  { %12132 = vst [vmem:[#allocation64_spill] sm:$0xff] %v10018_v63  ;;  %v12184_v63 = vld [vmem:[#allocation30_spill] sm:$0xff] }
 0x233   :  { %v982_v10 = vadd.f32 %v981_v29, %v980_v3  ;;  %v10020_v27 = vpop.f32.mrf.mxu1 }
 0x234   :  { %12133 = vst [vmem:[#allocation66_spill] sm:$0xff] %v10020_v27 }
 0x235   :  { %v984_v13 = vadd.f32 %v983_v8, %v982_v10  ;;  %v10022_v12 = vpop.f32.mrf.mxu1  ;;  %v12148_v10 = vmov 0.0  }
 0x236   :  { %12134 = vst [vmem:[#allocation68_spill] sm:$0xff] %v10022_v12  ;;  %7955 = vmatprep.subr.bf16.mxu0 %v12148_v10  ;;  %8027 = vmatprep.subr.bf16.mxu1 %v12148_v10 }
 0x237   :  { %v986_v26 = vadd.f32 %v985_v56, %v984_v13  ;;  %v10024_v25 = vpop.f32.mrf.mxu1 }
 0x238   :  { %12135 = vst [vmem:[#allocation89_spill] sm:$0xff] %v10024_v25 }
 0x239   :  { %v988_v6 = vadd.f32 %v987_v42, %v986_v26  ;;  %v10026_v30 = vpop.f32.mrf.mxu1 }
 0x23a   :  { %12136 = vst [vmem:[#allocation90_spill] sm:$0xff] %v10026_v30 }
 0x23b   :  { %v990_v22 = vadd.f32 %v989_v19, %v988_v6  ;;  %v10028_v41 = vpop.f32.mrf.mxu1 }
 0x23c   :  { %12137 = vst [vmem:[#allocation91_spill] sm:$0xff] %v10028_v41 }
 0x23d   :  { %v992_v32 = vadd.f32 %v9833_v49, %v990_v22  ;;  %v10030_v5 = vpop.f32.mrf.mxu1 }
 0x23e   :  { %12138 = vst [vmem:[#allocation92_spill] sm:$0xff] %v10030_v5 }
 0x23f   :  { %v10032_v36 = vpop.f32.mrf.mxu1  ;;  %v993_v13 = vrot.slane %v992_v32, 4 }
 0x240   :  { %12139 = vst [vmem:[#allocation93_spill] sm:$0xff] %v10032_v36 }
 0x241   :  { %v10034_v49 = vpop.f32.mrf.mxu1  ;;  %v994_v56 = vadd.f32 %v993_v13, %v992_v32 }
 0x242   :  { %12140 = vst [vmem:[#allocation94_spill] sm:$0xff] %v10034_v49 }
 0x243   :  { %v10036_v47 = vpop.f32.mrf.mxu1  ;;  %v995_v42 = vrot.slane %v994_v56, 2 }
 0x244   :  { %12141 = vst [vmem:[#allocation95_spill] sm:$0xff] %v10036_v47 }
 0x245   :  { %v10038_v9 = vpop.f32.mrf.mxu1  ;;  %v996_v19 = vadd.f32 %v995_v42, %v994_v56 }
 0x246   :  { %12142 = vst [vmem:[#allocation96_spill] sm:$0xff] %v10038_v9  ;;  %v12181_v9 = vld [vmem:[#allocation20_spill] sm:$0xff] }
 0x247   :  { %v10040_v58 = vpop.f32.mrf.mxu1  ;;  %v997_v1 = vrot.slane %v996_v19, 1  ;;  %v2349_v0 = vsub.f32 %v12181_v9, %v9777_v11  ;;  %v12183_v9 = vld [vmem:[#allocation28_spill] sm:$0xff] }
 0x248   :  { %12143 = vst [vmem:[#allocation97_spill] sm:$0xff] %v10040_v58  ;;  %v2357_v24 = vsub.f32 %v12183_v9, %v9777_v11 }
 0x249   :  { %v10042_v57 = vpop.f32.mrf.mxu1  ;;  %v998_v36 = vadd.f32 %v997_v1, %v996_v19  ;;  %v12156_v19 = vld [vmem:[#allocation14_spill] sm:$0xff] }
 0x24a   :  { %12144 = vst [vmem:[#allocation98_spill] sm:$0xff] %v10042_v57  ;;  %v2342_v1 = vsub.f32 %v12156_v19, %v9777_v11 }
 0x24b   :  { %v10044_v3 = vpop.f32.mrf.mxu1  ;;  %v999_v49 = vmul.f32 0.0022222223, %v998_v36  ;;  %v12157_v36 = vld [vmem:[#allocation11_spill] sm:$0xff] }
 0x24c   :  { %12145 = vst [vmem:[#allocation99_spill] sm:$0xff] %v10044_v3  ;;  %v12165_v3 = vld [vmem:[#allocation26_spill] sm:$0xff] }
 0x24d   :  { %v10046_v50 = vpop.f32.mrf.mxu1  ;;  %v1000_v5 = vadd.f32 1e-05, %v999_v49  ;;  %v12158_v49 = vld [vmem:[#allocation19_spill] sm:$0xff]  ;;  %v2354_v33 = vsub.f32 %v12165_v3, %v9777_v11 }
 0x24e   :  { %12146 = vst [vmem:[#allocation100_spill] sm:$0xff] %v10046_v50 }
 0x24f   :  { %v10054_v29 = vpop.f32.mrf.mxu1  ;;  %8813 = vrsqrt.f32 %v1000_v5  ;;  %v12159_v5 = vld [vmem:[#allocation21_spill] sm:$0xff] }
 0x250   :  { %12147 = vst [vmem:[#allocation101_spill] sm:$0xff] %v10054_v29  ;;  %v2352_v27 = vsub.f32 %v12159_v5, %v9777_v11  ;;  %v2345_v29 = vsub.f32 %v12163_v59, %v9777_v11 }
 0x251   :  { %v10058_v44 = vpop.f32.mrf.mxu1 }
 0x252   :  { %12149 = vst [vmem:[#allocation102_spill] sm:$0xff] %v10058_v44 }
 0x253   :  { %v10060_v8 = vpop.f32.mrf.mxu1 }
 0x254   :  { %12150 = vst [vmem:[#allocation103_spill] sm:$0xff] %v10060_v8 }
 0x255   :  { %v10062_v38 = vpop.f32.mrf.mxu1 }
 0x256   :  { %12151 = vst [vmem:[#allocation104_spill] sm:$0xff] %v10062_v38 }
 0x257   :  { %v10064_v26 = vpop.f32.mrf.mxu1 }
 0x259   :  { %v10066_v6 = vpop.f32.mrf.mxu1 }
 0x25a   :  { %12152 = vst [vmem:[#allocation105_spill] sm:$0xff] %v10066_v6  ;;  %v2351_v6 = vsub.f32 %v12158_v49, %v9777_v11 }
 0x25b   :  { %v10068_v22 = vpop.f32.mrf.mxu1 }
 0x25c   :  { %12153 = vst [vmem:[#allocation106_spill] sm:$0xff] %v10068_v22  ;;  %v10086_v22 = vpop.eup %8813 }
 0x25d   :  { %v10070_v52 = vpop.f32.mrf.mxu1  ;;  %v2486_v30 = vmul.f32 %v10086_v22, %v2342_v1  ;;  %v2495_v19 = vmul.f32 %v10086_v22, %v2351_v6  ;;  %v12162_v1 = vld [vmem:[#allocation13_spill] sm:$0xff]  ;;  %v2489_v44 = vmul.f32 %v10086_v22, %v2345_v29 }
 0x25f   :  { %v10072_v41 = vpop.f32.mrf.mxu1  ;;  %v2636_v49 = vmul.f32 %v10103_v46, %v2486_v30  ;;  %v2645_v6 = vmul.f32 %v10103_v46, %v2495_v19  ;;  %v12164_v30 = vld [vmem:[#allocation24_spill] sm:$0xff]  ;;  %v2498_v19 = vmul.f32 %v10086_v22, %v2354_v33 }
 0x260   :  { %v2456_v34 = vsub.f32 %v10072_v41, %v9777_v11 }
 0x261   :  { %v10074_v8 = vpop.f32.mrf.mxu1 }
 0x262   :  { %12154 = vst [vmem:[#allocation107_spill] sm:$0xff] %v10074_v8  ;;  %v2343_v8 = vsub.f32 %v12157_v36, %v9777_v11  ;;  %v2496_v36 = vmul.f32 %v10086_v22, %v2352_v27 }
 0x263   :  { %v10076_v25 = vpop.f32.mrf.mxu1 }
 0x264   :  { %v2646_v27 = vmul.f32 %v10103_v46, %v2496_v36 }
 0x265   :  { %v10078_v32 = vpop.f32.mrf.mxu1 }
 0x267   :  { %v10080_v13 = vpop.f32.mrf.mxu1 }
 0x268   :  { %v2460_v41 = vsub.f32 %v10080_v13, %v9777_v11 }
 0x269   :  { %v10082_v56 = vpop.f32.mrf.mxu1 }
 0x26a   :  { %12155 = vst [vmem:[#allocation108_spill] sm:$0xff] %v10082_v56  ;;  %v2487_v56 = vmul.f32 %v10086_v22, %v2343_v8  ;;  %v10114_v8 = vld [vmem:[%s11977_s4] ss:$0 sm:$0xff] }
 0x26b   :  { %v10084_v42 = vpop.f32.mrf.mxu1  ;;  %v2786_v50 = vadd.f32 %v10114_v8, %v2636_v49  ;;  %v2795_v36 = vadd.f32 %v10114_v8, %v2645_v6  ;;  %v2648_v6 = vmul.f32 %v10103_v46, %v2498_v19  ;;  %v12173_v19 = vld [vmem:[#allocation4_spill] sm:$0xff] }
 0x26c   :  { %v2637_v38 = vmul.f32 %v10103_v46, %v2487_v56  ;;  %v2353_v56 = vsub.f32 %v12164_v30, %v9777_v11  ;;  %v2796_v30 = vadd.f32 %v10114_v8, %v2646_v27 }
 0x26d   :  { %v10098_v12 = vpop.f32.mrf.mxu1  ;;  %v2930_v17 = vmax.f32 %v2786_v50, 0.0  ;;  %v2939_v47 = vmax.f32 %v2795_v36, 0.0  ;;  %v12171_v50 = vld [vmem:[#allocation25_spill] sm:$0xff]  ;;  %v12179_v36 = vld [vmem:[#allocation7_spill] sm:$0xff] }
 0x26e   :  { %12160 = vst [vmem:[#allocation14_spill] sm:$0xff] %v10098_v12  ;;  %v2344_v12 = vsub.f32 %v12162_v1, %v9777_v11  ;;  %v2787_v1 = vadd.f32 %v10114_v8, %v2637_v38  ;;  %v2497_v59 = vmul.f32 %v10086_v22, %v2353_v56  ;;  %v12168_v38 = vld [vmem:[#allocation18_spill] sm:$0xff]  ;;  %v2940_v27 = vmax.f32 %v2796_v30, 0.0 }
 0x26f   :  { %v10109_v5 = vpop.f32.mrf.mxu1  ;;  %v2346_v49 = vsub.f32 %v12168_v38, %v9777_v11  ;;  %v12174_v30 = vld [vmem:[#allocation6_spill] sm:$0xff] }
 0x270   :  { %v2488_v55 = vmul.f32 %v10086_v22, %v2344_v12  ;;  %v2639_v12 = vmul.f32 %v10103_v46, %v2489_v44  ;;  %v2931_v29 = vmax.f32 %v2787_v1, 0.0  ;;  %v2647_v33 = vmul.f32 %v10103_v46, %v2497_v59 }
 0x271   :  { %v10130_v14 = vpop.f32.mrf.mxu1  ;;  %v2356_v44 = vsub.f32 %v12171_v50, %v9777_v11  ;;  %v2490_v1 = vmul.f32 %v10086_v22, %v2346_v49  ;;  %v8697_v49 = vld [vmem:[%s12055_s0 + $0x8] sm:$0xff]  }
 0x272   :  { %12166 = vst [vmem:[#allocation11_spill] sm:$0xff] %v10130_v14  ;;  %v2638_v3 = vmul.f32 %v10103_v46, %v2488_v55  ;;  %v12169_v14 = vld [vmem:[#allocation15_spill] sm:$0xff]  ;;  %v3074_v4 = vpack.c.bf16 %v2931_v29, %v2930_v17  ;;  %v2798_v17 = vadd.f32 %v10114_v8, %v2648_v6 }
 0x273   :  { %v10138_v58 = vpop.f32.mrf.mxu1  ;;  %v2347_v56 = vsub.f32 %v12169_v14, %v9777_v11  ;;  %v12170_v55 = vld [vmem:[#allocation23_spill] sm:$0xff]  ;;  %v2789_v14 = vadd.f32 %v10114_v8, %v2639_v12  ;;  %v3281_v12 = vpack.c.bf16 %v2940_v27, %v2939_v47 }
 0x274   :  { %12167 = vst [vmem:[#allocation19_spill] sm:$0xff] %v10138_v58  ;;  %v2355_v35 = vsub.f32 %v12170_v55, %v9777_v11  ;;  %v2788_v38 = vadd.f32 %v10114_v8, %v2638_v3  ;;  %v2797_v3 = vadd.f32 %v10114_v8, %v2647_v33  ;;  %7936 = vmatmul.mubr.msk.bf16.vlgmr.msra.gmra.mxu0 %vm644_vm2, %v3074_v4  ;;  %v8698_v29 = vld [vmem:[%s12055_s0 + $0x48] sm:$0xff]   ;;  %v12176_v55 = vld [vmem:[#allocation5_spill] sm:$0xff]  ;;  %v12178_v33 = vld [vmem:[#allocation10_spill] sm:$0xff] }
 0x275   :  { %v2491_v58 = vmul.f32 %v10086_v22, %v2347_v56  ;;  %v10154_v59 = vpop.f32.mrf.mxu1  ;;  %v2500_v56 = vmul.f32 %v10086_v22, %v2356_v44  ;;  %v12175_v50 = vld [vmem:[#allocation3_spill] sm:$0xff]  ;;  %7939 = vmatprep.mubr.msk.bf16.mxu0 %vm8824_vm0, %v12148_v10  ;;  %v2640_v4 = vmul.f32 %v10103_v46, %v2490_v1  ;;  %v2933_v27 = vmax.f32 %v2789_v14, 0.0  ;;  %7984 = vmatmul.mubr.msk.bf16.vlgmr.msra.gmra.mxu1 %vm644_vm2, %v3281_v12  ;;  %v12180_v44 = vld [vmem:[#allocation17_spill] sm:$0xff] }
 0x276   :  { %12172 = vst [vmem:[#allocation21_spill] sm:$0xff] %v10154_v59  ;;  %v2499_v57 = vmul.f32 %v10086_v22, %v2355_v35  ;;  %v12177_v59 = vld [vmem:[#allocation8_spill] sm:$0xff]  ;;  %v2932_v6 = vmax.f32 %v2788_v38, 0.0  ;;  %v2348_v53 = vsub.f32 %v12180_v44, %v9777_v11  ;;  %7987 = vmatprep.mubr.msk.bf16.mxu1 %vm8824_vm0, %v12148_v10  ;;  %7956 = vmatpush3.bf16.msra.mxu0 %v8697_v49  ;;  %v2941_v14 = vmax.f32 %v2797_v3, 0.0  ;;  %v12182_v44 = vld [vmem:[#allocation22_spill] sm:$0xff] }
 0x277   :  { %v2641_v47 = vmul.f32 %v10103_v46, %v2491_v58  ;;  %v10183_v61 = vpop.f32.mrf.mxu1  ;;  %v8699_v58 = vld [vmem:[%s12055_s0] sm:$0xff]   ;;  %v2650_v38 = vmul.f32 %v10103_v46, %v2500_v56  ;;  %v2942_v12 = vmax.f32 %v2798_v17, 0.0  ;;  %8028 = vmatpush3.bf16.msra.mxu1 %v8698_v29  ;;  %v2350_v35 = vsub.f32 %v12182_v44, %v9777_v11  ;;  %7957 = vmatprep.subr.bf16.mxu0 %v12148_v10 }
 0x278   :  { %v2649_v1 = vmul.f32 %v10103_v46, %v2499_v57  ;;  %v2358_v49 = vsub.f32 %v12184_v63, %v9777_v11  ;;  %v2492_v2 = vmul.f32 %v10086_v22, %v2348_v53  ;;  %v2493_v57 = vmul.f32 %v10086_v22, %v2349_v0  ;;  %8029 = vmatprep.subr.bf16.mxu1 %v12148_v10  ;;  %v12186_v44 = vld [vmem:[#allocation27_spill] sm:$0xff]  ;;  %v12187_v63 = vld [vmem:[#allocation40_spill] sm:$0xff]  ;;  %v12188_v53 = vld [vmem:[#allocation42_spill] sm:$0xff] }
 0x279   :  { %v2790_v56 = vadd.f32 %v10114_v8, %v2640_v4  ;;  %v2791_v3 = vadd.f32 %v10114_v8, %v2641_v47  ;;  %v3075_v17 = vpack.c.bf16 %v2933_v27, %v2932_v6  ;;  %v10210_v29 = vpop.f32.mrf.mxu1  ;;  %v2359_v9 = vsub.f32 %v12186_v44, %v9777_v11  ;;  %v8700_v44 = vld [vmem:[%s12055_s0 + $0x40] sm:$0xff]  }
 0x27a   :  { %12185 = vst [vmem:[#allocation13_spill] sm:$0xff] %v10210_v29  ;;  %v2501_v0 = vmul.f32 %v10086_v22, %v2357_v24  ;;  %7958 = vmatpush3.bf16.msra.mxu0 %v8699_v58  ;;  %v2502_v4 = vmul.f32 %v10086_v22, %v2358_v49  ;;  %v2799_v47 = vadd.f32 %v10114_v8, %v2649_v1  ;;  %v12191_v58 = vld [vmem:[#allocation44_spill] sm:$0xff]  ;;  %v12192_v1 = vld [vmem:[#allocation46_spill] sm:$0xff] }
 0x27b   :  { %v2800_v6 = vadd.f32 %v10114_v8, %v2650_v38  ;;  %v3282_v27 = vpack.c.bf16 %v2942_v12, %v2941_v14  ;;  %v2642_v38 = vmul.f32 %v10103_v46, %v2492_v2  ;;  %v2643_v14 = vmul.f32 %v10103_v46, %v2493_v57  ;;  %v10239_v62 = vpop.f32.mrf.mxu1  ;;  %8030 = vmatpush3.bf16.msra.mxu1 %v8700_v44 }
 0x27c   :  { %7940 = vmatmul.mubr.msk.bf16.gmra.mxu0 %vm644_vm2, %v3075_v17  ;;  %v2934_v12 = vmax.f32 %v2790_v56, 0.0  ;;  %v2935_v17 = vmax.f32 %v2791_v3, 0.0  ;;  %v2452_v24 = vsub.f32 %v10064_v26, %v9777_v11  ;;  %v2453_v49 = vsub.f32 %v10070_v52, %v9777_v11  ;;  %8003 = vmatprep.subr.bf16.mxu0 %v12148_v10 }
 0x27d   :  { %7943 = vmatprep.mubr.msk.bf16.mxu0 %vm8824_vm0, %v12148_v10  ;;  %7988 = vmatmul.mubr.msk.bf16.gmra.mxu1 %vm644_vm2, %v3282_v27  ;;  %v2459_v2 = vsub.f32 %v10076_v25, %v9777_v11  ;;  %v2651_v57 = vmul.f32 %v10103_v46, %v2501_v0  ;;  %v2652_v56 = vmul.f32 %v10103_v46, %v2502_v4  ;;  %v2943_v3 = vmax.f32 %v2799_v47, 0.0  ;;  %v10265_v44 = vpop.f32.mrf.mxu1 }
 0x27e   :  { %7991 = vmatprep.mubr.msk.bf16.mxu1 %vm8824_vm0, %v12148_v10  ;;  %v2944_v27 = vmax.f32 %v2800_v6, 0.0  ;;  %v2494_v26 = vmul.f32 %v10086_v22, %v2350_v35  ;;  %v2457_v52 = vsub.f32 %v10078_v32, %v9777_v11  ;;  %v2463_v25 = vsub.f32 %v10084_v42, %v9777_v11  ;;  %8075 = vmatprep.subr.bf16.mxu1 %v12148_v10 }
 0x27f   :  { %v2792_v0 = vadd.f32 %v10114_v8, %v2642_v38  ;;  %v2793_v4 = vadd.f32 %v10114_v8, %v2643_v14  ;;  %v3076_v47 = vpack.c.bf16 %v2935_v17, %v2934_v12  ;;  %v2596_v6 = vmul.f32 %v10086_v22, %v2452_v24 }
 0x280   :  { %v2503_v32 = vmul.f32 %v10086_v22, %v2359_v9  ;;  %v2597_v13 = vmul.f32 %v10086_v22, %v2453_v49  ;;  %v2600_v35 = vmul.f32 %v10086_v22, %v2456_v34  ;;  %v2464_v42 = vsub.f32 %v10109_v5, %v9777_v11 }
 0x281   :  { %v2801_v38 = vadd.f32 %v10114_v8, %v2651_v57  ;;  %v2802_v14 = vadd.f32 %v10114_v8, %v2652_v56  ;;  %v3283_v12 = vpack.c.bf16 %v2944_v27, %v2943_v3  ;;  %v2746_v24 = vmul.f32 %v10103_v46, %v2596_v6 }
 0x282   :  { %v12193_v17 = vsub.f32 %v12173_v19, %v9777_v11  ;;  %v2747_v49 = vmul.f32 %v10103_v46, %v2597_v13  ;;  %v2644_v57 = vmul.f32 %v10103_v46, %v2494_v26  ;;  %v2936_v56 = vmax.f32 %v2792_v0, 0.0 }
 0x283   :  { %v2937_v3 = vmax.f32 %v2793_v4, 0.0  ;;  %v2896_v27 = vadd.f32 %v10114_v8, %v2746_v24  ;;  %v12194_v19 = vsub.f32 %v12174_v30, %v9777_v11  ;;  %v12195_v6 = vsub.f32 %v12175_v50, %v9777_v11  ;;  %v10306_v24 = vpop.f32.mrf.mxu1 }
 0x284   :  { %7944 = vmatmul.mubr.msk.bf16.gmra.mxu0 %vm644_vm2, %v3076_v47  ;;  %v2477_v9 = vmul.f32 %v10086_v22, %v12193_v17  ;;  %v2897_v17 = vadd.f32 %v10114_v8, %v2747_v49  ;;  %v2750_v26 = vmul.f32 %v10103_v46, %v2600_v35  ;;  %v2653_v0 = vmul.f32 %v10103_v46, %v2503_v32 }
 0x285   :  { %7947 = vmatprep.mubr.msk.bf16.mxu0 %vm8824_vm0, %v12148_v10  ;;  %7992 = vmatmul.mubr.msk.bf16.gmra.mxu1 %vm644_vm2, %v3283_v12  ;;  %v2478_v47 = vmul.f32 %v10086_v22, %v12194_v19  ;;  %v10299_v13 = vmul.f32 %v10086_v22, %v12195_v6  ;;  %v2945_v4 = vmax.f32 %v2801_v38, 0.0  ;;  %v2946_v12 = vmax.f32 %v2802_v14, 0.0 }
 0x286   :  { %7995 = vmatprep.mubr.msk.bf16.mxu1 %vm8824_vm0, %v12148_v10  ;;  %v3040_v30 = vmax.f32 %v2896_v27, 0.0  ;;  %v12196_v50 = vsub.f32 %v12176_v55, %v9777_v11  ;;  %v12197_v49 = vsub.f32 %v12187_v63, %v9777_v11  ;;  %v12198_v6 = vsub.f32 %v12188_v53, %v9777_v11 }
 0x287   :  { %v3041_v38 = vmax.f32 %v2897_v17, 0.0  ;;  %v2627_v14 = vmul.f32 %v10103_v46, %v2477_v9  ;;  %v2794_v27 = vadd.f32 %v10114_v8, %v2644_v57  ;;  %v3077_v5 = vpack.c.bf16 %v2937_v3, %v2936_v56 }
 0x288   :  { %v2480_v19 = vmul.f32 %v10086_v22, %v12196_v50  ;;  %v2513_v35 = vmul.f32 %v10086_v22, %v12197_v49  ;;  %v2514_v32 = vmul.f32 %v10086_v22, %v12198_v6  ;;  %v2603_v55 = vmul.f32 %v10086_v22, %v2459_v2  ;;  %v10331_v6 = vpop.f32.mrf.mxu1 }
 0x289   :  { %v10323_v34 = vpack.c.bf16 %v3041_v38, %v3040_v30  ;;  %v2900_v50 = vadd.f32 %v10114_v8, %v2750_v26  ;;  %v2601_v63 = vmul.f32 %v10086_v22, %v2457_v52  ;;  %v2604_v49 = vmul.f32 %v10086_v22, %v2460_v41 }
 0x28a   :  { %v2803_v53 = vadd.f32 %v10114_v8, %v2653_v0  ;;  %v3284_v29 = vpack.c.bf16 %v2946_v12, %v2945_v4  ;;  %v2753_v17 = vmul.f32 %v10103_v46, %v2603_v55  ;;  %v2607_v9 = vmul.f32 %v10086_v22, %v2463_v25  ;;  %v10351_v38 = vpop.f32.mrf.mxu1 }
 0x28b   :  { %v2628_v2 = vmul.f32 %v10103_v46, %v2478_v47  ;;  %v2751_v57 = vmul.f32 %v10103_v46, %v2601_v63  ;;  %v2754_v56 = vmul.f32 %v10103_v46, %v2604_v49  ;;  %v2608_v52 = vmul.f32 %v10086_v22, %v2464_v42 }
 0x28c   :  { %7948 = vmatmul.mubr.msk.bf16.gmra.mxu0 %vm644_vm2, %v3077_v5  ;;  %v2663_v41 = vmul.f32 %v10103_v46, %v2513_v35  ;;  %v2938_v3 = vmax.f32 %v2794_v27, 0.0  ;;  %v2903_v25 = vadd.f32 %v10114_v8, %v2753_v17  ;;  %v2757_v26 = vmul.f32 %v10103_v46, %v2607_v9 }
 0x28d   :  { %7951 = vmatprep.mubr.msk.bf16.mxu0 %vm8824_vm0, %v12148_v10  ;;  %7996 = vmatmul.mubr.msk.bf16.gmra.mxu1 %vm644_vm2, %v3284_v29  ;;  %v3044_v5 = vmax.f32 %v2900_v50, 0.0  ;;  %v2901_v47 = vadd.f32 %v10114_v8, %v2751_v57  ;;  %v2904_v0 = vadd.f32 %v10114_v8, %v2754_v56  ;;  %v2758_v4 = vmul.f32 %v10103_v46, %v2608_v52 }
 0x28e   :  { %7999 = vmatprep.mubr.msk.bf16.mxu1 %vm8824_vm0, %v12148_v10  ;;  %v2664_v42 = vmul.f32 %v10103_v46, %v2514_v32  ;;  %v2947_v12 = vmax.f32 %v2803_v53, 0.0  ;;  %v3047_v30 = vmax.f32 %v2903_v25, 0.0  ;;  %v2907_v35 = vadd.f32 %v10114_v8, %v2757_v26 }
 0x28f   :  { %v12199_v29 = vsub.f32 %v12189_v21, %v9777_v11  ;;  %v3045_v55 = vmax.f32 %v2901_v47, 0.0  ;;  %v3048_v50 = vmax.f32 %v2904_v0, 0.0  ;;  %v2908_v63 = vadd.f32 %v10114_v8, %v2758_v4 }
 0x290   :  { %v2777_v49 = vadd.f32 %v10114_v8, %v2627_v14  ;;  %v2778_v17 = vadd.f32 %v10114_v8, %v2628_v2  ;;  %v3078_v32 = vpack.c.bf16 %v2938_v3, %v2938_v3  ;;  %v3051_v53 = vmax.f32 %v2907_v35, 0.0  ;;  %v2316_v3 = vpop.f32.mrf.mxu1 }
 0x291   :  { %v2515_v27 = vmul.f32 %v10086_v22, %v12199_v29  ;;  %v12200_v9 = vsub.f32 %v12190_v16, %v9777_v11  ;;  %v10364_v56 = vpack.c.bf16 %v3045_v55, %v3044_v5  ;;  %v10366_v21 = vpack.c.bf16 %v3048_v50, %v3047_v30 }
 0x292   :  { %v3052_v52 = vmax.f32 %v2908_v63, 0.0  ;;  %v2813_v25 = vadd.f32 %v10114_v8, %v2663_v41  ;;  %v2814_v26 = vadd.f32 %v10114_v8, %v2664_v42  ;;  %v3285_v47 = vpack.c.bf16 %v2947_v12, %v2947_v12 }
 0x293   :  { %v2516_v57 = vmul.f32 %v10086_v22, %v12200_v9  ;;  %v12201_v14 = vsub.f32 %v10183_v61, %v9777_v11  ;;  %v2629_v16 = vmul.f32 %v10103_v46, %v10299_v13  ;;  %v12202_v0 = vsub.f32 %v10265_v44, %v9777_v11  ;;  %v8701_v9 = vld [vmem:[%s12055_s0 + $0x38] sm:$0xff]  }
 0x294   :  { %7952 = vmatmul.mubr.msk.bf16.gmra.mxu0 %vm644_vm2, %v3078_v32  ;;  %v10377_v5 = vpack.c.bf16 %v3052_v52, %v3051_v53  ;;  %v2472_v4 = vsub.f32 %v10306_v24, %v9777_v11  ;;  %v2630_v61 = vmul.f32 %v10103_v46, %v2480_v19  ;;  %v2921_v42 = vmax.f32 %v2777_v49, 0.0 }
 0x295   :  { %v2612_v2 = vmul.f32 %v10086_v22, %v12201_v14  ;;  %v2613_v41 = vmul.f32 %v10086_v22, %v12202_v0  ;;  %7959 = vmatprep.mubr.msk.bf16.mxu0 %vm8824_vm0, %v12148_v10  ;;  %v2922_v12 = vmax.f32 %v2778_v17, 0.0  ;;  %8000 = vmatmul.mubr.msk.bf16.gmra.mxu1 %vm644_vm2, %v3285_v47  ;;  %v2665_v13 = vmul.f32 %v10103_v46, %v2515_v27 }
 0x296   :  { %v2616_v35 = vmul.f32 %v10086_v22, %v2472_v4  ;;  %v2473_v29 = vsub.f32 %v2316_v3, %v9777_v11  ;;  %8031 = vmatprep.mubr.msk.bf16.mxu1 %vm8824_vm0, %v12148_v10  ;;  %v2666_v24 = vmul.f32 %v10103_v46, %v2516_v57  ;;  %v2957_v19 = vmax.f32 %v2813_v25, 0.0 }
 0x297   :  { %v2762_v30 = vmul.f32 %v10103_v46, %v2612_v2  ;;  %v2763_v44 = vmul.f32 %v10103_v46, %v2613_v41  ;;  %v2958_v55 = vmax.f32 %v2814_v26, 0.0  ;;  %v12203_v63 = vsub.f32 %v12177_v59, %v9777_v11 }
 0x298   :  { %v12204_v49 = vsub.f32 %v12178_v33, %v9777_v11  ;;  %v2766_v53 = vmul.f32 %v10103_v46, %v2616_v35  ;;  %v2779_v57 = vadd.f32 %v10114_v8, %v2629_v16  ;;  %v2780_v52 = vadd.f32 %v10114_v8, %v2630_v61  ;;  %v8702_v16 = vld [vmem:[%s12055_s0 + $0x68] sm:$0xff]  }
 0x299   :  { %v2912_v50 = vadd.f32 %v10114_v8, %v2762_v30  ;;  %v2481_v27 = vmul.f32 %v10086_v22, %v12203_v63  ;;  %v2913_v32 = vadd.f32 %v10114_v8, %v2763_v44  ;;  %v3065_v59 = vpack.c.bf16 %v2922_v12, %v2921_v42  ;;  %v8703_v30 = vld [vmem:[%s12055_s0 + $0x30] sm:$0xff]   ;;  %v8704_v63 = vld [vmem:[%s12055_s0 + $0x60] sm:$0xff]  }
 0x29a   :  { %v2482_v17 = vmul.f32 %v10086_v22, %v12204_v49  ;;  %v12205_v26 = vsub.f32 %v12191_v58, %v9777_v11  ;;  %v12206_v47 = vsub.f32 %v12192_v1, %v9777_v11  ;;  %v2815_v2 = vadd.f32 %v10114_v8, %v2665_v13  ;;  %v12207_v1 = vld [vmem:[#allocation9_spill] sm:$0xff] }
 0x29b   :  { %v3056_v25 = vmax.f32 %v2912_v50, 0.0  ;;  %v3057_v3 = vmax.f32 %v2913_v32, 0.0  ;;  %v2816_v0 = vadd.f32 %v10114_v8, %v2666_v24  ;;  %v3515_v41 = vpack.c.bf16 %v2958_v55, %v2957_v19  ;;  %v12208_v24 = vld [vmem:[#allocation43_spill] sm:$0xff] }
 0x29c   :  { %v2517_v33 = vmul.f32 %v10086_v22, %v12205_v26  ;;  %v2518_v14 = vmul.f32 %v10086_v22, %v12206_v47  ;;  %v2916_v4 = vadd.f32 %v10114_v8, %v2766_v53  ;;  %v2617_v58 = vmul.f32 %v10086_v22, %v2473_v29  ;;  %7960 = vmatmul.mubr.msk.bf16.vlgmr.msra.gmra.mxu0 %vm644_vm2, %v3065_v59  ;;  %v12209_v53 = vld [vmem:[#allocation45_spill] sm:$0xff] }
 0x29d   :  { %v2340_v61 = vsub.f32 %v12207_v1, %v9777_v11  ;;  %v2631_v42 = vmul.f32 %v10103_v46, %v2481_v27  ;;  %v10432_v12 = vpack.c.bf16 %v3057_v3, %v3056_v25  ;;  %7963 = vmatprep.mubr.msk.bf16.mxu0 %vm8824_vm0, %v12148_v10  ;;  %8004 = vmatpush3.bf16.msra.mxu0 %v8701_v9  ;;  %v2923_v44 = vmax.f32 %v2779_v57, 0.0 }
 0x29e   :  { %v2632_v13 = vmul.f32 %v10103_v46, %v2482_v17  ;;  %v2924_v35 = vmax.f32 %v2780_v52, 0.0  ;;  %v2767_v29 = vmul.f32 %v10103_v46, %v2617_v58  ;;  %8032 = vmatmul.mubr.msk.bf16.vlgmr.msra.gmra.mxu1 %vm644_vm2, %v3515_v41  ;;  %v2375_v19 = vsub.f32 %v12208_v24, %v9777_v11  ;;  %8005 = vmatprep.subr.bf16.mxu0 %v12148_v10 }
 0x29f   :  { %v2667_v55 = vmul.f32 %v10103_v46, %v2517_v33  ;;  %v2668_v50 = vmul.f32 %v10103_v46, %v2518_v14  ;;  %8035 = vmatprep.mubr.msk.bf16.mxu1 %vm8824_vm0, %v12148_v10  ;;  %8076 = vmatpush3.bf16.msra.mxu1 %v8702_v16  ;;  %v2959_v27 = vmax.f32 %v2815_v2, 0.0  ;;  %v2960_v49 = vmax.f32 %v2816_v0, 0.0 }
 0x2a0   :  { %v3060_v17 = vmax.f32 %v2916_v4, 0.0  ;;  %v2917_v32 = vadd.f32 %v10114_v8, %v2767_v29  ;;  %v2376_v9 = vsub.f32 %v12209_v53, %v9777_v11  ;;  %v12210_v57 = vsub.f32 %v12179_v36, %v9777_v11  ;;  %8077 = vmatprep.subr.bf16.mxu1 %v12148_v10  ;;  %v12212_v29 = vld [vmem:[#allocation48_spill] sm:$0xff] }
 0x2a1   :  { %v2484_v59 = vmul.f32 %v10086_v22, %v2340_v61  ;;  %8006 = vmatpush3.bf16.msra.mxu0 %v8703_v30  ;;  %v2781_v25 = vadd.f32 %v10114_v8, %v2631_v42  ;;  %v2782_v26 = vadd.f32 %v10114_v8, %v2632_v13  ;;  %v3066_v33 = vpack.c.bf16 %v2924_v35, %v2923_v44  ;;  %v12211_v61 = vld [vmem:[#allocation12_spill] sm:$0xff] }
 0x2a2   :  { %v2483_v52 = vmul.f32 %v10086_v22, %v12210_v57  ;;  %v3061_v47 = vmax.f32 %v2917_v32, 0.0  ;;  %8051 = vmatprep.subr.bf16.mxu0 %v12148_v10  ;;  %v2519_v14 = vmul.f32 %v10086_v22, %v2375_v19  ;;  %v2520_v2 = vmul.f32 %v10086_v22, %v2376_v9 }
 0x2a3   :  { %v2817_v36 = vadd.f32 %v10114_v8, %v2667_v55  ;;  %8078 = vmatpush3.bf16.msra.mxu1 %v8704_v63  ;;  %v2818_v3 = vadd.f32 %v10114_v8, %v2668_v50  ;;  %v3516_v16 = vpack.c.bf16 %v2960_v49, %v2959_v27  ;;  %v2634_v4 = vmul.f32 %v10103_v46, %v2484_v59 }
 0x2a4   :  { %v10468_v0 = vpack.c.bf16 %v3061_v47, %v3060_v17  ;;  %7964 = vmatmul.mubr.msk.bf16.gmra.mxu0 %vm644_vm2, %v3066_v33  ;;  %8123 = vmatprep.subr.bf16.mxu1 %v12148_v10  ;;  %v2633_v41 = vmul.f32 %v10103_v46, %v2483_v52  ;;  %v2925_v58 = vmax.f32 %v2781_v25, 0.0  ;;  %v2926_v1 = vmax.f32 %v2782_v26, 0.0  ;;  %v12213_v52 = vld [vmem:[#allocation29_spill] sm:$0xff]  ;;  %v12214_v25 = vld [vmem:[#allocation32_spill] sm:$0xff] }
 0x2a5   :  { %7967 = vmatprep.mubr.msk.bf16.mxu0 %vm8824_vm0, %v12148_v10  ;;  %v2341_v42 = vsub.f32 %v12211_v61, %v9777_v11  ;;  %v2669_v30 = vmul.f32 %v10103_v46, %v2519_v14  ;;  %v2670_v13 = vmul.f32 %v10103_v46, %v2520_v2  ;;  %v2961_v44 = vmax.f32 %v2817_v36, 0.0  ;;  %v12215_v2 = vld [vmem:[#allocation59_spill] sm:$0xff] }
 0x2a6   :  { %8036 = vmatmul.mubr.msk.bf16.gmra.mxu1 %vm644_vm2, %v3516_v16  ;;  %v2962_v35 = vmax.f32 %v2818_v3, 0.0  ;;  %v2377_v24 = vsub.f32 %v12212_v29, %v9777_v11  ;;  %v2783_v55 = vadd.f32 %v10114_v8, %v2633_v41  ;;  %v2784_v50 = vadd.f32 %v10114_v8, %v2634_v4  ;;  %v12216_v3 = vld [vmem:[#allocation63_spill] sm:$0xff] }
 0x2a7   :  { %8039 = vmatprep.mubr.msk.bf16.mxu1 %vm8824_vm0, %v12148_v10  ;;  %v2485_v19 = vmul.f32 %v10086_v22, %v2341_v42  ;;  %v3067_v63 = vpack.c.bf16 %v2926_v1, %v2925_v58  ;;  %v2819_v49 = vadd.f32 %v10114_v8, %v2669_v30  ;;  %v2820_v17 = vadd.f32 %v10114_v8, %v2670_v13 }
 0x2a8   :  { %v2521_v27 = vmul.f32 %v10086_v22, %v2377_v24  ;;  %v3517_v32 = vpack.c.bf16 %v2962_v35, %v2961_v44  ;;  %v2927_v9 = vmax.f32 %v2783_v55, 0.0  ;;  %v2928_v57 = vmax.f32 %v2784_v50, 0.0  ;;  %v12217_v24 = vld [vmem:[#allocation34_spill] sm:$0xff]  ;;  %v12218_v55 = vld [vmem:[#allocation31_spill] sm:$0xff] }
 0x2a9   :  { %v2635_v53 = vmul.f32 %v10103_v46, %v2485_v19  ;;  %v2360_v59 = vsub.f32 %v12213_v52, %v9777_v11  ;;  %v2361_v26 = vsub.f32 %v12214_v25, %v9777_v11  ;;  %v2963_v47 = vmax.f32 %v2819_v49, 0.0 }
 0x2aa   :  { %v2671_v33 = vmul.f32 %v10103_v46, %v2521_v27  ;;  %v2964_v14 = vmax.f32 %v2820_v17, 0.0  ;;  %v2387_v36 = vsub.f32 %v12215_v2, %v9777_v11  ;;  %v2388_v16 = vsub.f32 %v12216_v3, %v9777_v11  ;;  %v12219_v17 = vld [vmem:[#allocation69_spill] sm:$0xff] }
 0x2ab   :  { %v2504_v41 = vmul.f32 %v10086_v22, %v2360_v59  ;;  %v2505_v4 = vmul.f32 %v10086_v22, %v2361_v26  ;;  %v2785_v58 = vadd.f32 %v10114_v8, %v2635_v53  ;;  %v3068_v1 = vpack.c.bf16 %v2928_v57, %v2927_v9 }
 0x2ac   :  { %7968 = vmatmul.mubr.msk.bf16.gmra.mxu0 %vm644_vm2, %v3067_v63  ;;  %v2531_v61 = vmul.f32 %v10086_v22, %v2387_v36  ;;  %v2532_v42 = vmul.f32 %v10086_v22, %v2388_v16  ;;  %v2821_v30 = vadd.f32 %v10114_v8, %v2671_v33  ;;  %v3518_v13 = vpack.c.bf16 %v2964_v14, %v2963_v47 }
 0x2ad   :  { %7971 = vmatprep.mubr.msk.bf16.mxu0 %vm8824_vm0, %v12148_v10  ;;  %v2654_v44 = vmul.f32 %v10103_v46, %v2504_v41  ;;  %v2655_v35 = vmul.f32 %v10103_v46, %v2505_v4  ;;  %v2929_v29 = vmax.f32 %v2785_v58, 0.0  ;;  %v2362_v19 = vsub.f32 %v12217_v24, %v9777_v11  ;;  %v12220_v41 = vld [vmem:[#allocation33_spill] sm:$0xff]  ;;  %v12221_v58 = vld [vmem:[#allocation36_spill] sm:$0xff] }
 0x2ae   :  { %8040 = vmatmul.mubr.msk.bf16.gmra.mxu1 %vm644_vm2, %v3517_v32  ;;  %v2363_v50 = vsub.f32 %v12218_v55, %v9777_v11  ;;  %v2681_v63 = vmul.f32 %v10103_v46, %v2531_v61  ;;  %v2682_v27 = vmul.f32 %v10103_v46, %v2532_v42  ;;  %v2965_v49 = vmax.f32 %v2821_v30, 0.0  ;;  %v8705_v55 = vld [vmem:[%s12055_s0 + $0x58] sm:$0xff]  }
 0x2af   :  { %8043 = vmatprep.mubr.msk.bf16.mxu1 %vm8824_vm0, %v12148_v10  ;;  %v2389_v32 = vsub.f32 %v12219_v17, %v9777_v11  ;;  %v2390_v53 = vsub.f32 %v9763_v60, %v9777_v11  ;;  %v2506_v9 = vmul.f32 %v10086_v22, %v2362_v19  ;;  %v2804_v52 = vadd.f32 %v10114_v8, %v2654_v44  ;;  %v12222_v44 = vld [vmem:[#allocation67_spill] sm:$0xff] }
 0x2b0   :  { %v2507_v57 = vmul.f32 %v10086_v22, %v2363_v50  ;;  %v2805_v59 = vadd.f32 %v10114_v8, %v2655_v35  ;;  %v3069_v25 = vpack.c.bf16 %v2929_v29, %v2929_v29  ;;  %v2831_v47 = vadd.f32 %v10114_v8, %v2681_v63  ;;  %v12223_v29 = vld [vmem:[#allocation70_spill] sm:$0xff] }
 0x2b1   :  { %v2533_v26 = vmul.f32 %v10086_v22, %v2389_v32  ;;  %v2534_v33 = vmul.f32 %v10086_v22, %v2390_v53  ;;  %v2832_v14 = vadd.f32 %v10114_v8, %v2682_v27  ;;  %v3519_v2 = vpack.c.bf16 %v2965_v49, %v2965_v49  ;;  %v8706_v32 = vld [vmem:[%s12055_s0 + $0x88] sm:$0xff]  }
 0x2b2   :  { %v2656_v60 = vmul.f32 %v10103_v46, %v2506_v9  ;;  %v2657_v36 = vmul.f32 %v10103_v46, %v2507_v57  ;;  %v2948_v3 = vmax.f32 %v2804_v52, 0.0  ;;  %v2949_v16 = vmax.f32 %v2805_v59, 0.0  ;;  %v8707_v59 = vld [vmem:[%s12055_s0 + $0x50] sm:$0xff]  }
 0x2b3   :  { %v2364_v4 = vsub.f32 %v12220_v41, %v9777_v11  ;;  %v2683_v61 = vmul.f32 %v10103_v46, %v2533_v26  ;;  %v2684_v42 = vmul.f32 %v10103_v46, %v2534_v33  ;;  %v2975_v30 = vmax.f32 %v2831_v47, 0.0 }
 0x2b4   :  { %7972 = vmatmul.mubr.msk.bf16.gmra.mxu0 %vm644_vm2, %v3068_v1  ;;  %v2365_v1 = vsub.f32 %v12221_v58, %v9777_v11  ;;  %v2391_v35 = vsub.f32 %v12222_v44, %v9777_v11  ;;  %v2392_v24 = vsub.f32 %v12223_v29, %v9777_v11  ;;  %v2806_v63 = vadd.f32 %v10114_v8, %v2656_v60  ;;  %v12225_v60 = vld [vmem:[#allocation35_spill] sm:$0xff] }
 0x2b5   :  { %7975 = vmatprep.mubr.msk.bf16.mxu0 %vm8824_vm0, %v12148_v10  ;;  %v2508_v19 = vmul.f32 %v10086_v22, %v2364_v4  ;;  %v2807_v27 = vadd.f32 %v10114_v8, %v2657_v36  ;;  %v3398_v49 = vpack.c.bf16 %v2949_v16, %v2948_v3  ;;  %v2833_v9 = vadd.f32 %v10114_v8, %v2683_v61  ;;  %v8708_v3 = vld [vmem:[%s12055_s0 + $0x80] sm:$0xff]  }
 0x2b6   :  { %8044 = vmatmul.mubr.msk.bf16.gmra.mxu1 %vm644_vm2, %v3518_v13  ;;  %v2976_v13 = vmax.f32 %v2832_v14, 0.0  ;;  %v2509_v50 = vmul.f32 %v10086_v22, %v2365_v1  ;;  %v2535_v17 = vmul.f32 %v10086_v22, %v2391_v35  ;;  %v2536_v53 = vmul.f32 %v10086_v22, %v2392_v24  ;;  %v12224_v14 = vld [vmem:[#allocation38_spill] sm:$0xff] }
 0x2b7   :  { %8047 = vmatprep.mubr.msk.bf16.mxu1 %vm8824_vm0, %v12148_v10  ;;  %v2834_v57 = vadd.f32 %v10114_v8, %v2684_v42  ;;  %v2950_v33 = vmax.f32 %v2806_v63, 0.0  ;;  %v2951_v47 = vmax.f32 %v2807_v27, 0.0  ;;  %v2367_v36 = vsub.f32 %v12225_v60, %v9777_v11 }
 0x2b8   :  { %v3749_v52 = vpack.c.bf16 %v2976_v13, %v2975_v30  ;;  %v2659_v26 = vmul.f32 %v10103_v46, %v2509_v50  ;;  %v2685_v16 = vmul.f32 %v10103_v46, %v2535_v17  ;;  %v2686_v41 = vmul.f32 %v10103_v46, %v2536_v53 }
 0x2b9   :  { %v2977_v4 = vmax.f32 %v2833_v9, 0.0  ;;  %v2978_v58 = vmax.f32 %v2834_v57, 0.0  ;;  %v2393_v1 = vsub.f32 %v9767_v23, %v9777_v11  ;;  %v2394_v61 = vsub.f32 %v9771_v31, %v9777_v11 }
 0x2ba   :  { %v2511_v30 = vmul.f32 %v10086_v22, %v2367_v36  ;;  %v2809_v44 = vadd.f32 %v10114_v8, %v2659_v26  ;;  %v3399_v35 = vpack.c.bf16 %v2951_v47, %v2950_v33  ;;  %v2835_v23 = vadd.f32 %v10114_v8, %v2685_v16 }
 0x2bb   :  { %v2537_v29 = vmul.f32 %v10086_v22, %v2393_v1  ;;  %v2538_v24 = vmul.f32 %v10086_v22, %v2394_v61  ;;  %v2836_v31 = vadd.f32 %v10114_v8, %v2686_v41  ;;  %v12229_v1 = vld [vmem:[#allocation47_spill] sm:$0xff] }
 0x2bc   :  { %7976 = vmatmul.mubr.msk.bf16.gmra.mxu0 %vm644_vm2, %v3069_v25  ;;  %v2658_v25 = vmul.f32 %v10103_v46, %v2508_v19  ;;  %v3750_v19 = vpack.c.bf16 %v2978_v58, %v2977_v4  ;;  %v2661_v50 = vmul.f32 %v10103_v46, %v2511_v30  ;;  %v2953_v27 = vmax.f32 %v2809_v44, 0.0  ;;  %v12228_v4 = vld [vmem:[#allocation50_spill] sm:$0xff] }
 0x2bd   :  { %8007 = vmatprep.mubr.msk.bf16.mxu0 %vm8824_vm0, %v12148_v10  ;;  %v2688_v53 = vmul.f32 %v10103_v46, %v2538_v24  ;;  %v2979_v9 = vmax.f32 %v2835_v23, 0.0  ;;  %v2980_v57 = vmax.f32 %v2836_v31, 0.0  ;;  %v2378_v58 = vsub.f32 %v12228_v4, %v9777_v11 }
 0x2be   :  { %8048 = vmatmul.mubr.msk.bf16.gmra.mxu1 %vm644_vm2, %v3519_v2  ;;  %v2366_v2 = vsub.f32 %v12224_v14, %v9777_v11  ;;  %v2808_v13 = vadd.f32 %v10114_v8, %v2658_v25  ;;  %v2811_v33 = vadd.f32 %v10114_v8, %v2661_v50  ;;  %v2379_v61 = vsub.f32 %v12229_v1, %v9777_v11  ;;  %v12232_v1 = vld [vmem:[#allocation57_spill] sm:$0xff] }
 0x2bf   :  { %8079 = vmatprep.mubr.msk.bf16.mxu1 %vm8824_vm0, %v12148_v10  ;;  %v2838_v60 = vadd.f32 %v10114_v8, %v2688_v53  ;;  %v3751_v36 = vpack.c.bf16 %v2980_v57, %v2979_v9  ;;  %v2405_v44 = vsub.f32 %v9835_v28, %v9777_v11 }
 0x2c0   :  { %v2510_v42 = vmul.f32 %v10086_v22, %v2366_v2  ;;  %v2952_v63 = vmax.f32 %v2808_v13, 0.0  ;;  %v2955_v41 = vmax.f32 %v2811_v33, 0.0  ;;  %v2523_v24 = vmul.f32 %v10086_v22, %v2379_v61 }
 0x2c1   :  { %v2982_v13 = vmax.f32 %v2838_v60, 0.0  ;;  %v2382_v61 = vsub.f32 %v12232_v1, %v9777_v11 }
 0x2c2   :  { %v3400_v47 = vpack.c.bf16 %v2953_v27, %v2952_v63 }
 0x2c4   :  { %8008 = vmatmul.mubr.msk.bf16.vlgmr.msra.gmra.mxu0 %vm644_vm2, %v3398_v49  ;;  %v12226_v49 = vld [vmem:[#allocation37_spill] sm:$0xff] }
 0x2c5   :  { %8011 = vmatprep.mubr.msk.bf16.mxu0 %vm8824_vm0, %v12148_v10  ;;  %8052 = vmatpush3.bf16.msra.mxu0 %v8705_v55  ;;  %v2660_v55 = vmul.f32 %v10103_v46, %v2510_v42  ;;  %v2368_v17 = vsub.f32 %v12226_v49, %v9777_v11  ;;  %v12230_v49 = vld [vmem:[#allocation49_spill] sm:$0xff] }
 0x2c6   :  { %8080 = vmatmul.mubr.msk.bf16.vlgmr.msra.gmra.mxu1 %vm644_vm2, %v3749_v52  ;;  %8053 = vmatprep.subr.bf16.mxu0 %v12148_v10  ;;  %v12227_v52 = vld [vmem:[#allocation71_spill] sm:$0xff] }
 0x2c7   :  { %8083 = vmatprep.mubr.msk.bf16.mxu1 %vm8824_vm0, %v12148_v10  ;;  %8124 = vmatpush3.bf16.msra.mxu1 %v8706_v32  ;;  %v2687_v32 = vmul.f32 %v10103_v46, %v2537_v29  ;;  %v2512_v25 = vmul.f32 %v10086_v22, %v2368_v17  ;;  %v2810_v26 = vadd.f32 %v10114_v8, %v2660_v55 }
 0x2c8   :  { %8125 = vmatprep.subr.bf16.mxu1 %v12148_v10  ;;  %v2522_v29 = vmul.f32 %v10086_v22, %v2378_v58  ;;  %v2380_v17 = vsub.f32 %v12230_v49, %v9777_v11 }
 0x2c9   :  { %8054 = vmatpush3.bf16.msra.mxu0 %v8707_v59  ;;  %v2395_v59 = vsub.f32 %v12227_v52, %v9777_v11  ;;  %v2837_v2 = vadd.f32 %v10114_v8, %v2687_v32  ;;  %v2954_v16 = vmax.f32 %v2810_v26, 0.0  ;;  %v12231_v32 = vld [vmem:[#allocation53_spill] sm:$0xff] }
 0x2ca   :  { %8099 = vmatprep.subr.bf16.mxu0 %v12148_v10  ;;  %v2672_v28 = vmul.f32 %v10103_v46, %v2522_v29  ;;  %v2381_v53 = vsub.f32 %v12231_v32, %v9777_v11  ;;  %v2524_v26 = vmul.f32 %v10086_v22, %v2380_v17  ;;  %v8711_v17 = vld [vmem:[%s12055_s0 + $0x70] sm:$0xff]   ;;  %v10716_v32 = vld [vmem:[%s12161_s3] ss:$0 sm:$0xff] }
 0x2cb   :  { %8126 = vmatpush3.bf16.msra.mxu1 %v8708_v3  ;;  %v2539_v14 = vmul.f32 %v10086_v22, %v2395_v59  ;;  %v2662_v3 = vmul.f32 %v10103_v46, %v2512_v25  ;;  %v2981_v30 = vmax.f32 %v2837_v2, 0.0  ;;  %v3401_v31 = vpack.c.bf16 %v2955_v41, %v2954_v16 }
 0x2cc   :  { %8012 = vmatmul.mubr.msk.bf16.gmra.mxu0 %vm644_vm2, %v3399_v35  ;;  %8171 = vmatprep.subr.bf16.mxu1 %v12148_v10  ;;  %v2406_v35 = vsub.f32 %v9851_v7, %v9777_v11  ;;  %v2673_v7 = vmul.f32 %v10103_v46, %v2523_v24  ;;  %v2407_v59 = vsub.f32 %v9824_v18, %v9777_v11 }
 0x2cd   :  { %8015 = vmatprep.mubr.msk.bf16.mxu0 %vm8824_vm0, %v12148_v10  ;;  %v2689_v42 = vmul.f32 %v10103_v46, %v2539_v14  ;;  %v2812_v23 = vadd.f32 %v10114_v8, %v2662_v3  ;;  %v3752_v63 = vpack.c.bf16 %v2982_v13, %v2981_v30  ;;  %v2408_v25 = vsub.f32 %v9843_v51, %v9777_v11 }
 0x2ce   :  { %8084 = vmatmul.mubr.msk.bf16.gmra.mxu1 %vm644_vm2, %v3750_v19  ;;  %v2549_v19 = vmul.f32 %v10086_v22, %v2405_v44  ;;  %v2550_v55 = vmul.f32 %v10086_v22, %v2406_v35  ;;  %v2525_v33 = vmul.f32 %v10086_v22, %v2381_v53  ;;  %v2823_v14 = vadd.f32 %v10114_v8, %v2673_v7 }
 0x2cf   :  { %8087 = vmatprep.mubr.msk.bf16.mxu1 %vm8824_vm0, %v12148_v10  ;;  %v2839_v50 = vadd.f32 %v10114_v8, %v2689_v42  ;;  %v2956_v27 = vmax.f32 %v2812_v23, 0.0  ;;  %v2551_v60 = vmul.f32 %v10086_v22, %v2407_v59  ;;  %v2674_v51 = vmul.f32 %v10103_v46, %v2524_v26  ;;  %v12233_v42 = vld [vmem:[#allocation51_spill] sm:$0xff] }
 0x2d0   :  { %v2699_v9 = vmul.f32 %v10103_v46, %v2549_v19  ;;  %v2700_v57 = vmul.f32 %v10103_v46, %v2550_v55  ;;  %v2675_v41 = vmul.f32 %v10103_v46, %v2525_v33  ;;  %v2967_v58 = vmax.f32 %v2823_v14, 0.0  ;;  %v8709_v19 = vld [vmem:[%s12055_s0 + $0x78] sm:$0xff]   ;;  %v8712_v33 = vld [vmem:[%s12055_s0 + $0xa0] sm:$0xff]  }
 0x2d1   :  { %v2983_v52 = vmax.f32 %v2839_v50, 0.0  ;;  %v3402_v2 = vpack.c.bf16 %v2956_v27, %v2956_v27  ;;  %v2383_v30 = vsub.f32 %v12233_v42, %v9777_v11  ;;  %v2701_v13 = vmul.f32 %v10103_v46, %v2551_v60 }
 0x2d2   :  { %v2849_v3 = vadd.f32 %v10114_v8, %v2699_v9  ;;  %v2850_v18 = vadd.f32 %v10114_v8, %v2700_v57  ;;  %v2409_v24 = vsub.f32 %v9867_v43, %v9777_v11  ;;  %v2410_v23 = vsub.f32 %v9883_v54, %v9777_v11  ;;  %v8710_v43 = vld [vmem:[%s12055_s0 + $0xa8] sm:$0xff]  }
 0x2d3   :  { %v3753_v16 = vpack.c.bf16 %v2983_v52, %v2983_v52  ;;  %v2527_v55 = vmul.f32 %v10086_v22, %v2383_v30  ;;  %v2824_v50 = vadd.f32 %v10114_v8, %v2674_v51  ;;  %v2851_v7 = vadd.f32 %v10114_v8, %v2701_v13  ;;  %v12234_v52 = vld [vmem:[#allocation55_spill] sm:$0xff]  ;;  %v10743_v51 = vld [vmem:[%s11977_s4] ss:$0 sm:$0xff] }
 0x2d4   :  { %8016 = vmatmul.mubr.msk.bf16.gmra.mxu0 %vm644_vm2, %v3400_v47  ;;  %v2822_v47 = vadd.f32 %v10114_v8, %v2672_v28  ;;  %v2993_v35 = vmax.f32 %v2849_v3, 0.0  ;;  %v2994_v29 = vmax.f32 %v2850_v18, 0.0  ;;  %v2553_v28 = vmul.f32 %v10086_v22, %v2409_v24 }
 0x2d5   :  { %8019 = vmatprep.mubr.msk.bf16.mxu0 %vm8824_vm0, %v12148_v10  ;;  %v2554_v54 = vmul.f32 %v10086_v22, %v2410_v23  ;;  %v2968_v9 = vmax.f32 %v2824_v50, 0.0  ;;  %v2384_v59 = vsub.f32 %v12234_v52, %v9777_v11  ;;  %v2412_v3 = vsub.f32 %v9875_v37, %v9777_v11 }
 0x2d6   :  { %8088 = vmatmul.mubr.msk.bf16.gmra.mxu1 %vm644_vm2, %v3751_v36  ;;  %v2552_v36 = vmul.f32 %v10086_v22, %v2408_v25  ;;  %v2966_v4 = vmax.f32 %v2822_v47, 0.0  ;;  %v3983_v49 = vpack.c.bf16 %v2994_v29, %v2993_v35  ;;  %v12235_v25 = vld [vmem:[#allocation61_spill] sm:$0xff]  ;;  %v2703_v47 = vmul.f32 %v10716_v32, %v2553_v28 }
 0x2d7   :  { %8091 = vmatprep.mubr.msk.bf16.mxu1 %vm8824_vm0, %v12148_v10  ;;  %v2385_v26 = vsub.f32 %v12235_v25, %v9777_v11  ;;  %v2704_v14 = vmul.f32 %v10716_v32, %v2554_v54  ;;  %v2528_v18 = vmul.f32 %v10086_v22, %v2384_v59  ;;  %v2556_v37 = vmul.f32 %v10086_v22, %v2412_v3  ;;  %v12236_v29 = vld [vmem:[#allocation65_spill] sm:$0xff] }
 0x2d8   :  { %v2702_v44 = vmul.f32 %v10103_v46, %v2552_v36  ;;  %v2825_v46 = vadd.f32 %v10114_v8, %v2675_v41  ;;  %v2411_v36 = vsub.f32 %v9859_v15, %v9777_v11  ;;  %v2853_v1 = vadd.f32 %v10743_v51, %v2703_v47 }
 0x2d9   :  { %v2678_v30 = vmul.f32 %v10716_v32, %v2528_v18  ;;  %v2386_v24 = vsub.f32 %v12236_v29, %v9777_v11  ;;  %v2413_v50 = vsub.f32 %v9899_v39, %v9777_v11  ;;  %v2424_v47 = vsub.f32 %v9971_v20, %v9777_v11 }
 0x2da   :  { %v2852_v27 = vadd.f32 %v10114_v8, %v2702_v44  ;;  %v2677_v8 = vmul.f32 %v10716_v32, %v2527_v55  ;;  %v2969_v57 = vmax.f32 %v2825_v46, 0.0  ;;  %v2555_v15 = vmul.f32 %v10086_v22, %v2411_v36 }
 0x2db   :  { %v2530_v46 = vmul.f32 %v10086_v22, %v2386_v24  ;;  %v2557_v54 = vmul.f32 %v10086_v22, %v2413_v50  ;;  %v2568_v18 = vmul.f32 %v10086_v22, %v2424_v47 }
 0x2dc   :  { %8020 = vmatmul.mubr.msk.bf16.gmra.mxu0 %vm644_vm2, %v3401_v31  ;;  %v2526_v31 = vmul.f32 %v10086_v22, %v2382_v61  ;;  %v2996_v60 = vmax.f32 %v2852_v27, 0.0  ;;  %v2854_v61 = vadd.f32 %v10743_v51, %v2704_v14  ;;  %v2705_v23 = vmul.f32 %v10716_v32, %v2555_v15 }
 0x2dd   :  { %8023 = vmatprep.mubr.msk.bf16.mxu0 %vm8824_vm0, %v12148_v10  ;;  %v2680_v39 = vmul.f32 %v10716_v32, %v2530_v46  ;;  %v2707_v59 = vmul.f32 %v10716_v32, %v2557_v54  ;;  %v12241_v54 = vld [vmem:[#allocation75_spill] sm:$0xff] }
 0x2de   :  { %8092 = vmatmul.mubr.msk.bf16.gmra.mxu1 %vm644_vm2, %v3752_v63  ;;  %v3632_v63 = vpack.c.bf16 %v2967_v58, %v2966_v4  ;;  %v2676_v53 = vmul.f32 %v10716_v32, %v2526_v31  ;;  %v2827_v4 = vadd.f32 %v10743_v51, %v2677_v8  ;;  %v3633_v58 = vpack.c.bf16 %v2969_v57, %v2968_v9  ;;  %v12237_v8 = vld [vmem:[#allocation72_spill] sm:$0xff]  ;;  %v12238_v57 = vld [vmem:[#allocation74_spill] sm:$0xff] }
 0x2df   :  { %8095 = vmatprep.mubr.msk.bf16.mxu1 %vm8824_vm0, %v12148_v10  ;;  %v2706_v31 = vmul.f32 %v10716_v32, %v2556_v37  ;;  %v2998_v55 = vmax.f32 %v2854_v61, 0.0  ;;  %v2396_v9 = vsub.f32 %v12237_v8, %v9777_v11  ;;  %v2397_v52 = vsub.f32 %v12238_v57, %v9777_v11  ;;  %v12240_v37 = vld [vmem:[#allocation73_spill] sm:$0xff] }
 0x2e0   :  { %v2826_v41 = vadd.f32 %v10743_v51, %v2676_v53  ;;  %v2971_v35 = vmax.f32 %v2827_v4, 0.0 }
 0x2e1   :  { %v2856_v27 = vadd.f32 %v10743_v51, %v2706_v31  ;;  %v2540_v14 = vmul.f32 %v10086_v22, %v2396_v9  ;;  %v12243_v9 = vld [vmem:[#allocation54_spill] sm:$0xff] }
 0x2e2   :  { %v2970_v44 = vmax.f32 %v2826_v41, 0.0  ;;  %v2427_v57 = vsub.f32 %v12243_v9, %v9777_v11 }
 0x2e4   :  { %8024 = vmatmul.mubr.msk.bf16.gmra.mxu0 %vm644_vm2, %v3402_v2  ;;  %v2995_v2 = vmax.f32 %v2851_v7, 0.0  ;;  %v2855_v7 = vadd.f32 %v10743_v51, %v2705_v23 }
 0x2e5   :  { %8055 = vmatprep.mubr.msk.bf16.mxu0 %vm8824_vm0, %v12148_v10 }
 0x2e6   :  { %8096 = vmatmul.mubr.msk.bf16.gmra.mxu1 %vm644_vm2, %v3753_v16  ;;  %v2529_v16 = vmul.f32 %v10086_v22, %v2385_v26  ;;  %v3984_v42 = vpack.c.bf16 %v2996_v60, %v2995_v2  ;;  %v2999_v25 = vmax.f32 %v2855_v7, 0.0  ;;  %v3000_v26 = vmax.f32 %v2856_v27, 0.0  ;;  %v12242_v27 = vld [vmem:[#allocation78_spill] sm:$0xff] }
 0x2e7   :  { %8127 = vmatprep.mubr.msk.bf16.mxu1 %vm8824_vm0, %v12148_v10  ;;  %v2541_v2 = vmul.f32 %v10086_v22, %v2397_v52  ;;  %v2830_v60 = vadd.f32 %v10743_v51, %v2680_v39  ;;  %v2400_v7 = vsub.f32 %v12241_v54, %v9777_v11  ;;  %v12244_v52 = vld [vmem:[#allocation56_spill] sm:$0xff] }
 0x2e8   :  { %v2679_v13 = vmul.f32 %v10716_v32, %v2529_v16  ;;  %v2857_v16 = vadd.f32 %v10743_v51, %v2707_v59  ;;  %v3986_v41 = vpack.c.bf16 %v3000_v26, %v2999_v25  ;;  %v2428_v59 = vsub.f32 %v12244_v52, %v9777_v11  ;;  %v8713_v26 = vld [vmem:[%s12055_s0 + $0x98] sm:$0xff]  }
 0x2e9   :  { %v2691_v20 = vmul.f32 %v10716_v32, %v2541_v2  ;;  %v2974_v4 = vmax.f32 %v2830_v60, 0.0  ;;  %v2544_v25 = vmul.f32 %v10086_v22, %v2400_v7  ;;  %v2571_v60 = vmul.f32 %v10086_v22, %v2427_v57 }
 0x2ea   :  { %v2829_v28 = vadd.f32 %v10743_v51, %v2679_v13  ;;  %v2425_v13 = vsub.f32 %v9995_v45, %v9777_v11 }
 0x2eb   :  { %v2841_v23 = vadd.f32 %v10743_v51, %v2691_v20  ;;  %v3636_v31 = vpack.c.bf16 %v2974_v4, %v2974_v4  ;;  %v2694_v20 = vmul.f32 %v10716_v32, %v2544_v25  ;;  %v12250_v25 = vld [vmem:[#allocation58_spill] sm:$0xff] }
 0x2ec   :  { %8056 = vmatmul.mubr.msk.bf16.vlgmr.msra.gmra.mxu0 %vm644_vm2, %v3632_v63  ;;  %v2828_v63 = vadd.f32 %v10743_v51, %v2678_v30  ;;  %v2973_v53 = vmax.f32 %v2829_v28, 0.0  ;;  %v3001_v30 = vmax.f32 %v2857_v16, 0.0 }
 0x2ed   :  { %8059 = vmatprep.mubr.msk.bf16.mxu0 %vm8824_vm0, %v12148_v10  ;;  %8100 = vmatpush3.bf16.msra.mxu0 %v8709_v19  ;;  %v2997_v19 = vmax.f32 %v2853_v1, 0.0  ;;  %v2399_v1 = vsub.f32 %v12240_v37, %v9777_v11  ;;  %v12245_v37 = vld [vmem:[#allocation80_spill] sm:$0xff] }
 0x2ee   :  { %8128 = vmatmul.mubr.msk.bf16.vlgmr.msra.gmra.mxu1 %vm644_vm2, %v3983_v49  ;;  %8101 = vmatprep.subr.bf16.mxu0 %v12148_v10  ;;  %v3987_v46 = vpack.c.bf16 %v3001_v30, %v3001_v30  ;;  %v8716_v30 = vld [vmem:[%s12055_s0 + $0xc0] sm:$0xff]  }
 0x2ef   :  { %8131 = vmatprep.mubr.msk.bf16.mxu1 %vm8824_vm0, %v12148_v10  ;;  %8172 = vmatpush3.bf16.msra.mxu1 %v8710_v43  ;;  %v3634_v43 = vpack.c.bf16 %v2971_v35, %v2970_v44  ;;  %v3985_v49 = vpack.c.bf16 %v2998_v55, %v2997_v19  ;;  %v2426_v44 = vsub.f32 %v10007_v40, %v9777_v11 }
 0x2f0   :  { %8173 = vmatprep.subr.bf16.mxu1 %v12148_v10  ;;  %v2543_v29 = vmul.f32 %v10086_v22, %v2399_v1  ;;  %v2569_v19 = vmul.f32 %v10086_v22, %v2425_v13  ;;  %v2402_v1 = vsub.f32 %v12245_v37, %v9777_v11  ;;  %v2721_v13 = vmul.f32 %v10716_v32, %v2571_v60 }
 0x2f1   :  { %8102 = vmatpush3.bf16.msra.mxu0 %v8711_v17  ;;  %v2972_v17 = vmax.f32 %v2828_v63, 0.0  ;;  %v2570_v55 = vmul.f32 %v10086_v22, %v2426_v44 }
 0x2f2   :  { %8147 = vmatprep.subr.bf16.mxu0 %v12148_v10  ;;  %v2693_v63 = vmul.f32 %v10716_v32, %v2543_v29  ;;  %v2719_v39 = vmul.f32 %v10716_v32, %v2569_v19 }
 0x2f3   :  { %8174 = vmatpush3.bf16.msra.mxu1 %v8712_v33  ;;  %v2423_v33 = vsub.f32 %v9955_v48, %v9777_v11  ;;  %v3635_v36 = vpack.c.bf16 %v2973_v53, %v2972_v17  ;;  %v2690_v48 = vmul.f32 %v10716_v32, %v2540_v14  ;;  %v2720_v17 = vmul.f32 %v10716_v32, %v2570_v55 }
 0x2f4   :  { %8060 = vmatmul.mubr.msk.bf16.gmra.mxu0 %vm644_vm2, %v3633_v58  ;;  %8219 = vmatprep.subr.bf16.mxu1 %v12148_v10  ;;  %v12239_v58 = vld [vmem:[#allocation76_spill] sm:$0xff]  ;;  %v2843_v14 = vadd.f32 %v10743_v51, %v2693_v63  ;;  %v2546_v55 = vmul.f32 %v10086_v22, %v2402_v1 }
 0x2f5   :  { %8063 = vmatprep.mubr.msk.bf16.mxu0 %vm8824_vm0, %v12148_v10  ;;  %v2567_v3 = vmul.f32 %v10086_v22, %v2423_v33  ;;  %v2398_v15 = vsub.f32 %v12239_v58, %v9777_v11  ;;  %v2840_v24 = vadd.f32 %v10743_v51, %v2690_v48  ;;  %v2870_v16 = vadd.f32 %v10743_v51, %v2720_v17  ;;  %v8715_v48 = vld [vmem:[%s12055_s0 + $0x90] sm:$0xff]  }
 0x2f6   :  { %8132 = vmatmul.mubr.msk.bf16.gmra.mxu1 %vm644_vm2, %v3984_v42  ;;  %v2718_v42 = vmul.f32 %v10716_v32, %v2568_v18  ;;  %v2869_v18 = vadd.f32 %v10743_v51, %v2719_v39 }
 0x2f7   :  { %8135 = vmatprep.mubr.msk.bf16.mxu1 %vm8824_vm0, %v12148_v10  ;;  %v2717_v61 = vmul.f32 %v10716_v32, %v2567_v3  ;;  %v2542_v35 = vmul.f32 %v10086_v22, %v2398_v15  ;;  %v2984_v28 = vmax.f32 %v2840_v24, 0.0  ;;  %v2572_v3 = vmul.f32 %v10086_v22, %v2428_v59  ;;  %v12247_v24 = vld [vmem:[#allocation60_spill] sm:$0xff] }
 0x2f8   :  { %v2868_v45 = vadd.f32 %v10743_v51, %v2718_v42  ;;  %v2987_v15 = vmax.f32 %v2843_v14, 0.0  ;;  %v3014_v29 = vmax.f32 %v2870_v16, 0.0 }
 0x2f9   :  { %v2867_v50 = vadd.f32 %v10743_v51, %v2717_v61  ;;  %v2692_v40 = vmul.f32 %v10716_v32, %v2542_v35  ;;  %v12246_v61 = vld [vmem:[#allocation77_spill] sm:$0xff]  ;;  %v2722_v44 = vmul.f32 %v10716_v32, %v2572_v3  ;;  %v3013_v35 = vmax.f32 %v2869_v18, 0.0 }
 0x2fa   :  { %v3012_v8 = vmax.f32 %v2868_v45, 0.0  ;;  %v2403_v42 = vsub.f32 %v12246_v61, %v9777_v11  ;;  %v2844_v45 = vadd.f32 %v10743_v51, %v2694_v20  ;;  %v12251_v20 = vld [vmem:[#allocation83_spill] sm:$0xff] }
 0x2fb   :  { %v3011_v53 = vmax.f32 %v2867_v50, 0.0  ;;  %v2842_v47 = vadd.f32 %v10743_v51, %v2692_v40  ;;  %v2872_v54 = vadd.f32 %v10743_v51, %v2722_v44  ;;  %v4218_v7 = vpack.c.bf16 %v3014_v29, %v3013_v35 }
 0x2fc   :  { %8064 = vmatmul.mubr.msk.bf16.gmra.mxu0 %vm644_vm2, %v3634_v43  ;;  %v2985_v43 = vmax.f32 %v2841_v23, 0.0  ;;  %v2429_v23 = vsub.f32 %v12247_v24, %v9777_v11  ;;  %v2547_v50 = vmul.f32 %v10086_v22, %v2403_v42  ;;  %v2988_v39 = vmax.f32 %v2844_v45, 0.0  ;;  %v12253_v42 = vld [vmem:[#allocation96_spill] sm:$0xff] }
 0x2fd   :  { %8067 = vmatprep.mubr.msk.bf16.mxu0 %vm8824_vm0, %v12148_v10  ;;  %v2986_v58 = vmax.f32 %v2842_v47, 0.0  ;;  %v3016_v59 = vmax.f32 %v2872_v54, 0.0 }
 0x2fe   :  { %8136 = vmatmul.mubr.msk.bf16.gmra.mxu1 %vm644_vm2, %v3985_v49  ;;  %v2401_v49 = vsub.f32 %v12242_v27, %v9777_v11  ;;  %v3866_v2 = vpack.c.bf16 %v2985_v43, %v2984_v28  ;;  %v2573_v63 = vmul.f32 %v10086_v22, %v2429_v23  ;;  %v2871_v43 = vadd.f32 %v10743_v51, %v2721_v13  ;;  %v12254_v13 = vld [vmem:[#allocation98_spill] sm:$0xff] }
 0x2ff   :  { %8139 = vmatprep.mubr.msk.bf16.mxu1 %vm8824_vm0, %v12148_v10  ;;  %v3867_v40 = vpack.c.bf16 %v2987_v15, %v2986_v58  ;;  %v2696_v27 = vmul.f32 %v10716_v32, %v2546_v55  ;;  %v12252_v58 = vld [vmem:[#allocation81_spill] sm:$0xff]  ;;  %v2442_v44 = vsub.f32 %v12254_v13, %v9777_v11 }
 0x300   :  { %v2545_v33 = vmul.f32 %v10086_v22, %v2401_v49  ;;  %v2697_v49 = vmul.f32 %v10716_v32, %v2547_v50  ;;  %v2723_v9 = vmul.f32 %v10716_v32, %v2573_v63  ;;  %v3015_v52 = vmax.f32 %v2871_v43, 0.0  ;;  %v12255_v63 = vld [vmem:[#allocation82_spill] sm:$0xff]  ;;  %v12256_v43 = vld [vmem:[#allocation85_spill] sm:$0xff] }
 0x301   :  { %v2846_v47 = vadd.f32 %v10743_v51, %v2696_v27  ;;  %v2415_v15 = vsub.f32 %v12252_v58, %v9777_v11  ;;  %v2417_v54 = vsub.f32 %v12256_v43, %v9777_v11  ;;  %v12259_v58 = vld [vmem:[#allocation87_spill] sm:$0xff] }
 0x302   :  { %v2695_v4 = vmul.f32 %v10716_v32, %v2545_v33  ;;  %v2847_v14 = vadd.f32 %v10743_v51, %v2697_v49  ;;  %v4219_v18 = vpack.c.bf16 %v3016_v59, %v3015_v52 }
 0x303   :  { %v2559_v29 = vmul.f32 %v10086_v22, %v2415_v15  ;;  %v2561_v52 = vmul.f32 %v10086_v22, %v2417_v54  ;;  %v2418_v15 = vsub.f32 %v12259_v58, %v9777_v11  ;;  %v8718_v54 = vld [vmem:[%s12055_s0 + $0xe8] sm:$0xff]  }
 0x304   :  { %8068 = vmatmul.mubr.msk.bf16.gmra.mxu0 %vm644_vm2, %v3635_v36  ;;  %v8714_v36 = vld [vmem:[%s12055_s0 + $0xc8] sm:$0xff]  }
 0x305   :  { %8071 = vmatprep.mubr.msk.bf16.mxu0 %vm8824_vm0, %v12148_v10 }
 0x306   :  { %8140 = vmatmul.mubr.msk.bf16.gmra.mxu1 %vm644_vm2, %v3986_v41  ;;  %v4217_v41 = vpack.c.bf16 %v3012_v8, %v3011_v53  ;;  %v12249_v53 = vld [vmem:[#allocation79_spill] sm:$0xff] }
 0x307   :  { %8143 = vmatprep.mubr.msk.bf16.mxu1 %vm8824_vm0, %v12148_v10  ;;  %v2404_v8 = vsub.f32 %v12249_v53, %v9777_v11 }
 0x309   :  { %v2548_v33 = vmul.f32 %v10086_v22, %v2404_v8  ;;  %v12258_v8 = vld [vmem:[#allocation97_spill] sm:$0xff] }
 0x30b   :  { %v2698_v16 = vmul.f32 %v10716_v32, %v2548_v33 }
 0x30c   :  { %8072 = vmatmul.mubr.msk.bf16.gmra.mxu0 %vm644_vm2, %v3636_v31  ;;  %v12248_v31 = vld [vmem:[#allocation64_spill] sm:$0xff] }
 0x30d   :  { %8103 = vmatprep.mubr.msk.bf16.mxu0 %vm8824_vm0, %v12148_v10  ;;  %v2430_v19 = vsub.f32 %v12248_v31, %v9777_v11  ;;  %v2848_v24 = vadd.f32 %v10743_v51, %v2698_v16  ;;  %v2711_v16 = vmul.f32 %v10716_v32, %v2561_v52 }
 0x30e   :  { %8144 = vmatmul.mubr.msk.bf16.gmra.mxu1 %vm644_vm2, %v3987_v46  ;;  %v2845_v46 = vadd.f32 %v10743_v51, %v2695_v4  ;;  %v2414_v4 = vsub.f32 %v12251_v20, %v9777_v11 }
 0x30f   :  { %8175 = vmatprep.mubr.msk.bf16.mxu1 %vm8824_vm0, %v12148_v10  ;;  %v2574_v28 = vmul.f32 %v10086_v22, %v2430_v19  ;;  %v2586_v19 = vmul.f32 %v10086_v22, %v2442_v44 }
 0x310   :  { %v2989_v17 = vmax.f32 %v2845_v46, 0.0  ;;  %v2558_v35 = vmul.f32 %v10086_v22, %v2414_v4  ;;  %v2709_v46 = vmul.f32 %v10716_v32, %v2559_v29  ;;  %v2562_v29 = vmul.f32 %v10086_v22, %v2418_v15 }
 0x311   :  { %v2724_v57 = vmul.f32 %v10716_v32, %v2574_v28  ;;  %v2416_v28 = vsub.f32 %v12255_v63, %v9777_v11  ;;  %v2736_v27 = vmul.f32 %v10716_v32, %v2586_v19 }
 0x312   :  { %v2708_v45 = vmul.f32 %v10716_v32, %v2558_v35 }
 0x313   :  { %v2874_v3 = vadd.f32 %v10743_v51, %v2724_v57  ;;  %v2560_v57 = vmul.f32 %v10086_v22, %v2416_v28 }
 0x314   :  { %8104 = vmatmul.mubr.msk.bf16.vlgmr.msra.gmra.mxu0 %vm644_vm2, %v3866_v2  ;;  %v3868_v2 = vpack.c.bf16 %v2989_v17, %v2988_v39  ;;  %v10945_v39 = vpop.f32.mrf.mxu1  ;;  %v12257_v17 = vld [vmem:[#allocation95_spill] sm:$0xff]  ;;  %v2858_v59 = vadd.f32 %v10743_v51, %v2708_v45 }
 0x315   :  { %8107 = vmatprep.mubr.msk.bf16.mxu0 %vm8824_vm0, %v12148_v10  ;;  %8148 = vmatpush3.bf16.msra.mxu0 %v8713_v26  ;;  %v2431_v26 = vsub.f32 %v12250_v25, %v9777_v11  ;;  %v3018_v61 = vmax.f32 %v2874_v3, 0.0  ;;  %v2443_v53 = vsub.f32 %v12257_v17, %v9777_v11  ;;  %v2859_v25 = vadd.f32 %v10743_v51, %v2709_v46 }
 0x316   :  { %8176 = vmatmul.mubr.msk.bf16.vlgmr.msra.gmra.mxu1 %vm644_vm2, %v4217_v41  ;;  %8149 = vmatprep.subr.bf16.mxu0 %v12148_v10  ;;  %v2990_v41 = vmax.f32 %v2846_v47, 0.0  ;;  %v2861_v46 = vadd.f32 %v10743_v51, %v2711_v16 }
 0x317   :  { %8179 = vmatprep.mubr.msk.bf16.mxu1 %vm8824_vm0, %v12148_v10  ;;  %8220 = vmatpush3.bf16.msra.mxu1 %v8714_v36  ;;  %v2575_v60 = vmul.f32 %v10086_v22, %v2431_v26  ;;  %v2873_v36 = vadd.f32 %v10743_v51, %v2723_v9  ;;  %v2444_v9 = vsub.f32 %v12258_v8, %v9777_v11 }
 0x318   :  { %8221 = vmatprep.subr.bf16.mxu1 %v12148_v10  ;;  %v2587_v33 = vmul.f32 %v10086_v22, %v2443_v53 }
 0x319   :  { %8150 = vmatpush3.bf16.msra.mxu0 %v8715_v48  ;;  %v2991_v48 = vmax.f32 %v2847_v14, 0.0  ;;  %v2725_v37 = vmul.f32 %v10716_v32, %v2575_v60  ;;  %v3017_v1 = vmax.f32 %v2873_v36, 0.0  ;;  %v2588_v47 = vmul.f32 %v10086_v22, %v2444_v9  ;;  %v10959_v36 = vpop.f32.mrf.mxu1  ;;  %v8719_v9 = vld [vmem:[%s12055_s0 + $0xb0] sm:$0xff]  }
 0x31a   :  { %8195 = vmatprep.subr.bf16.mxu0 %v12148_v10 }
 0x31b   :  { %8222 = vmatpush3.bf16.msra.mxu1 %v8716_v30  ;;  %v2441_v30 = vsub.f32 %v12253_v42, %v9777_v11  ;;  %v3869_v23 = vpack.c.bf16 %v2991_v48, %v2990_v41  ;;  %v2875_v55 = vadd.f32 %v10743_v51, %v2725_v37  ;;  %v4220_v50 = vpack.c.bf16 %v3018_v61, %v3017_v1  ;;  %v12260_v37 = vld [vmem:[#allocation84_spill] sm:$0xff] }
 0x31c   :  { %8108 = vmatmul.mubr.msk.bf16.gmra.mxu0 %vm644_vm2, %v3867_v40  ;;  %8267 = vmatprep.subr.bf16.mxu1 %v12148_v10  ;;  %v2992_v40 = vmax.f32 %v2848_v24, 0.0  ;;  %v3002_v41 = vmax.f32 %v2858_v59, 0.0  ;;  %v3003_v48 = vmax.f32 %v2859_v25, 0.0  ;;  %v2419_v1 = vsub.f32 %v12260_v37, %v9777_v11  ;;  %v12261_v24 = vld [vmem:[#allocation100_spill] sm:$0xff]  ;;  %v12265_v37 = vld [vmem:[#allocation99_spill] sm:$0xff] }
 0x31d   :  { %8111 = vmatprep.mubr.msk.bf16.mxu0 %vm8824_vm0, %v12148_v10  ;;  %v2585_v31 = vmul.f32 %v10086_v22, %v2441_v30  ;;  %v3019_v49 = vmax.f32 %v2875_v55, 0.0  ;;  %v2737_v61 = vmul.f32 %v10716_v32, %v2587_v33  ;;  %v2738_v42 = vmul.f32 %v10716_v32, %v2588_v47  ;;  %v8717_v55 = vld [vmem:[%s12055_s0 + $0xb8] sm:$0xff]  }
 0x31e   :  { %8180 = vmatmul.mubr.msk.bf16.gmra.mxu1 %vm644_vm2, %v4218_v7  ;;  %v3870_v26 = vpack.c.bf16 %v2992_v40, %v2992_v40  ;;  %v4100_v40 = vpack.c.bf16 %v3003_v48, %v3002_v41  ;;  %v3005_v25 = vmax.f32 %v2861_v46, 0.0  ;;  %v12263_v47 = vld [vmem:[#allocation86_spill] sm:$0xff] }
 0x31f   :  { %8183 = vmatprep.mubr.msk.bf16.mxu1 %vm8824_vm0, %v12148_v10  ;;  %v2735_v7 = vmul.f32 %v10716_v32, %v2585_v31  ;;  %v4221_v60 = vpack.c.bf16 %v3019_v49, %v3019_v49  ;;  %v12262_v31 = vld [vmem:[#allocation102_spill] sm:$0xff] }
 0x320   :  { %v2446_v19 = vsub.f32 %v12262_v31, %v9777_v11 }
 0x321   :  { %v2885_v14 = vadd.f32 %v10743_v51, %v2735_v7  ;;  %v2887_v7 = vadd.f32 %v10743_v51, %v2737_v61 }
 0x322   :  { %v2590_v17 = vmul.f32 %v10086_v22, %v2446_v19 }
 0x323   :  { %v3029_v30 = vmax.f32 %v2885_v14, 0.0  ;;  %v2420_v14 = vsub.f32 %v12263_v47, %v9777_v11  ;;  %v3031_v41 = vmax.f32 %v2887_v7, 0.0 }
 0x324   :  { %8112 = vmatmul.mubr.msk.bf16.gmra.mxu0 %vm644_vm2, %v3868_v2  ;;  %v2886_v2 = vadd.f32 %v10743_v51, %v2736_v27  ;;  %v2888_v27 = vadd.f32 %v10743_v51, %v2738_v42  ;;  %v12266_v42 = vld [vmem:[#allocation101_spill] sm:$0xff] }
 0x325   :  { %8115 = vmatprep.mubr.msk.bf16.mxu0 %vm8824_vm0, %v12148_v10  ;;  %v2564_v61 = vmul.f32 %v10086_v22, %v2420_v14  ;;  %v12268_v14 = vld [vmem:[#allocation104_spill] sm:$0xff] }
 0x326   :  { %8184 = vmatmul.mubr.msk.bf16.gmra.mxu1 %vm644_vm2, %v4219_v18  ;;  %v2710_v18 = vmul.f32 %v10716_v32, %v2560_v57  ;;  %v3030_v13 = vmax.f32 %v2886_v2, 0.0  ;;  %v2712_v57 = vmul.f32 %v10716_v32, %v2562_v29  ;;  %v12264_v2 = vld [vmem:[#allocation88_spill] sm:$0xff]  ;;  %v3032_v48 = vmax.f32 %v2888_v27, 0.0 }
 0x327   :  { %8187 = vmatprep.mubr.msk.bf16.mxu1 %vm8824_vm0, %v12148_v10 }
 0x328   :  { %v2860_v45 = vadd.f32 %v10743_v51, %v2710_v18  ;;  %v4451_v49 = vpack.c.bf16 %v3030_v13, %v3029_v30  ;;  %v8720_v18 = vld [vmem:[%s12055_s0 + $0xe0] sm:$0xff]   ;;  %v2448_v30 = vsub.f32 %v12266_v42, %v9777_v11 }
 0x32a   :  { %v3004_v59 = vmax.f32 %v2860_v45, 0.0  ;;  %v4452_v45 = vpack.c.bf16 %v3032_v48, %v3031_v41 }
 0x32c   :  { %8116 = vmatmul.mubr.msk.bf16.gmra.mxu0 %vm644_vm2, %v3869_v23  ;;  %v2445_v23 = vsub.f32 %v12261_v24, %v9777_v11  ;;  %v4101_v24 = vpack.c.bf16 %v3005_v25, %v3004_v59 }
 0x32d   :  { %8119 = vmatprep.mubr.msk.bf16.mxu0 %vm8824_vm0, %v12148_v10 }
 0x32e   :  { %8188 = vmatmul.mubr.msk.bf16.gmra.mxu1 %vm644_vm2, %v4220_v50  ;;  %v2563_v50 = vmul.f32 %v10086_v22, %v2419_v1  ;;  %v2589_v43 = vmul.f32 %v10086_v22, %v2445_v23  ;;  %v2447_v1 = vsub.f32 %v12265_v37, %v9777_v11 }
 0x32f   :  { %8191 = vmatprep.mubr.msk.bf16.mxu1 %vm8824_vm0, %v12148_v10 }
 0x330   :  { %v2713_v52 = vmul.f32 %v10716_v32, %v2563_v50  ;;  %v2739_v16 = vmul.f32 %v10716_v32, %v2589_v43  ;;  %v2591_v19 = vmul.f32 %v10086_v22, %v2447_v1  ;;  %v2592_v50 = vmul.f32 %v10086_v22, %v2448_v30 }
 0x331   :  { %v2714_v43 = vmul.f32 %v10716_v32, %v2564_v61 }
 0x332   :  { %v2863_v29 = vadd.f32 %v10743_v51, %v2713_v52  ;;  %v2742_v59 = vmul.f32 %v10716_v32, %v2592_v50  ;;  %v12270_v50 = vld [vmem:[#allocation68_spill] sm:$0xff] }
 0x334   :  { %v10961_v3 = vpop.f32.mrf.mxu0  ;;  %8120 = vmatmul.mubr.msk.bf16.gmra.mxu0 %vm644_vm2, %v3870_v26  ;;  %v3007_v27 = vmax.f32 %v2863_v29, 0.0  ;;  %v2892_v37 = vadd.f32 %v10743_v51, %v2742_v59 }
 0x335   :  { %8151 = vmatprep.mubr.msk.bf16.mxu0 %vm8824_vm0, %v12148_v10  ;;  %v10968_v20 = vpop.f32.mrf.mxu1 }
 0x336   :  { %8192 = vmatmul.mubr.msk.bf16.gmra.mxu1 %vm644_vm2, %v4221_v60  ;;  %v7937_v4 = vpop.f32.mrf.mxu0  ;;  %v2421_v60 = vsub.f32 %v12264_v2, %v9777_v11  ;;  %v2449_v2 = vsub.f32 %v12268_v14, %v9777_v11 }
 0x337   :  { %8223 = vmatprep.mubr.msk.bf16.mxu1 %vm8824_vm0, %v12148_v10  ;;  %v7985_v44 = vpop.f32.mrf.mxu1  ;;  %v2740_v4 = vmul.f32 %v10716_v32, %v2590_v17 }
 0x338   :  { %v10979_v35 = vpop.f32.mrf.mxu0  ;;  %v2565_v13 = vmul.f32 %v10086_v22, %v2421_v60  ;;  %v2862_v44 = vadd.f32 %v10743_v51, %v2712_v57  ;;  %v2741_v57 = vmul.f32 %v10716_v32, %v2591_v19  ;;  %v2593_v61 = vmul.f32 %v10086_v22, %v2449_v2  ;;  %v12269_v19 = vld [vmem:[#allocation62_spill] sm:$0xff] }
 0x339   :  { %v10992_v63 = vpop.f32.mrf.mxu1  ;;  %v2890_v46 = vadd.f32 %v10743_v51, %v2740_v4 }
 0x33a   :  { %v7938_v28 = vpop.f32.mrf.mxu0  ;;  %v3006_v7 = vmax.f32 %v2862_v44, 0.0 }
 0x33b   :  { %v7986_v53 = vpop.f32.mrf.mxu1  ;;  %v3034_v25 = vmax.f32 %v2890_v46, 0.0 }
 0x33c   :  { %v11001_v8 = vpop.f32.mrf.mxu0  ;;  %8152 = vmatmul.mubr.msk.bf16.vlgmr.msra.gmra.mxu0 %vm644_vm2, %v4100_v40  ;;  %v12267_v53 = vld [vmem:[#allocation52_spill] sm:$0xff]  ;;  %v4102_v41 = vpack.c.bf16 %v3007_v27, %v3006_v7 }
 0x33d   :  { %8155 = vmatprep.mubr.msk.bf16.mxu0 %vm8824_vm0, %v12148_v10  ;;  %8196 = vmatpush3.bf16.msra.mxu0 %v8717_v55  ;;  %v11011_v26 = vpop.f32.mrf.mxu1  ;;  %v2889_v55 = vadd.f32 %v10743_v51, %v2739_v16 }
 0x33e   :  { %8224 = vmatmul.mubr.msk.bf16.vlgmr.msra.gmra.mxu1 %vm644_vm2, %v4451_v49  ;;  %v7941_v33 = vpop.f32.mrf.mxu0  ;;  %8197 = vmatprep.subr.bf16.mxu0 %v12148_v10 }
 0x33f   :  { %8227 = vmatprep.mubr.msk.bf16.mxu1 %vm8824_vm0, %v12148_v10  ;;  %8268 = vmatpush3.bf16.msra.mxu1 %v8718_v54  ;;  %v7989_v58 = vpop.f32.mrf.mxu1  ;;  %v2715_v54 = vmul.f32 %v10716_v32, %v2565_v13  ;;  %v3033_v52 = vmax.f32 %v2889_v55, 0.0  ;;  %v2432_v55 = vsub.f32 %v12269_v19, %v9777_v11  ;;  %v12274_v19 = vld [vmem:[#allocation11_spill] sm:$0xff] }
 0x340   :  { %v11026_v15 = vpop.f32.mrf.mxu0  ;;  %8269 = vmatprep.subr.bf16.mxu1 %v12148_v10  ;;  %v2891_v58 = vadd.f32 %v10743_v51, %v2741_v57 }
 0x341   :  { %8198 = vmatpush3.bf16.msra.mxu0 %v8719_v9  ;;  %v11037_v23 = vpop.f32.mrf.mxu1  ;;  %v2422_v9 = vsub.f32 %v12267_v53, %v9777_v11  ;;  %v2865_v16 = vadd.f32 %v10743_v51, %v2715_v54  ;;  %v4453_v1 = vpack.c.bf16 %v3034_v25, %v3033_v52  ;;  %v2576_v27 = vmul.f32 %v10086_v22, %v2432_v55 }
 0x342   :  { %v7942_v31 = vpop.f32.mrf.mxu0  ;;  %8243 = vmatprep.subr.bf16.mxu0 %v12148_v10  ;;  %v3035_v46 = vmax.f32 %v2891_v58, 0.0  ;;  %v2462_v55 = vsub.f32 %v12274_v19, %v9777_v11  ;;  %v8721_v19 = vld [vmem:[%s12055_s0 + $0xd8] sm:$0xff]  }
 0x343   :  { %8270 = vmatpush3.bf16.msra.mxu1 %v8720_v18  ;;  %v7990_v40 = vpop.f32.mrf.mxu1  ;;  %v2566_v60 = vmul.f32 %v10086_v22, %v2422_v9  ;;  %v2864_v18 = vadd.f32 %v10743_v51, %v2714_v43  ;;  %v3009_v29 = vmax.f32 %v2865_v16, 0.0  ;;  %v2743_v43 = vmul.f32 %v10716_v32, %v2593_v61 }
 0x344   :  { %v11044_v28 = vpop.f32.mrf.mxu0  ;;  %8156 = vmatmul.mubr.msk.bf16.gmra.mxu0 %vm644_vm2, %v4101_v24  ;;  %v3036_v40 = vmax.f32 %v2892_v37, 0.0  ;;  %v2726_v2 = vmul.f32 %v10716_v32, %v2576_v27  ;;  %v12272_v37 = vld [vmem:[#allocation66_spill] sm:$0xff] }
 0x345   :  { %8159 = vmatprep.mubr.msk.bf16.mxu0 %vm8824_vm0, %v12148_v10  ;;  %v11051_v49 = vpop.f32.mrf.mxu1  ;;  %v2716_v13 = vmul.f32 %v10716_v32, %v2566_v60  ;;  %v3008_v44 = vmax.f32 %v2864_v18, 0.0  ;;  %v2893_v25 = vadd.f32 %v10743_v51, %v2743_v43 }
 0x346   :  { %8228 = vmatmul.mubr.msk.bf16.gmra.mxu1 %vm644_vm2, %v4452_v45  ;;  %v7945_v17 = vpop.f32.mrf.mxu0  ;;  %v2433_v45 = vsub.f32 %v12270_v50, %v9777_v11  ;;  %v4454_v59 = vpack.c.bf16 %v3036_v40, %v3035_v46 }
 0x347   :  { %8231 = vmatprep.mubr.msk.bf16.mxu1 %vm8824_vm0, %v12148_v10  ;;  %v7993_v33 = vpop.f32.mrf.mxu1  ;;  %v2866_v53 = vadd.f32 %v10743_v51, %v2716_v13  ;;  %v4103_v9 = vpack.c.bf16 %v3009_v29, %v3008_v44  ;;  %v3037_v61 = vmax.f32 %v2893_v25, 0.0  ;;  %v12273_v29 = vld [vmem:[#allocation14_spill] sm:$0xff] }
 0x348   :  { %v11060_v47 = vpop.f32.mrf.mxu0  ;;  %v2577_v17 = vmul.f32 %v10086_v22, %v2433_v45  ;;  %v2876_v45 = vadd.f32 %v10743_v51, %v2726_v2 }
 0x349   :  { %v11067_v48 = vpop.f32.mrf.mxu1  ;;  %v3010_v18 = vmax.f32 %v2866_v53, 0.0  ;;  %v4455_v27 = vpack.c.bf16 %v3037_v61, %v3037_v61  ;;  %v2606_v53 = vmul.f32 %v10086_v22, %v2462_v55 }
 0x34a   :  { %v7946_v4 = vpop.f32.mrf.mxu0  ;;  %v2727_v60 = vmul.f32 %v10716_v32, %v2577_v17  ;;  %v3020_v2 = vmax.f32 %v2876_v45, 0.0 }
 0x34b   :  { %v7994_v42 = vpop.f32.mrf.mxu1  ;;  %v12271_v4 = vld [vmem:[#allocation90_spill] sm:$0xff]  ;;  %v4104_v40 = vpack.c.bf16 %v3010_v18, %v3010_v18 }
 0x34c   :  { %v11072_v30 = vpop.f32.mrf.mxu0  ;;  %8160 = vmatmul.mubr.msk.bf16.gmra.mxu0 %vm644_vm2, %v4102_v41  ;;  %v2434_v58 = vsub.f32 %v12271_v4, %v9777_v11  ;;  %v2877_v46 = vadd.f32 %v10743_v51, %v2727_v60  ;;  %v12275_v4 = vld [vmem:[#allocation89_spill] sm:$0xff] }
 0x34d   :  { %8163 = vmatprep.mubr.msk.bf16.mxu0 %vm8824_vm0, %v12148_v10  ;;  %v11078_v24 = vpop.f32.mrf.mxu1 }
 0x34e   :  { %8232 = vmatmul.mubr.msk.bf16.gmra.mxu1 %vm644_vm2, %v4453_v1  ;;  %v7949_v31 = vpop.f32.mrf.mxu0  ;;  %v2435_v1 = vsub.f32 %v12272_v37, %v9777_v11  ;;  %v2578_v44 = vmul.f32 %v10086_v22, %v2434_v58  ;;  %v3021_v60 = vmax.f32 %v2877_v46, 0.0  ;;  %v2436_v58 = vsub.f32 %v12275_v4, %v9777_v11  ;;  %v12276_v37 = vld [vmem:[#allocation92_spill] sm:$0xff]  ;;  %v12278_v4 = vld [vmem:[#allocation91_spill] sm:$0xff] }
 0x34f   :  { %8235 = vmatprep.mubr.msk.bf16.mxu1 %vm8824_vm0, %v12148_v10  ;;  %v7997_v54 = vpop.f32.mrf.mxu1  ;;  %v2461_v31 = vsub.f32 %v12273_v29, %v9777_v11 }
 0x350   :  { %v11088_v7 = vpop.f32.mrf.mxu0  ;;  %v2579_v50 = vmul.f32 %v10086_v22, %v2435_v1  ;;  %v2728_v25 = vmul.f32 %v10716_v32, %v2578_v44  ;;  %v2437_v1 = vsub.f32 %v12276_v37, %v9777_v11  ;;  %v2580_v29 = vmul.f32 %v10086_v22, %v2436_v58 }
 0x351   :  { %v11093_v57 = vpop.f32.mrf.mxu1  ;;  %v2605_v17 = vmul.f32 %v10086_v22, %v2461_v31  ;;  %v4334_v45 = vpack.c.bf16 %v3021_v60, %v3020_v2  ;;  %v12277_v2 = vld [vmem:[#allocation94_spill] sm:$0xff]  ;;  %v2439_v58 = vsub.f32 %v12278_v4, %v9777_v11 }
 0x352   :  { %v7950_v52 = vpop.f32.mrf.mxu0  ;;  %v2878_v55 = vadd.f32 %v10743_v51, %v2728_v25  ;;  %v2438_v60 = vsub.f32 %v12277_v2, %v9777_v11 }
 0x353   :  { %v7998_v33 = vpop.f32.mrf.mxu1  ;;  %v2755_v61 = vmul.f32 %v10716_v32, %v2605_v17 }
 0x354   :  { %v11096_v14 = vpop.f32.mrf.mxu0  ;;  %8164 = vmatmul.mubr.msk.bf16.gmra.mxu0 %vm644_vm2, %v4103_v9  ;;  %v2729_v33 = vmul.f32 %v10716_v32, %v2579_v50 }
 0x355   :  { %8167 = vmatprep.mubr.msk.bf16.mxu0 %vm8824_vm0, %v12148_v10  ;;  %v11103_v16 = vpop.f32.mrf.mxu1 }
 0x356   :  { %8236 = vmatmul.mubr.msk.bf16.gmra.mxu1 %vm644_vm2, %v4454_v59  ;;  %v7953_v41 = vpop.f32.mrf.mxu0  ;;  %v2879_v50 = vadd.f32 %v10743_v51, %v2729_v33 }
 0x357   :  { %8239 = vmatprep.mubr.msk.bf16.mxu1 %vm8824_vm0, %v12148_v10  ;;  %v8001_v42 = vpop.f32.mrf.mxu1 }
 0x358   :  { %v3179_v13 = vpop.f32.mrf.mxu0  ;;  %v2756_v42 = vmul.f32 %v10716_v32, %v2606_v53  ;;  %v3023_v25 = vmax.f32 %v2879_v50, 0.0 }
 0x359   :  { %v3386_v43 = vpop.f32.mrf.mxu1 }
 0x35a   :  { %v7954_v54 = vpop.f32.mrf.mxu0 }
 0x35b   :  { %v8002_v9 = vpop.f32.mrf.mxu1  ;;  %v2905_v54 = vadd.f32 %v10743_v51, %v2755_v61 }
 0x35c   :  { %v3243_v52 = vpop.f32.mrf.mxu0  ;;  %8168 = vmatmul.mubr.msk.bf16.gmra.mxu0 %vm644_vm2, %v4104_v40  ;;  %v8722_v9 = vld [vmem:[%s12055_s0 + $0xd0] sm:$0xff]  }
 0x35d   :  { %v3244_v59 = vadd.f32 %v3243_v52, %v10961_v3  ;;  %8199 = vmatprep.mubr.msk.bf16.mxu0 %vm8824_vm0, %v12148_v10  ;;  %v3049_v37 = vmax.f32 %v2905_v54, 0.0 }
 0x35e   :  { %v11128_v18 = vpop.f32.mrf.mxu1  ;;  %8240 = vmatmul.mubr.msk.bf16.gmra.mxu1 %vm644_vm2, %v4455_v27  ;;  %v7961_v41 = vpop.f32.mrf.mxu0 }
 0x35f   :  { %8271 = vmatprep.mubr.msk.bf16.mxu1 %vm8824_vm0, %v12148_v10  ;;  %v11136_v3 = vadd.f32 %v10968_v20, %v3244_v59  ;;  %v2581_v20 = vmul.f32 %v10086_v22, %v2437_v1  ;;  %v3022_v59 = vmax.f32 %v2878_v55, 0.0 }
 0x360   :  { %v8033_v13 = vpop.f32.mrf.mxu1  ;;  %v3246_v44 = vpop.f32.mrf.mxu0 }
 0x361   :  { %v3247_v31 = vadd.f32 %v3246_v44, %v10979_v35  ;;  %v2906_v35 = vadd.f32 %v10743_v51, %v2756_v42  ;;  %v2731_v52 = vmul.f32 %v10716_v32, %v2581_v20  ;;  %v12279_v13 = vld [vmem:[#allocation21_spill] sm:$0xff]  ;;  %v4335_v50 = vpack.c.bf16 %v3023_v25, %v3022_v59 }
 0x362   :  { %v11150_v46 = vpop.f32.mrf.mxu1  ;;  %v7962_v40 = vpop.f32.mrf.mxu0  ;;  %v2465_v44 = vsub.f32 %v12279_v13, %v9777_v11 }
 0x363   :  { %v11153_v43 = vadd.f32 %v10992_v63, %v3247_v31  ;;  %v2730_v63 = vmul.f32 %v10716_v32, %v2580_v29  ;;  %v3050_v1 = vmax.f32 %v2906_v35, 0.0  ;;  %v12280_v29 = vld [vmem:[#allocation13_spill] sm:$0xff]  ;;  %v2881_v55 = vadd.f32 %v10743_v51, %v2731_v52 }
 0x364   :  { %v8034_v27 = vpop.f32.mrf.mxu1  ;;  %v3251_v17 = vpop.f32.mrf.mxu0  ;;  %8200 = vmatmul.mubr.msk.bf16.vlgmr.msra.gmra.mxu0 %vm644_vm2, %v4334_v45  ;;  %v2466_v31 = vsub.f32 %v12280_v29, %v9777_v11 }
 0x365   :  { %v3252_v53 = vadd.f32 %v3251_v17, %v11001_v8  ;;  %8203 = vmatprep.mubr.msk.bf16.mxu0 %vm8824_vm0, %v12148_v10  ;;  %8244 = vmatpush3.bf16.msra.mxu0 %v8721_v19  ;;  %v2880_v20 = vadd.f32 %v10743_v51, %v2730_v63  ;;  %v4686_v35 = vpack.c.bf16 %v3050_v1, %v3049_v37  ;;  %v3025_v59 = vmax.f32 %v2881_v55, 0.0 }
 0x366   :  { %v11166_v33 = vpop.f32.mrf.mxu1  ;;  %8272 = vmatmul.mubr.msk.bf16.vlgmr.msra.gmra.mxu1 %vm644_vm2, %v10366_v21  ;;  %v7965_v8 = vpop.f32.mrf.mxu0  ;;  %8245 = vmatprep.subr.bf16.mxu0 %v12148_v10  ;;  %v2582_v21 = vmul.f32 %v10086_v22, %v2438_v60  ;;  %v2609_v27 = vmul.f32 %v10086_v22, %v2465_v44 }
 0x367   :  { %8275 = vmatprep.mubr.msk.bf16.mxu1 %vm8824_vm0, %v12148_v10  ;;  %v11176_v41 = vadd.f32 %v11011_v26, %v3252_v53  ;;  %v2583_v26 = vmul.f32 %v10086_v22, %v2439_v58 }
 0x368   :  { %v8037_v61 = vpop.f32.mrf.mxu1  ;;  %v3254_v42 = vpop.f32.mrf.mxu0  ;;  %v2732_v63 = vmul.f32 %v10716_v32, %v2582_v21  ;;  %v2759_v4 = vmul.f32 %v10716_v32, %v2609_v27 }
 0x369   :  { %v3255_v19 = vadd.f32 %v3254_v42, %v11026_v15  ;;  %8246 = vmatpush3.bf16.msra.mxu0 %v8722_v9  ;;  %v2610_v15 = vmul.f32 %v10086_v22, %v2466_v31  ;;  %v2733_v52 = vmul.f32 %v10716_v32, %v2583_v26  ;;  %v12282_v61 = vld [vmem:[#allocation19_spill] sm:$0xff] }
 0x36a   :  { %v11189_v45 = vpop.f32.mrf.mxu1  ;;  %v7966_v40 = vpop.f32.mrf.mxu0  ;;  %8291 = vmatprep.subr.bf16.mxu0 %v12148_v10  ;;  %v2467_v42 = vsub.f32 %v12282_v61, %v9777_v11  ;;  %v2882_v44 = vadd.f32 %v10743_v51, %v2732_v63  ;;  %v2909_v55 = vadd.f32 %v10743_v51, %v2759_v4 }
 0x36b   :  { %v11193_v54 = vadd.f32 %v11037_v23, %v3255_v19  ;;  %v3024_v23 = vmax.f32 %v2880_v20, 0.0  ;;  %v2760_v58 = vmul.f32 %v10716_v32, %v2610_v15 }
 0x36c   :  { %v8038_v17 = vpop.f32.mrf.mxu1  ;;  %v3259_v53 = vpop.f32.mrf.mxu0  ;;  %8204 = vmatmul.mubr.msk.bf16.gmra.mxu0 %vm644_vm2, %v4335_v50  ;;  %v2611_v20 = vmul.f32 %v10086_v22, %v2467_v42  ;;  %v3026_v15 = vmax.f32 %v2882_v44, 0.0 }
 0x36d   :  { %v3260_v9 = vadd.f32 %v3259_v53, %v11044_v28  ;;  %8207 = vmatprep.mubr.msk.bf16.mxu0 %vm8824_vm0, %v12148_v10  ;;  %v12281_v28 = vld [vmem:[#allocation93_spill] sm:$0xff]  ;;  %v4336_v29 = vpack.c.bf16 %v3025_v59, %v3024_v23  ;;  %v2910_v50 = vadd.f32 %v10743_v51, %v2760_v58  ;;  %v11250_v23 = vld [vmem:[%s12161_s3] ss:$0 sm:$0xff]  ;;  %v3053_v59 = vmax.f32 %v2909_v55, 0.0 }
 0x36e   :  { %v11203_v25 = vpop.f32.mrf.mxu1  ;;  %8276 = vmatmul.mubr.msk.bf16.gmra.mxu1 %vm644_vm2, %v4686_v35  ;;  %v7969_v8 = vpop.f32.mrf.mxu0  ;;  %v2440_v60 = vsub.f32 %v12281_v28, %v9777_v11 }
 0x36f   :  { %8279 = vmatprep.mubr.msk.bf16.mxu1 %vm8824_vm0, %v12148_v10  ;;  %v11209_v2 = vadd.f32 %v11051_v49, %v3260_v9  ;;  %v2883_v49 = vadd.f32 %v10743_v51, %v2733_v52  ;;  %v12283_v9 = vld [vmem:[#allocation103_spill] sm:$0xff]  ;;  %v12284_v52 = vld [vmem:[#allocation105_spill] sm:$0xff]  ;;  %v3054_v8 = vmax.f32 %v2910_v50, 0.0 }
 0x370   :  { %v8041_v37 = vpop.f32.mrf.mxu1  ;;  %v3262_v1 = vpop.f32.mrf.mxu0  ;;  %v2584_v13 = vmul.f32 %v10086_v22, %v2440_v60  ;;  %v2451_v63 = vsub.f32 %v12283_v9, %v9777_v11 }
 0x371   :  { %v3263_v21 = vadd.f32 %v3262_v1, %v11060_v47  ;;  %v4688_v44 = vpack.c.bf16 %v3054_v8, %v3053_v59 }
 0x372   :  { %v11221_v31 = vpop.f32.mrf.mxu1  ;;  %v7970_v19 = vpop.f32.mrf.mxu0  ;;  %v2734_v27 = vmul.f32 %v10716_v32, %v2584_v13  ;;  %v2450_v32 = vsub.f32 %v12284_v52, %v9777_v11  ;;  %v2595_v37 = vmul.f32 %v10086_v22, %v2451_v63 }
 0x373   :  { %v11224_v26 = vadd.f32 %v11067_v48, %v3263_v21  ;;  %v3027_v48 = vmax.f32 %v2883_v49, 0.0 }
 0x374   :  { %v8042_v47 = vpop.f32.mrf.mxu1  ;;  %v3267_v40 = vpop.f32.mrf.mxu0  ;;  %8208 = vmatmul.mubr.msk.bf16.gmra.mxu0 %vm644_vm2, %v4336_v29  ;;  %v2884_v58 = vadd.f32 %v10743_v51, %v2734_v27  ;;  %v2594_v1 = vmul.f32 %v10086_v22, %v2450_v32  ;;  %v11280_v27 = vld [vmem:[%s11977_s4] ss:$0 sm:$0xff] }
 0x375   :  { %v3268_v35 = vadd.f32 %v3267_v40, %v11072_v30  ;;  %8211 = vmatprep.mubr.msk.bf16.mxu0 %vm8824_vm0, %v12148_v10 }
 0x376   :  { %v11234_v17 = vpop.f32.mrf.mxu1  ;;  %8280 = vmatmul.mubr.msk.bf16.gmra.mxu1 %vm644_vm2, %v10377_v5  ;;  %v7973_v53 = vpop.f32.mrf.mxu0  ;;  %v2761_v5 = vmul.f32 %v11250_v23, %v2611_v20  ;;  %v3028_v19 = vmax.f32 %v2884_v58, 0.0  ;;  %v2745_v20 = vmul.f32 %v11250_v23, %v2595_v37  ;;  %v2744_v55 = vmul.f32 %v11250_v23, %v2594_v1 }
 0x377   :  { %8283 = vmatprep.mubr.msk.bf16.mxu1 %vm8824_vm0, %v12148_v10  ;;  %v11243_v30 = vadd.f32 %v11078_v24, %v3268_v35  ;;  %v4337_v24 = vpack.c.bf16 %v3027_v48, %v3026_v15 }
 0x378   :  { %v8045_v28 = vpop.f32.mrf.mxu1  ;;  %v3270_v60 = vpop.f32.mrf.mxu0  ;;  %v2911_v13 = vadd.f32 %v10743_v51, %v2761_v5  ;;  %v4338_v35 = vpack.c.bf16 %v3028_v19, %v3028_v19  ;;  %v2895_v15 = vadd.f32 %v11280_v27, %v2745_v20  ;;  %v2894_v48 = vadd.f32 %v11280_v27, %v2744_v55 }
 0x379   :  { %v3271_v4 = vadd.f32 %v3270_v60, %v11088_v7 }
 0x37a   :  { %v11257_v61 = vpop.f32.mrf.mxu1  ;;  %v7974_v42 = vpop.f32.mrf.mxu0  ;;  %v3039_v5 = vmax.f32 %v2895_v15, 0.0  ;;  %v3038_v59 = vmax.f32 %v2894_v48, 0.0 }
 0x37b   :  { %v11260_v21 = vadd.f32 %v11093_v57, %v3271_v4  ;;  %v12285_v4 = vld [vmem:[#allocation106_spill] sm:$0xff] }
 0x37c   :  { %v8046_v49 = vpop.f32.mrf.mxu1  ;;  %v3275_v29 = vpop.f32.mrf.mxu0  ;;  %8212 = vmatmul.mubr.msk.bf16.gmra.mxu0 %vm644_vm2, %v4337_v24  ;;  %v2455_v58 = vsub.f32 %v12285_v4, %v9777_v11  ;;  %v12286_v24 = vld [vmem:[#allocation107_spill] sm:$0xff] }
 0x37d   :  { %v3276_v7 = vadd.f32 %v3275_v29, %v11096_v14  ;;  %8215 = vmatprep.mubr.msk.bf16.mxu0 %vm8824_vm0, %v12148_v10  ;;  %v3055_v14 = vmax.f32 %v2911_v13, 0.0  ;;  %v2454_v37 = vsub.f32 %v12286_v24, %v9777_v11  ;;  %v8723_v13 = vld [vmem:[%s12055_s0 + $0xf8] sm:$0xff]  }
 0x37e   :  { %v11269_v50 = vpop.f32.mrf.mxu1  ;;  %8284 = vmatmul.mubr.msk.bf16.gmra.mxu1 %vm644_vm2, %v4688_v44  ;;  %v7977_v51 = vpop.f32.mrf.mxu0  ;;  %v4568_v44 = vpack.c.bf16 %v3039_v5, %v3038_v59  ;;  %v2599_v49 = vmul.f32 %v10086_v22, %v2455_v58 }
 0x37f   :  { %8287 = vmatprep.mubr.msk.bf16.mxu1 %vm8824_vm0, %v12148_v10  ;;  %v11275_v57 = vadd.f32 %v11103_v16, %v3276_v7  ;;  %v4689_v63 = vpack.c.bf16 %v3055_v14, %v3055_v14  ;;  %v8724_v51 = vld [vmem:[%s12055_s0 + $0xf0] sm:$0xff]  }
 0x380   :  { %v8049_v47 = vpop.f32.mrf.mxu1  ;;  %v3278_v40 = vpop.f32.mrf.mxu0  ;;  %v2749_v14 = vmul.f32 %v11250_v23, %v2599_v49 }
 0x382   :  { %v3620_v53 = vpop.f32.mrf.mxu1  ;;  %v7978_v9 = vpop.f32.mrf.mxu0 }
 0x383   :  { %v2899_v53 = vadd.f32 %v11280_v27, %v2749_v14 }
 0x384   :  { %v8050_v52 = vpop.f32.mrf.mxu1  ;;  %v3468_v32 = vpop.f32.mrf.mxu0  ;;  %8216 = vmatmul.mubr.msk.bf16.gmra.mxu0 %vm644_vm2, %v4338_v35 }
 0x385   :  { %v3506_v16 = vadd.f32 %v3468_v32, %v11136_v3  ;;  %8247 = vmatprep.mubr.msk.bf16.mxu0 %vm8824_vm0, %v12148_v10  ;;  %v3043_v5 = vmax.f32 %v2899_v53, 0.0 }
 0x386   :  { %v11288_v8 = vpop.f32.mrf.mxu1  ;;  %8288 = vmatmul.mubr.msk.bf16.gmra.mxu1 %vm644_vm2, %v4689_v63  ;;  %v8009_v28 = vpop.f32.mrf.mxu0 }
 0x387   :  { %v11292_v60 = vadd.f32 %v11128_v18, %v3506_v16  ;;  %v2598_v18 = vmul.f32 %v10086_v22, %v2454_v37 }
 0x388   :  { %v8081_v3 = vpop.f32.mrf.mxu1  ;;  %v3471_v1 = vpop.f32.mrf.mxu0 }
 0x389   :  { %v3507_v42 = vadd.f32 %v3471_v1, %v11153_v43  ;;  %v2748_v47 = vmul.f32 %v11250_v23, %v2598_v18 }
 0x38a   :  { %v11304_v29 = vpop.f32.mrf.mxu1  ;;  %v8010_v7 = vpop.f32.mrf.mxu0 }
 0x38b   :  { %v11307_v19 = vadd.f32 %v11150_v46, %v3507_v42  ;;  %v2898_v9 = vadd.f32 %v11280_v27, %v2748_v47 }
 0x38c   :  { %v8082_v20 = vpop.f32.mrf.mxu1  ;;  %v3476_v55 = vpop.f32.mrf.mxu0  ;;  %8248 = vmatmul.mubr.msk.bf16.vlgmr.msra.gmra.mxu0 %vm644_vm2, %v4568_v44 }
 0x38d   :  { %v3508_v43 = vadd.f32 %v3476_v55, %v11176_v41  ;;  %8251 = vmatprep.mubr.msk.bf16.mxu0 %vm8824_vm0, %v12148_v10  ;;  %8292 = vmatpush3.bf16.msra.mxu0 %v8723_v13  ;;  %v3042_v59 = vmax.f32 %v2898_v9, 0.0 }
 0x38e   :  { %v11318_v46 = vpop.f32.mrf.mxu1  ;;  %v8013_v40 = vpop.f32.mrf.mxu0  ;;  %8293 = vmatprep.subr.bf16.mxu0 %v12148_v10 }
 0x38f   :  { %v11322_v35 = vadd.f32 %v11166_v33, %v3508_v43  ;;  %v4570_v1 = vpack.c.bf16 %v3043_v5, %v3042_v59 }
 0x390   :  { %v8085_v41 = vpop.f32.mrf.mxu1  ;;  %v3479_v15 = vpop.f32.mrf.mxu0 }
 0x391   :  { %v3509_v48 = vadd.f32 %v3479_v15, %v11193_v54  ;;  %8294 = vmatpush3.bf16.msra.mxu0 %v8724_v51 }
 0x392   :  { %v11327_v63 = vpop.f32.mrf.mxu1  ;;  %v8014_v52 = vpop.f32.mrf.mxu0  ;;  %8341 = vmatprep.subr.bf16.mxu0 %v12148_v10 }
 0x393   :  { %v11331_v32 = vadd.f32 %v11189_v45, %v3509_v48  ;;  %v12287_v45 = vld [vmem:[#allocation108_spill] sm:$0xff]  ;;  %v2470_v52 = vsub.f32 %v10331_v6, %v9777_v11 }
 0x394   :  { %v8086_v16 = vpop.f32.mrf.mxu1  ;;  %v3484_v33 = vpop.f32.mrf.mxu0  ;;  %8252 = vmatmul.mubr.msk.bf16.gmra.mxu0 %vm644_vm2, %v10323_v34  ;;  %v2458_v24 = vsub.f32 %v12287_v45, %v9777_v11 }
 0x395   :  { %v3510_v54 = vadd.f32 %v3484_v33, %v11209_v2  ;;  %8255 = vmatprep.mubr.msk.bf16.mxu0 %vm8824_vm0, %v12148_v10 }
 0x396   :  { %v11338_v28 = vpop.f32.mrf.mxu1  ;;  %v8017_v4 = vpop.f32.mrf.mxu0  ;;  %v2602_v2 = vmul.f32 %v10086_v22, %v2458_v24 }
 0x397   :  { %v11341_v58 = vadd.f32 %v11203_v25, %v3510_v54  ;;  %v2614_v54 = vmul.f32 %v10086_v22, %v2470_v52 }
 0x398   :  { %v8089_v37 = vpop.f32.mrf.mxu1  ;;  %v3487_v3 = vpop.f32.mrf.mxu0 }
 0x399   :  { %v3511_v34 = vadd.f32 %v3487_v3, %v11224_v26  ;;  %v2752_v26 = vmul.f32 %v11250_v23, %v2602_v2  ;;  %v2764_v6 = vmul.f32 %v11250_v23, %v2614_v54 }
 0x39a   :  { %v11347_v42 = vpop.f32.mrf.mxu1  ;;  %v8018_v13 = vpop.f32.mrf.mxu0 }
 0x39b   :  { %v11350_v44 = vadd.f32 %v11221_v31, %v3511_v34  ;;  %v2902_v14 = vadd.f32 %v11280_v27, %v2752_v26 }
 0x39c   :  { %v8090_v49 = vpop.f32.mrf.mxu1  ;;  %v3492_v18 = vpop.f32.mrf.mxu0  ;;  %8256 = vmatmul.mubr.msk.bf16.gmra.mxu0 %vm644_vm2, %v4570_v1 }
 0x39d   :  { %v3512_v25 = vadd.f32 %v3492_v18, %v11243_v30  ;;  %8259 = vmatprep.mubr.msk.bf16.mxu0 %vm8824_vm0, %v12148_v10  ;;  %v3046_v48 = vmax.f32 %v2902_v14, 0.0 }
 0x39e   :  { %v11357_v7 = vpop.f32.mrf.mxu1  ;;  %v8021_v20 = vpop.f32.mrf.mxu0 }
 0x39f   :  { %v11360_v55 = vadd.f32 %v11234_v17, %v3512_v25  ;;  %v4572_v33 = vpack.c.bf16 %v3046_v48, %v3046_v48 }
 0x3a0   :  { %v8093_v43 = vpop.f32.mrf.mxu1  ;;  %v3495_v31 = vpop.f32.mrf.mxu0 }
 0x3a1   :  { %v3513_v51 = vadd.f32 %v3495_v31, %v11260_v21 }
 0x3a2   :  { %v11364_v47 = vpop.f32.mrf.mxu1  ;;  %v8022_v30 = vpop.f32.mrf.mxu0 }
 0x3a3   :  { %v11367_v40 = vadd.f32 %v11257_v61, %v3513_v51  ;;  %v2471_v61 = vsub.f32 %v10239_v62, %v9777_v11  ;;  %v2474_v30 = vsub.f32 %v10959_v36, %v9777_v11 }
 0x3a4   :  { %v8094_v41 = vpop.f32.mrf.mxu1  ;;  %v3500_v15 = vpop.f32.mrf.mxu0  ;;  %8260 = vmatmul.mubr.msk.bf16.gmra.mxu0 %vm644_vm2, %v10364_v56 }
 0x3a5   :  { %v3514_v17 = vadd.f32 %v3500_v15, %v11275_v57  ;;  %8263 = vmatprep.mubr.msk.bf16.mxu0 %vm8824_vm0, %v12148_v10  ;;  %v2615_v57 = vmul.f32 %v10086_v22, %v2471_v61  ;;  %v2618_v48 = vmul.f32 %v10086_v22, %v2474_v30 }
 0x3a6   :  { %v11374_v21 = vpop.f32.mrf.mxu1  ;;  %v8025_v53 = vpop.f32.mrf.mxu0 }
 0x3a7   :  { %v11377_v9 = vadd.f32 %v11269_v50, %v3514_v17  ;;  %v2765_v62 = vmul.f32 %v11250_v23, %v2615_v57 }
 0x3a8   :  { %v8097_v16 = vpop.f32.mrf.mxu1  ;;  %v3503_v56 = vpop.f32.mrf.mxu0 }
 0x3a9   :  { %v2915_v13 = vadd.f32 %v11280_v27, %v2765_v62  ;;  %v2768_v16 = vmul.f32 %v11250_v23, %v2618_v48 }
 0x3aa   :  { %v3854_v5 = vpop.f32.mrf.mxu1  ;;  %v8026_v59 = vpop.f32.mrf.mxu0 }
 0x3ac   :  { %v8098_v4 = vpop.f32.mrf.mxu1  ;;  %v3702_v45 = vpop.f32.mrf.mxu0  ;;  %8264 = vmatmul.mubr.msk.bf16.gmra.mxu0 %vm644_vm2, %v4572_v33 }
 0x3ad   :  { %v3740_v50 = vadd.f32 %v3702_v45, %v11292_v60  ;;  %8295 = vmatprep.mubr.msk.bf16.mxu0 %vm8824_vm0, %v12148_v10  ;;  %v2914_v60 = vadd.f32 %v11280_v27, %v2764_v6  ;;  %v2918_v45 = vadd.f32 %v11280_v27, %v2768_v16 }
 0x3ae   :  { %v11391_v24 = vpop.f32.mrf.mxu1  ;;  %v8057_v37 = vpop.f32.mrf.mxu0 }
 0x3af   :  { %v11394_v3 = vadd.f32 %v11288_v8, %v3740_v50  ;;  %v3058_v43 = vmax.f32 %v2914_v60, 0.0 }
 0x3b0   :  { %v8129_v34 = vpop.f32.mrf.mxu1  ;;  %v3705_v1 = vpop.f32.mrf.mxu0 }
 0x3b1   :  { %v3741_v2 = vadd.f32 %v3705_v1, %v11307_v19  ;;  %v3059_v19 = vmax.f32 %v2915_v13, 0.0 }
 0x3b2   :  { %v11399_v49 = vpop.f32.mrf.mxu1  ;;  %v8058_v18 = vpop.f32.mrf.mxu0 }
 0x3b3   :  { %v11402_v25 = vadd.f32 %v11304_v29, %v3741_v2  ;;  %v2475_v29 = vsub.f32 %v10351_v38, %v9777_v11  ;;  %v4803_v15 = vpack.c.bf16 %v3059_v19, %v3058_v43 }
 0x3b4   :  { %v8130_v26 = vpop.f32.mrf.mxu1  ;;  %v3710_v20 = vpop.f32.mrf.mxu0  ;;  %8296 = vmatmul.mubr.msk.bf16.vlgmr.msra.gmra.mxu0 %vm644_vm2, %v10432_v12 }
 0x3b5   :  { %v3742_v8 = vadd.f32 %v3710_v20, %v11322_v35  ;;  %8299 = vmatprep.mubr.msk.bf16.mxu0 %vm8824_vm0, %v12148_v10  ;;  %v2619_v17 = vmul.f32 %v10086_v22, %v2475_v29 }
 0x3b6   :  { %v11409_v31 = vpop.f32.mrf.mxu1  ;;  %v8061_v51 = vpop.f32.mrf.mxu0 }
 0x3b7   :  { %v11412_v14 = vadd.f32 %v11318_v46, %v3742_v8 }
 0x3b8   :  { %v8133_v12 = vpop.f32.mrf.mxu1  ;;  %v3713_v41 = vpop.f32.mrf.mxu0 }
 0x3b9   :  { %v3743_v35 = vadd.f32 %v3713_v41, %v11331_v32  ;;  %v2769_v32 = vmul.f32 %v11250_v23, %v2619_v17 }
 0x3ba   :  { %v11421_v53 = vpop.f32.mrf.mxu1  ;;  %v8062_v61 = vpop.f32.mrf.mxu0 }
 0x3bb   :  { %v11424_v46 = vadd.f32 %v11327_v63, %v3743_v35  ;;  %v2476_v63 = vsub.f32 %v10945_v39, %v9777_v11  ;;  %v2919_v59 = vadd.f32 %v11280_v27, %v2769_v32 }
 0x3bc   :  { %v8134_v52 = vpop.f32.mrf.mxu1  ;;  %v3718_v38 = vpop.f32.mrf.mxu0  ;;  %8300 = vmatmul.mubr.msk.bf16.gmra.mxu0 %vm644_vm2, %v4803_v15 }
 0x3bd   :  { %v3744_v36 = vadd.f32 %v3718_v38, %v11341_v58  ;;  %8303 = vmatprep.mubr.msk.bf16.mxu0 %vm8824_vm0, %v12148_v10  ;;  %v2620_v4 = vmul.f32 %v10086_v22, %v2476_v63  ;;  %v3063_v39 = vmax.f32 %v2919_v59, 0.0 }
 0x3be   :  { %v11432_v56 = vpop.f32.mrf.mxu1  ;;  %v8065_v33 = vpop.f32.mrf.mxu0 }
 0x3bf   :  { %v11435_v57 = vadd.f32 %v11338_v28, %v3744_v36  ;;  %v2770_v22 = vmul.f32 %v11250_v23, %v2620_v4 }
 0x3c0   :  { %v8137_v54 = vpop.f32.mrf.mxu1  ;;  %v3721_v5 = vpop.f32.mrf.mxu0 }
 0x3c1   :  { %v3745_v58 = vadd.f32 %v3721_v5, %v11350_v44  ;;  %v3062_v44 = vmax.f32 %v2918_v45, 0.0 }
 0x3c2   :  { %v11443_v50 = vpop.f32.mrf.mxu1  ;;  %v8066_v62 = vpop.f32.mrf.mxu0 }
 0x3c3   :  { %v11446_v6 = vadd.f32 %v11347_v42, %v3745_v58 }
 0x3c4   :  { %v8138_v28 = vpop.f32.mrf.mxu1  ;;  %v3726_v37 = vpop.f32.mrf.mxu0  ;;  %8304 = vmatmul.mubr.msk.bf16.gmra.mxu0 %vm644_vm2, %v10468_v0  ;;  %v2920_v0 = vadd.f32 %v11280_v27, %v2770_v22 }
 0x3c5   :  { %v3746_v11 = vadd.f32 %v3726_v37, %v11360_v55  ;;  %8307 = vmatprep.mubr.msk.bf16.mxu0 %vm8824_vm0, %v12148_v10  ;;  %v4805_v55 = vpack.c.bf16 %v3063_v39, %v3062_v44 }
 0x3c6   :  { %v11454_v34 = vpop.f32.mrf.mxu1  ;;  %v8069_v1 = vpop.f32.mrf.mxu0 }
 0x3c7   :  { %v11457_v42 = vadd.f32 %v11357_v7, %v3746_v11  ;;  %v3064_v7 = vmax.f32 %v2920_v0, 0.0 }
 0x3c8   :  { %v8141_v2 = vpop.f32.mrf.mxu1  ;;  %v3729_v13 = vpop.f32.mrf.mxu0 }
 0x3c9   :  { %v3747_v60 = vadd.f32 %v3729_v13, %v11367_v40  ;;  %v4806_v30 = vpack.c.bf16 %v3064_v7, %v3064_v7 }
 0x3ca   :  { %v11461_v18 = vpop.f32.mrf.mxu1  ;;  %v8070_v26 = vpop.f32.mrf.mxu0 }
 0x3cb   :  { %v3864_v20 = vadd.f32 %v11364_v47, %v3747_v60 }
 0x3cc   :  { %v8142_v23 = vpop.f32.mrf.mxu1  ;;  %v3734_v8 = vpop.f32.mrf.mxu0  ;;  %8308 = vmatmul.mubr.msk.bf16.gmra.mxu0 %vm644_vm2, %v4805_v55 }
 0x3cd   :  { %v3748_v19 = vadd.f32 %v3734_v8, %v11377_v9  ;;  %8311 = vmatprep.mubr.msk.bf16.mxu0 %vm8824_vm0, %v12148_v10 }
 0x3ce   :  { %v11468_v43 = vpop.f32.mrf.mxu1  ;;  %v8073_v40 = vpop.f32.mrf.mxu0 }
 0x3cf   :  { %v3865_v27 = vadd.f32 %v11374_v21, %v3748_v19 }
 0x3d0   :  { %v8145_v51 = vpop.f32.mrf.mxu1  ;;  %v3737_v29 = vpop.f32.mrf.mxu0 }
 0x3d2   :  { %v4088_v12 = vpop.f32.mrf.mxu1  ;;  %v8074_v47 = vpop.f32.mrf.mxu0 }
 0x3d4   :  { %v8146_v41 = vpop.f32.mrf.mxu1  ;;  %v3936_v35 = vpop.f32.mrf.mxu0  ;;  %8312 = vmatmul.mubr.msk.bf16.gmra.mxu0 %vm644_vm2, %v4806_v30 }
 0x3d5   :  { %v3974_v9 = vadd.f32 %v3936_v35, %v11394_v3  ;;  %8349 = vmatprep.mubr.msk.bf16.mxu0 %vm8824_vm0, %v12148_v10 }
 0x3d6   :  { %v4287_v15 = vpop.f32.mrf.mxu1  ;;  %v8105_v17 = vpop.f32.mrf.mxu0 }
 0x3d7   :  { %v4091_v48 = vadd.f32 %v11391_v24, %v3974_v9 }
 0x3d8   :  { %v8177_v61 = vpop.f32.mrf.mxu1  ;;  %v3939_v21 = vpop.f32.mrf.mxu0 }
 0x3d9   :  { %v3975_v52 = vadd.f32 %v3939_v21, %v11402_v25 }
 0x3da   :  { %v4290_v38 = vpop.f32.mrf.mxu1  ;;  %v8106_v36 = vpop.f32.mrf.mxu0 }
 0x3db   :  { %v4092_v32 = vadd.f32 %v11399_v49, %v3975_v52 }
 0x3dc   :  { %v8178_v16 = vpop.f32.mrf.mxu1  ;;  %v3944_v33 = vpop.f32.mrf.mxu0 }
 0x3dd   :  { %v3976_v63 = vadd.f32 %v3944_v33, %v11412_v14 }
 0x3de   :  { %v4295_v3 = vpop.f32.mrf.mxu1  ;;  %v8109_v54 = vpop.f32.mrf.mxu0 }
 0x3df   :  { %v4093_v5 = vadd.f32 %v11409_v31, %v3976_v63 }
 0x3e0   :  { %v8181_v58 = vpop.f32.mrf.mxu1  ;;  %v3947_v59 = vpop.f32.mrf.mxu0 }
 0x3e1   :  { %v3977_v24 = vadd.f32 %v3947_v59, %v11424_v46 }
 0x3e2   :  { %v4298_v4 = vpop.f32.mrf.mxu1  ;;  %v8110_v45 = vpop.f32.mrf.mxu0 }
 0x3e3   :  { %v4094_v25 = vadd.f32 %v11421_v53, %v3977_v24 }
 0x3e4   :  { %v8182_v62 = vpop.f32.mrf.mxu1  ;;  %v3952_v28 = vpop.f32.mrf.mxu0 }
 0x3e5   :  { %v3978_v49 = vadd.f32 %v3952_v28, %v11435_v57 }
 0x3e6   :  { %v4303_v37 = vpop.f32.mrf.mxu1  ;;  %v8113_v11 = vpop.f32.mrf.mxu0 }
 0x3e7   :  { %v4095_v14 = vadd.f32 %v11432_v56, %v3978_v49 }
 0x3e8   :  { %v8185_v39 = vpop.f32.mrf.mxu1  ;;  %v3955_v22 = vpop.f32.mrf.mxu0 }
 0x3e9   :  { %v3979_v31 = vadd.f32 %v3955_v22, %v11446_v6 }
 0x3ea   :  { %v4306_v44 = vpop.f32.mrf.mxu1  ;;  %v8114_v1 = vpop.f32.mrf.mxu0 }
 0x3eb   :  { %v4096_v46 = vadd.f32 %v11443_v50, %v3979_v31 }
 0x3ec   :  { %v8186_v2 = vpop.f32.mrf.mxu1  ;;  %v3960_v13 = vpop.f32.mrf.mxu0 }
 0x3ed   :  { %v3980_v53 = vadd.f32 %v3960_v13, %v11457_v42 }
 0x3ee   :  { %v4311_v60 = vpop.f32.mrf.mxu1  ;;  %v8117_v0 = vpop.f32.mrf.mxu0 }
 0x3ef   :  { %v4097_v57 = vadd.f32 %v11454_v34, %v3980_v53 }
 0x3f0   :  { %v8189_v55 = vpop.f32.mrf.mxu1  ;;  %v3963_v26 = vpop.f32.mrf.mxu0 }
 0x3f1   :  { %v3981_v23 = vadd.f32 %v3963_v26, %v3864_v20 }
 0x3f2   :  { %v4314_v56 = vpop.f32.mrf.mxu1  ;;  %v8118_v8 = vpop.f32.mrf.mxu0 }
 0x3f3   :  { %v4098_v19 = vadd.f32 %v11461_v18, %v3981_v23 }
 0x3f4   :  { %v8190_v6 = vpop.f32.mrf.mxu1  ;;  %v3968_v7 = vpop.f32.mrf.mxu0 }
 0x3f5   :  { %v3982_v40 = vadd.f32 %v3968_v7, %v3865_v27 }
 0x3f6   :  { %v4319_v51 = vpop.f32.mrf.mxu1  ;;  %v8121_v50 = vpop.f32.mrf.mxu0 }
 0x3f7   :  { %v4099_v29 = vadd.f32 %v11468_v43, %v3982_v40 }
 0x3f8   :  { %v8193_v30 = vpop.f32.mrf.mxu1  ;;  %v3971_v42 = vpop.f32.mrf.mxu0 }
 0x3fa   :  { %v4322_v12 = vpop.f32.mrf.mxu1  ;;  %v8122_v47 = vpop.f32.mrf.mxu0 }
 0x3fc   :  { %v8194_v41 = vpop.f32.mrf.mxu1  ;;  %v4170_v34 = vpop.f32.mrf.mxu0 }
 0x3fd   :  { %v4208_v35 = vadd.f32 %v4170_v34, %v4091_v48 }
 0x3fe   :  { %v4521_v9 = vpop.f32.mrf.mxu1  ;;  %v8153_v20 = vpop.f32.mrf.mxu0 }
 0x3ff   :  { %v4325_v17 = vadd.f32 %v4287_v15, %v4208_v35 }
 0x400   :  { %v8225_v61 = vpop.f32.mrf.mxu1  ;;  %v4173_v21 = vpop.f32.mrf.mxu0 }
 0x401   :  { %v4209_v18 = vadd.f32 %v4173_v21, %v4092_v32 }
 0x402   :  { %v4524_v52 = vpop.f32.mrf.mxu1  ;;  %v8154_v36 = vpop.f32.mrf.mxu0 }
 0x403   :  { %v4326_v27 = vadd.f32 %v4290_v38, %v4209_v18 }
 0x404   :  { %v8226_v16 = vpop.f32.mrf.mxu1  ;;  %v4178_v33 = vpop.f32.mrf.mxu0 }
 0x405   :  { %v4210_v63 = vadd.f32 %v4178_v33, %v4093_v5 }
 0x406   :  { %v4529_v43 = vpop.f32.mrf.mxu1  ;;  %v8157_v54 = vpop.f32.mrf.mxu0 }
 0x407   :  { %v4327_v58 = vadd.f32 %v4295_v3, %v4210_v63 }
 0x408   :  { %v8229_v59 = vpop.f32.mrf.mxu1  ;;  %v4181_v24 = vpop.f32.mrf.mxu0 }
 0x409   :  { %v4211_v45 = vadd.f32 %v4181_v24, %v4094_v25 }
 0x40a   :  { %v4532_v62 = vpop.f32.mrf.mxu1  ;;  %v8158_v48 = vpop.f32.mrf.mxu0 }
 0x40b   :  { %v4328_v28 = vadd.f32 %v4298_v4, %v4211_v45 }
 0x40c   :  { %v8230_v49 = vpop.f32.mrf.mxu1  ;;  %v4186_v15 = vpop.f32.mrf.mxu0 }
 0x40d   :  { %v4212_v11 = vadd.f32 %v4186_v15, %v4095_v14 }
 0x40e   :  { %v4537_v39 = vpop.f32.mrf.mxu1  ;;  %v8161_v32 = vpop.f32.mrf.mxu0 }
 0x40f   :  { %v4329_v22 = vadd.f32 %v4303_v37, %v4212_v11 }
 0x410   :  { %v8233_v31 = vpop.f32.mrf.mxu1  ;;  %v4189_v38 = vpop.f32.mrf.mxu0 }
 0x411   :  { %v4213_v1 = vadd.f32 %v4189_v38, %v4096_v46 }
 0x412   :  { %v4540_v2 = vpop.f32.mrf.mxu1  ;;  %v8162_v5 = vpop.f32.mrf.mxu0 }
 0x413   :  { %v4330_v13 = vadd.f32 %v4306_v44, %v4213_v1 }
 0x414   :  { %v8234_v53 = vpop.f32.mrf.mxu1  ;;  %v4194_v3 = vpop.f32.mrf.mxu0 }
 0x415   :  { %v4214_v0 = vadd.f32 %v4194_v3, %v4097_v57 }
 0x416   :  { %v4545_v55 = vpop.f32.mrf.mxu1  ;;  %v8165_v25 = vpop.f32.mrf.mxu0 }
 0x417   :  { %v4331_v26 = vadd.f32 %v4311_v60, %v4214_v0 }
 0x418   :  { %v8237_v23 = vpop.f32.mrf.mxu1  ;;  %v4197_v4 = vpop.f32.mrf.mxu0 }
 0x419   :  { %v4215_v8 = vadd.f32 %v4197_v4, %v4098_v19 }
 0x41a   :  { %v4548_v6 = vpop.f32.mrf.mxu1  ;;  %v8166_v14 = vpop.f32.mrf.mxu0 }
 0x41b   :  { %v4332_v7 = vadd.f32 %v4314_v56, %v4215_v8 }
 0x41c   :  { %v8238_v40 = vpop.f32.mrf.mxu1  ;;  %v4202_v37 = vpop.f32.mrf.mxu0 }
 0x41d   :  { %v4216_v50 = vadd.f32 %v4202_v37, %v4099_v29 }
 0x41e   :  { %v4553_v30 = vpop.f32.mrf.mxu1  ;;  %v8169_v46 = vpop.f32.mrf.mxu0 }
 0x41f   :  { %v4333_v42 = vadd.f32 %v4319_v51, %v4216_v50 }
 0x420   :  { %v8241_v12 = vpop.f32.mrf.mxu1  ;;  %v4205_v44 = vpop.f32.mrf.mxu0 }
 0x422   :  { %v4556_v47 = vpop.f32.mrf.mxu1  ;;  %v8170_v41 = vpop.f32.mrf.mxu0 }
 0x424   :  { %v8242_v57 = vpop.f32.mrf.mxu1  ;;  %v4404_v34 = vpop.f32.mrf.mxu0 }
 0x425   :  { %v4442_v35 = vadd.f32 %v4404_v34, %v4325_v17 }
 0x426   :  { %v4755_v60 = vpop.f32.mrf.mxu1  ;;  %v8201_v20 = vpop.f32.mrf.mxu0 }
 0x427   :  { %v4559_v61 = vadd.f32 %v4521_v9, %v4442_v35 }
 0x428   :  { %v8273_v19 = vpop.f32.mrf.mxu1  ;;  %v4407_v21 = vpop.f32.mrf.mxu0 }
 0x429   :  { %v4443_v18 = vadd.f32 %v4407_v21, %v4326_v27 }
 0x42a   :  { %v4758_v56 = vpop.f32.mrf.mxu1  ;;  %v8202_v36 = vpop.f32.mrf.mxu0 }
 0x42b   :  { %v4560_v16 = vadd.f32 %v4524_v52, %v4443_v18 }
 0x42c   :  { %v8274_v29 = vpop.f32.mrf.mxu1  ;;  %v4412_v33 = vpop.f32.mrf.mxu0 }
 0x42d   :  { %v4444_v63 = vadd.f32 %v4412_v33, %v4327_v58 }
 0x42e   :  { %v4763_v51 = vpop.f32.mrf.mxu1  ;;  %v8205_v54 = vpop.f32.mrf.mxu0 }
 0x42f   :  { %v4561_v59 = vadd.f32 %v4529_v43, %v4444_v63 }
 0x430   :  { %v8277_v24 = vpop.f32.mrf.mxu1  ;;  %v4415_v45 = vpop.f32.mrf.mxu0 }
 0x431   :  { %v4445_v48 = vadd.f32 %v4415_v45, %v4328_v28 }
 0x432   :  { %v4766_v49 = vpop.f32.mrf.mxu1  ;;  %v8206_v17 = vpop.f32.mrf.mxu0 }
 0x433   :  { %v4562_v15 = vadd.f32 %v4532_v62, %v4445_v48 }
 0x434   :  { %v8278_v11 = vpop.f32.mrf.mxu1  ;;  %v4420_v9 = vpop.f32.mrf.mxu0 }
 0x435   :  { %v4446_v32 = vadd.f32 %v4420_v9, %v4329_v22 }
 0x436   :  { %v4771_v31 = vpop.f32.mrf.mxu1  ;;  %v8209_v27 = vpop.f32.mrf.mxu0 }
 0x437   :  { %v4563_v38 = vadd.f32 %v4537_v39, %v4446_v32 }
 0x438   :  { %v8281_v1 = vpop.f32.mrf.mxu1  ;;  %v4423_v52 = vpop.f32.mrf.mxu0 }
 0x439   :  { %v4447_v5 = vadd.f32 %v4423_v52, %v4330_v13 }
 0x43a   :  { %v4774_v53 = vpop.f32.mrf.mxu1  ;;  %v8210_v58 = vpop.f32.mrf.mxu0 }
 0x43b   :  { %v4564_v3 = vadd.f32 %v4540_v2, %v4447_v5 }
 0x43c   :  { %v8282_v0 = vpop.f32.mrf.mxu1  ;;  %v4428_v43 = vpop.f32.mrf.mxu0 }
 0x43d   :  { %v4448_v25 = vadd.f32 %v4428_v43, %v4331_v26 }
 0x43e   :  { %v4779_v23 = vpop.f32.mrf.mxu1  ;;  %v8213_v28 = vpop.f32.mrf.mxu0 }
 0x43f   :  { %v4565_v4 = vadd.f32 %v4545_v55, %v4448_v25 }
 0x440   :  { %v8285_v8 = vpop.f32.mrf.mxu1  ;;  %v4431_v62 = vpop.f32.mrf.mxu0 }
 0x441   :  { %v4449_v14 = vadd.f32 %v4431_v62, %v4332_v7 }
 0x442   :  { %v4782_v40 = vpop.f32.mrf.mxu1  ;;  %v8214_v22 = vpop.f32.mrf.mxu0 }
 0x443   :  { %v4566_v37 = vadd.f32 %v4548_v6, %v4449_v14 }
 0x444   :  { %v8286_v50 = vpop.f32.mrf.mxu1  ;;  %v4436_v39 = vpop.f32.mrf.mxu0 }
 0x445   :  { %v4450_v46 = vadd.f32 %v4436_v39, %v4333_v42 }
 0x446   :  { %v4787_v12 = vpop.f32.mrf.mxu1  ;;  %v8217_v13 = vpop.f32.mrf.mxu0 }
 0x447   :  { %v4567_v44 = vadd.f32 %v4553_v30, %v4450_v46 }
 0x448   :  { %v8289_v47 = vpop.f32.mrf.mxu1  ;;  %v4439_v2 = vpop.f32.mrf.mxu0 }
 0x44a   :  { %v4790_v41 = vpop.f32.mrf.mxu1  ;;  %v8218_v57 = vpop.f32.mrf.mxu0 }
 0x44c   :  { %v8290_v26 = vpop.f32.mrf.mxu1  ;;  %v4638_v34 = vpop.f32.mrf.mxu0 }
 0x44d   :  { %v4676_v35 = vadd.f32 %v4638_v34, %v4559_v61 }
 0x44e   :  { %v8249_v55 = vpop.f32.mrf.mxu0 }
 0x44f   :  { %v4793_v20 = vadd.f32 %v4755_v60, %v4676_v35 }
 0x450   :  { %v4641_v19 = vpop.f32.mrf.mxu0 }
 0x451   :  { %v4677_v7 = vadd.f32 %v4641_v19, %v4560_v16 }
 0x452   :  { %v8250_v21 = vpop.f32.mrf.mxu0 }
 0x453   :  { %v4794_v18 = vadd.f32 %v4758_v56, %v4677_v7 }
 0x454   :  { %v4646_v6 = vpop.f32.mrf.mxu0 }
 0x455   :  { %v4678_v36 = vadd.f32 %v4646_v6, %v4561_v59 }
 0x456   :  { %v8253_v29 = vpop.f32.mrf.mxu0 }
 0x457   :  { %v4795_v42 = vadd.f32 %v4763_v51, %v4678_v36 }
 0x458   :  { %v4649_v33 = vpop.f32.mrf.mxu0 }
 0x459   :  { %v4679_v63 = vadd.f32 %v4649_v33, %v4562_v15 }
 0x45a   :  { %v8254_v30 = vpop.f32.mrf.mxu0 }
 0x45b   :  { %v4796_v54 = vadd.f32 %v4766_v49, %v4679_v63  ;;  %v8734_v30 = vld [vmem:[%s11979_s9 + $0x38] sm:$0xff]  }
 0x45c   :  { %v4654_v24 = vpop.f32.mrf.mxu0  ;;  %8342 = vmatpush3.bf16.msra.mxu0 %v8734_v30 }
 0x45d   :  { %v4680_v45 = vadd.f32 %v4654_v24, %v4563_v38  ;;  %8343 = vmatprep.subr.bf16.mxu0 %v12148_v10 }
 0x45e   :  { %v8257_v48 = vpop.f32.mrf.mxu0 }
 0x45f   :  { %v4797_v17 = vadd.f32 %v4771_v31, %v4680_v45  ;;  %v8736_v48 = vld [vmem:[%s11979_s9 + $0x30] sm:$0xff]  }
 0x460   :  { %v4657_v11 = vpop.f32.mrf.mxu0  ;;  %8344 = vmatpush3.bf16.msra.mxu0 %v8736_v48 }
 0x461   :  { %v4681_v61 = vadd.f32 %v4657_v11, %v4564_v3  ;;  %8345 = vmatprep.subr.bf16.mxu0 %v12148_v10 }
 0x462   :  { %v8258_v9 = vpop.f32.mrf.mxu0 }
 0x463   :  { %v4798_v60 = vadd.f32 %v4774_v53, %v4681_v61  ;;  %v8725_v53 = vld [vmem:[%s11978_s8] sm:$0xff]  }
 0x464   :  { %v4662_v32 = vpop.f32.mrf.mxu0  ;;  %8325 = vmatprep.mubr.msk.bf16.mxu1 %vm5099_vm4, %v8725_v53 }
 0x465   :  { %v4682_v16 = vadd.f32 %v4662_v32, %v4565_v4 }
 0x466   :  { %v8261_v27 = vpop.f32.mrf.mxu0 }
 0x467   :  { %v4799_v56 = vadd.f32 %v4779_v23, %v4682_v16 }
 0x468   :  { %v4665_v1 = vpop.f32.mrf.mxu0 }
 0x469   :  { %v4683_v59 = vadd.f32 %v4665_v1, %v4566_v37 }
 0x46a   :  { %v8262_v52 = vpop.f32.mrf.mxu0 }
 0x46b   :  { %v4800_v51 = vadd.f32 %v4782_v40, %v4683_v59 }
 0x46c   :  { %v4670_v5 = vpop.f32.mrf.mxu0 }
 0x46d   :  { %v4684_v15 = vadd.f32 %v4670_v5, %v4567_v44 }
 0x46e   :  { %v8265_v58 = vpop.f32.mrf.mxu0 }
 0x46f   :  { %v4801_v49 = vadd.f32 %v4787_v12, %v4684_v15 }
 0x470   :  { %v4673_v0 = vpop.f32.mrf.mxu0 }
 0x472   :  { %v8266_v38 = vpop.f32.mrf.mxu0 }
 0x474   :  { %v4872_v43 = vpop.f32.mrf.mxu0 }
 0x475   :  { %v4910_v3 = vadd.f32 %v4872_v43, %v4793_v20 }
 0x476   :  { %v8297_v31 = vpop.f32.mrf.mxu0 }
 0x477   :  { %v4920_v4 = vsel %vm4919_vm5, %v4910_v3, 0.0 }
 0x478   :  { %v4875_v25 = vpop.f32.mrf.mxu0 }
 0x479   :  { %v4911_v23 = vadd.f32 %v4875_v25, %v4794_v18 }
 0x47a   :  { %v8298_v28 = vpop.f32.mrf.mxu0 }
 0x47b   :  { %v4921_v8 = vsel %vm4919_vm5, %v4911_v23, 0.0 }
 0x47c   :  { %v4922_v62 = vadd.f32 %v4921_v8, %v4920_v4  ;;  %v4880_v14 = vpop.f32.mrf.mxu0 }
 0x47d   :  { %v4912_v40 = vadd.f32 %v4880_v14, %v4795_v42 }
 0x47e   :  { %v8301_v22 = vpop.f32.mrf.mxu0 }
 0x47f   :  { %v4923_v37 = vsel %vm4919_vm5, %v4912_v40, 0.0 }
 0x480   :  { %v4924_v50 = vadd.f32 %v4923_v37, %v4922_v62  ;;  %v4883_v39 = vpop.f32.mrf.mxu0 }
 0x481   :  { %v4913_v46 = vadd.f32 %v4883_v39, %v4796_v54 }
 0x482   :  { %v8302_v12 = vpop.f32.mrf.mxu0 }
 0x483   :  { %v4925_v13 = vsel %vm4919_vm5, %v4913_v46, 0.0 }
 0x484   :  { %v4926_v44 = vadd.f32 %v4925_v13, %v4924_v50  ;;  %v4888_v47 = vpop.f32.mrf.mxu0 }
 0x485   :  { %v4914_v2 = vadd.f32 %v4888_v47, %v4797_v17 }
 0x486   :  { %v8305_v41 = vpop.f32.mrf.mxu0 }
 0x487   :  { %v4927_v57 = vsel %vm4919_vm5, %v4914_v2, 0.0 }
 0x488   :  { %v4928_v26 = vadd.f32 %v4927_v57, %v4926_v44  ;;  %v4891_v34 = vpop.f32.mrf.mxu0 }
 0x489   :  { %v4915_v35 = vadd.f32 %v4891_v34, %v4798_v60 }
 0x48a   :  { %v8306_v55 = vpop.f32.mrf.mxu0 }
 0x48b   :  { %v4929_v20 = vsel %vm4919_vm5, %v4915_v35, 0.0 }
 0x48c   :  { %v4930_v19 = vadd.f32 %v4929_v20, %v4928_v26  ;;  %v4896_v7 = vpop.f32.mrf.mxu0 }
 0x48d   :  { %v4916_v21 = vadd.f32 %v4896_v7, %v4799_v56 }
 0x48e   :  { %v8309_v18 = vpop.f32.mrf.mxu0 }
 0x48f   :  { %v4931_v6 = vsel %vm4919_vm5, %v4916_v21, 0.0 }
 0x490   :  { %v4932_v36 = vadd.f32 %v4931_v6, %v4930_v19  ;;  %v4899_v29 = vpop.f32.mrf.mxu0 }
 0x491   :  { %v4917_v42 = vadd.f32 %v4899_v29, %v4800_v51 }
 0x492   :  { %v8310_v33 = vpop.f32.mrf.mxu0 }
 0x493   :  { %v4933_v63 = vsel %vm4919_vm5, %v4917_v42, 0.0  ;;  %v7204_v33 = vld [vmem:[%s11980_s6] ss:$0 sm:$0xff] }
 0x494   :  { %v4934_v54 = vadd.f32 %v4933_v63, %v4932_v36  ;;  %v4904_v24 = vpop.f32.mrf.mxu0 }
 0x495   :  { %v4918_v45 = vadd.f32 %v4904_v24, %v4801_v49 }
 0x496   :  { %v8313_v17 = vpop.f32.mrf.mxu0 }
 0x497   :  { %v4935_v11 = vsel %vm4919_vm5, %v4918_v45, 0.0 }
 0x498   :  { %v4936_v61 = vadd.f32 %v4935_v11, %v4934_v54  ;;  %v4907_v9 = vpop.f32.mrf.mxu0 }
 0x49a   :  { %v4937_v60 = vrot.slane %v4936_v61, 4  ;;  %v8314_v32 = vpop.f32.mrf.mxu0 }
 0x49c   :  { %v4938_v16 = vadd.f32 %v4937_v60, %v4936_v61 }
 0x49e   :  { %v4939_v27 = vrot.slane %v4938_v16, 2 }
 0x4a0   :  { %v4940_v56 = vadd.f32 %v4939_v27, %v4938_v16 }
 0x4a2   :  { %v4941_v1 = vrot.slane %v4940_v56, 1 }
 0x4a4   :  { %v4942_v59 = vadd.f32 %v4941_v1, %v4940_v56 }
 0x4a6   :  { %v4943_v52 = vmul.f32 0.013888889, %v4942_v59 }
 0x4a8   :  { %v4944_v51 = vsub.f32 %v4910_v3, %v4943_v52  ;;  %v11511_v5 = vsub.f32 %v4911_v23, %v4943_v52  ;;  %v4946_v15 = vsub.f32 %v4912_v40, %v4943_v52  ;;  %v4947_v58 = vsub.f32 %v4913_v46, %v4943_v52 }
 0x4a9   :  { %v4948_v49 = vsub.f32 %v4914_v2, %v4943_v52  ;;  %v4949_v0 = vsub.f32 %v4915_v35, %v4943_v52  ;;  %v4950_v38 = vsub.f32 %v4916_v21, %v4943_v52  ;;  %v4951_v43 = vsub.f32 %v4917_v42, %v4943_v52 }
 0x4aa   :  { %v4952_v31 = vsub.f32 %v4918_v45, %v4943_v52  ;;  %v4953_v53 = vmul.f32 %v4944_v51, %v4944_v51  ;;  %v4954_v25 = vmul.f32 %v11511_v5, %v11511_v5  ;;  %v4955_v28 = vmul.f32 %v4946_v15, %v4946_v15  ;;  %v7205_v45 = vld [vmem:[%s11981_s7] ss:$0 sm:$0xff] }
 0x4ab   :  { %v4956_v4 = vmul.f32 %v4947_v58, %v4947_v58  ;;  %v4957_v8 = vmul.f32 %v4948_v49, %v4948_v49  ;;  %v4958_v62 = vmul.f32 %v4949_v0, %v4949_v0  ;;  %v4959_v14 = vmul.f32 %v4950_v38, %v4950_v38 }
 0x4ac   :  { %v4960_v22 = vmul.f32 %v4951_v43, %v4951_v43  ;;  %v4961_v3 = vmul.f32 %v4952_v31, %v4952_v31  ;;  %v4962_v23 = vsel %vm4919_vm5, %v4953_v53, 0.0  ;;  %v4963_v40 = vsel %vm4919_vm5, %v4954_v25, 0.0 }
 0x4ad   :  { %v4964_v37 = vadd.f32 %v4963_v40, %v4962_v23  ;;  %v4965_v50 = vsel %vm4919_vm5, %v4955_v28, 0.0  ;;  %v4967_v39 = vsel %vm4919_vm5, %v4956_v4, 0.0  ;;  %v4969_v46 = vsel %vm4919_vm5, %v4957_v8, 0.0 }
 0x4ae   :  { %v4971_v12 = vsel %vm4919_vm5, %v4958_v62, 0.0  ;;  %v4973_v13 = vsel %vm4919_vm5, %v4959_v14, 0.0  ;;  %v4975_v44 = vsel %vm4919_vm5, %v4960_v22, 0.0  ;;  %v4977_v47 = vsel %vm4919_vm5, %v4961_v3, 0.0 }
 0x4af   :  { %v4966_v2 = vadd.f32 %v4965_v50, %v4964_v37 }
 0x4b1   :  { %v4968_v41 = vadd.f32 %v4967_v39, %v4966_v2  ;;  %v8735_v2 = vld [vmem:[%s11979_s9 + $0x10] sm:$0xff]  }
 0x4b3   :  { %v4970_v57 = vadd.f32 %v4969_v46, %v4968_v41  ;;  %v8728_v41 = vld [vmem:[%s11978_s8 + $0x18] sm:$0xff]  }
 0x4b5   :  { %v4972_v26 = vadd.f32 %v4971_v12, %v4970_v57  ;;  %v8729_v57 = vld [vmem:[%s11978_s8 + $0x20] sm:$0xff]  }
 0x4b7   :  { %v4974_v34 = vadd.f32 %v4973_v13, %v4972_v26  ;;  %v8726_v13 = vld [vmem:[%s11978_s8 + $0x8] sm:$0xff]  }
 0x4b8   :  { %v8737_v26 = vld [vmem:[%s11979_s9 + $0x8] sm:$0xff]  }
 0x4b9   :  { %v4976_v35 = vadd.f32 %v4975_v44, %v4974_v34  ;;  %v8727_v44 = vld [vmem:[%s11978_s8 + $0x10] sm:$0xff]   ;;  %v8730_v34 = vld [vmem:[%s11978_s8 + $0x28] sm:$0xff]  }
 0x4bb   :  { %v4978_v55 = vadd.f32 %v4977_v47, %v4976_v35  ;;  %v8733_v47 = vld [vmem:[%s11979_s9 + $0x18] sm:$0xff]   ;;  %v8731_v35 = vld [vmem:[%s11978_s8 + $0x30] sm:$0xff]  }
 0x4bd   :  { %v4979_v20 = vrot.slane %v4978_v55, 4 }
 0x4bf   :  { %v4980_v19 = vadd.f32 %v4979_v20, %v4978_v55  ;;  %v8732_v55 = vld [vmem:[%s11978_s8 + $0x38] sm:$0xff]   ;;  %v8738_v20 = vld [vmem:[%s11979_s9 + $0x28] sm:$0xff]  }
 0x4c0   :  { %8346 = vmatpush3.bf16.msra.mxu0 %v8738_v20  ;;  %v8779_v20 = vld [vmem:[%s11979_s9 + $0x160] sm:$0xff]  }
 0x4c1   :  { %v4981_v7 = vrot.slane %v4980_v19, 2  ;;  %8347 = vmatprep.subr.bf16.mxu0 %v12148_v10 }
 0x4c3   :  { %v4982_v21 = vadd.f32 %v4981_v7, %v4980_v19  ;;  %v8739_v19 = vld [vmem:[%s11979_s9] sm:$0xff]  }
 0x4c4   :  { %v8740_v7 = vld [vmem:[%s11979_s9 + $0x20] sm:$0xff]  }
 0x4c5   :  { %v4983_v18 = vrot.slane %v4982_v21, 1  ;;  %8348 = vmatpush3.bf16.msra.mxu0 %v8740_v7  ;;  %v8781_v7 = vld [vmem:[%s11979_s9 + $0x1b8] sm:$0xff]  }
 0x4c6   :  { %8365 = vmatprep.subr.bf16.mxu0 %v12148_v10 }
 0x4c7   :  { %v4984_v6 = vadd.f32 %v4983_v18, %v4982_v21 }
 0x4c9   :  { %v4985_v36 = vmul.f32 0.013888889, %v4984_v6  ;;  %v8741_v6 = vld [vmem:[%s11979_s9 + $0x78] sm:$0xff]  }
 0x4cb   :  { %v4986_v29 = vadd.f32 1e-05, %v4985_v36 }
 0x4cd   :  { %8815 = vrsqrt.f32 %v4986_v29 }
 0x4da   :  { %v8816_v42 = vpop.eup %8815 }
 0x4db   :  { %v4998_v63 = vmul.f32 %v8816_v42, %v4952_v31  ;;  %v4996_v30 = vmul.f32 %v8816_v42, %v4950_v38  ;;  %v4997_v54 = vmul.f32 %v8816_v42, %v4951_v43  ;;  %v4994_v24 = vmul.f32 %v8816_v42, %v4948_v49 }
 0x4dc   :  { %v4995_v48 = vmul.f32 %v8816_v42, %v4949_v0  ;;  %v4992_v17 = vmul.f32 %v8816_v42, %v4946_v15  ;;  %v4993_v11 = vmul.f32 %v8816_v42, %v4947_v58  ;;  %v4990_v61 = vmul.f32 %v8816_v42, %v4944_v51 }
 0x4dd   :  { %v5013_v9 = vmul.f32 %v7204_v33, %v4998_v63  ;;  %v5011_v60 = vmul.f32 %v7204_v33, %v4996_v30  ;;  %v5012_v32 = vmul.f32 %v7204_v33, %v4997_v54  ;;  %v5009_v16 = vmul.f32 %v7204_v33, %v4994_v24  ;;  %v8743_v63 = vld [vmem:[%s11979_s9 + $0x70] sm:$0xff]   ;;  %v8745_v24 = vld [vmem:[%s11979_s9 + $0x68] sm:$0xff]  }
 0x4de   :  { %v5010_v27 = vmul.f32 %v7204_v33, %v4995_v48  ;;  %v5007_v56 = vmul.f32 %v7204_v33, %v4992_v17  ;;  %v5008_v1 = vmul.f32 %v7204_v33, %v4993_v11  ;;  %v4991_v59 = vmul.f32 %v8816_v42, %v11511_v5  ;;  %v8744_v54 = vld [vmem:[%s11979_s9 + $0x50] sm:$0xff]   ;;  %v8747_v48 = vld [vmem:[%s11979_s9 + $0x60] sm:$0xff]   ;;  %v8749_v11 = vld [vmem:[%s11979_s9 + $0xb8] sm:$0xff]  }
 0x4df   :  { %v5028_v52 = vadd.f32 %v7205_v45, %v5013_v9  ;;  %v5026_v38 = vadd.f32 %v7205_v45, %v5011_v60  ;;  %v5027_v49 = vadd.f32 %v7205_v45, %v5012_v32  ;;  %v5024_v43 = vadd.f32 %v7205_v45, %v5009_v16  ;;  %v8748_v17 = vld [vmem:[%s11979_s9 + $0x40] sm:$0xff]   ;;  %v8750_v60 = vld [vmem:[%s11979_s9 + $0x98] sm:$0xff]   ;;  %v8751_v32 = vld [vmem:[%s11979_s9 + $0xb0] sm:$0xff]  }
 0x4e0   :  { %v5025_v31 = vadd.f32 %v7205_v45, %v5010_v27  ;;  %v5022_v53 = vadd.f32 %v7205_v45, %v5007_v56  ;;  %v5023_v25 = vadd.f32 %v7205_v45, %v5008_v1  ;;  %v5005_v0 = vmul.f32 %v7204_v33, %v4990_v61  ;;  %v8752_v56 = vld [vmem:[%s11979_s9 + $0x90] sm:$0xff]   ;;  %v8753_v1 = vld [vmem:[%s11979_s9 + $0xa8] sm:$0xff]  }
 0x4e1   :  { %v5037_v15 = vmax.f32 %v5028_v52, 0.0  ;;  %v5035_v58 = vmax.f32 %v5026_v38, 0.0  ;;  %v5036_v51 = vmax.f32 %v5027_v49, 0.0  ;;  %v5033_v28 = vmax.f32 %v5024_v43, 0.0  ;;  %v8754_v52 = vld [vmem:[%s11979_s9 + $0x88] sm:$0xff]   ;;  %v8755_v38 = vld [vmem:[%s11979_s9 + $0xa0] sm:$0xff]  }
 0x4e2   :  { %v5034_v4 = vmax.f32 %v5025_v31, 0.0  ;;  %v5031_v8 = vmax.f32 %v5022_v53, 0.0  ;;  %v5032_v62 = vmax.f32 %v5023_v25, 0.0  ;;  %v5006_v14 = vmul.f32 %v7204_v33, %v4991_v59  ;;  %v8742_v33 = vld [vmem:[%s11979_s9 + $0x58] sm:$0xff]   ;;  %v8756_v31 = vld [vmem:[%s11979_s9 + $0x80] sm:$0xff]  }
 0x4e3   :  { %v5058_v22 = vpack.c.bf16 %v5037_v15, %v5037_v15  ;;  %v5057_v3 = vpack.c.bf16 %v5036_v51, %v5035_v58  ;;  %v5020_v23 = vadd.f32 %v7205_v45, %v5005_v0  ;;  %v8757_v53 = vld [vmem:[%s11979_s9 + $0xf8] sm:$0xff]   ;;  %v8759_v0 = vld [vmem:[%s11979_s9 + $0xf0] sm:$0xff]   ;;  %v8761_v51 = vld [vmem:[%s11979_s9 + $0xe8] sm:$0xff]  }
 0x4e4   :  { %v5056_v5 = vpack.c.bf16 %v5034_v4, %v5033_v28  ;;  %v5055_v40 = vpack.c.bf16 %v5032_v62, %v5031_v8  ;;  %v5021_v37 = vadd.f32 %v7205_v45, %v5006_v14  ;;  %v8746_v45 = vld [vmem:[%s11979_s9 + $0x48] sm:$0xff]   ;;  %v8758_v25 = vld [vmem:[%s11979_s9 + $0xd8] sm:$0xff]   ;;  %v8760_v58 = vld [vmem:[%s11979_s9 + $0xd0] sm:$0xff]  }
 0x4e5   :  { %8582 = vmatprep.subr.msk.bf16.mxu1 %vm5124_vm6, %v5058_v22  ;;  %v5126_v50 = vsel %vm5124_vm6, %v5058_v22, 0  ;;  %v5029_v39 = vmax.f32 %v5020_v23, 0.0  ;;  %v8762_v28 = vld [vmem:[%s11979_s9 + $0xc8] sm:$0xff]   ;;  %v8763_v4 = vld [vmem:[%s11979_s9 + $0xe0] sm:$0xff]   ;;  %v8765_v62 = vld [vmem:[%s11979_s9 + $0x138] sm:$0xff]  }
 0x4e6   :  { %8316 = vmatpush3.bf16.msra.mxu1 %v5126_v50  ;;  %v5030_v46 = vmax.f32 %v5021_v37, 0.0  ;;  %v8764_v8 = vld [vmem:[%s11979_s9 + $0xc0] sm:$0xff]   ;;  %v8767_v23 = vld [vmem:[%s11979_s9 + $0x130] sm:$0xff]   ;;  %v8769_v50 = vld [vmem:[%s11979_s9 + $0x128] sm:$0xff]  }
 0x4e7   :  { %8317 = vmatprep.subr.bf16.mxu1 %v5057_v3  ;;  %v8768_v37 = vld [vmem:[%s11979_s9 + $0x110] sm:$0xff]  }
 0x4e8   :  { %v5054_v12 = vpack.c.bf16 %v5030_v46, %v5029_v39  ;;  %v8770_v46 = vld [vmem:[%s11979_s9 + $0x108] sm:$0xff]  }
 0x4ea   :  { %8318 = vmatpush3.bf16.msra.mxu1 %v5057_v3  ;;  %v8766_v3 = vld [vmem:[%s11979_s9 + $0x118] sm:$0xff]  }
 0x4eb   :  { %8319 = vmatprep.subr.bf16.mxu1 %v5056_v5 }
 0x4ee   :  { %8320 = vmatpush3.bf16.msra.mxu1 %v5056_v5 }
 0x4ef   :  { %8321 = vmatprep.subr.bf16.mxu1 %v5055_v40 }
 0x4f2   :  { %8322 = vmatpush3.bf16.msra.mxu1 %v5055_v40 }
 0x4f3   :  { %8323 = vmatprep.subr.bf16.mxu1 %v5054_v12 }
 0x4f6   :  { %8324 = vmatpush3.bf16.msra.mxu1 %v5054_v12  ;;  %v8771_v12 = vld [vmem:[%s11979_s9 + $0x120] sm:$0xff]  }
 0x4f7   :  { %8353 = vmatprep.subr.bf16.mxu1 %v12148_v10 }
 0x4f9   :  { %8326 = vmatmul.mubr.msk.bf16.vlgmr.msra.gmra.mxu1 %vm5099_vm4, %v8726_v13 }
 0x4fa   :  { %8329 = vmatprep.mubr.msk.bf16.mxu1 %vm5099_vm4, %v8727_v44  ;;  %8354 = vmatpush3.bf16.msra.mxu1 %v8733_v47  ;;  %v8772_v47 = vld [vmem:[%s11979_s9 + $0x100] sm:$0xff]  }
 0x4fb   :  { %8355 = vmatprep.subr.bf16.mxu1 %v12148_v10 }
 0x4fe   :  { %8356 = vmatpush3.bf16.msra.mxu1 %v8735_v2  ;;  %v8773_v2 = vld [vmem:[%s11979_s9 + $0x178] sm:$0xff]  }
 0x4ff   :  { %8357 = vmatprep.subr.bf16.mxu1 %v12148_v10 }
 0x501   :  { %8330 = vmatmul.mubr.msk.bf16.gmra.mxu1 %vm5099_vm4, %v8728_v41  ;;  %v8774_v41 = vld [vmem:[%s11979_s9 + $0x158] sm:$0xff]  }
 0x502   :  { %8333 = vmatprep.mubr.msk.bf16.mxu1 %vm5099_vm4, %v8729_v57  ;;  %8358 = vmatpush3.bf16.msra.mxu1 %v8737_v26  ;;  %v8775_v57 = vld [vmem:[%s11979_s9 + $0x170] sm:$0xff]  }
 0x503   :  { %8359 = vmatprep.subr.bf16.mxu1 %v12148_v10 }
 0x506   :  { %8360 = vmatpush3.bf16.msra.mxu1 %v8739_v19  ;;  %v8780_v19 = vld [vmem:[%s11979_s9 + $0x140] sm:$0xff]  }
 0x507   :  { %8377 = vmatprep.subr.bf16.mxu1 %v12148_v10 }
 0x509   :  { %8334 = vmatmul.mubr.msk.bf16.gmra.mxu1 %vm5099_vm4, %v8730_v34  ;;  %v8776_v34 = vld [vmem:[%s11979_s9 + $0x150] sm:$0xff]  }
 0x50a   :  { %8337 = vmatprep.mubr.msk.bf16.mxu1 %vm5099_vm4, %v8731_v35  ;;  %v8777_v35 = vld [vmem:[%s11979_s9 + $0x168] sm:$0xff]  }
 0x511   :  { %8338 = vmatmul.mubr.msk.bf16.gmra.mxu1 %vm5099_vm4, %v8732_v55  ;;  %v8778_v55 = vld [vmem:[%s11979_s9 + $0x148] sm:$0xff]  }
 0x512   :  { %8361 = vmatprep.mubr.msk.bf16.mxu1 %vm8824_vm0, %v12148_v10 }
 0x5b9   :  { %v8327_v21 = vpop.f32.mrf.mxu1 }
 0x5ba   :  { %v5377_v27 = vpack.c.bf16 %v8327_v21, %v8327_v21 }
 0x5bb   :  { %v5162_v18 = vpop.f32.mrf.mxu1 }
 0x5bc   :  { %v5225_v36 = vpack.c.bf16 %v5162_v18, %v5162_v18 }
 0x5bd   :  { %v8328_v29 = vpop.f32.mrf.mxu1 }
 0x5be   :  { %8362 = vmatmul.mubr.msk.bf16.vlgmr.msra.gmra.mxu1 %vm4919_vm5, %v5225_v36  ;;  %v5454_v9 = vpack.c.bf16 %v8328_v29, %v8328_v29  ;;  %v8783_v36 = vld [vmem:[%s11979_s9 + $0x1b0] sm:$0xff]  }
 0x5bf   :  { %8378 = vmatpush3.bf16.msra.mxu1 %v8741_v6  ;;  %v5165_v42 = vpop.f32.mrf.mxu1  ;;  %8385 = vmatprep.mubr.msk.bf16.mxu1 %vm8824_vm0, %v12148_v10  ;;  %v8782_v6 = vld [vmem:[%s11979_s9 + $0x198] sm:$0xff]  }
 0x5c0   :  { %v5234_v30 = vpack.c.bf16 %v5165_v42, %v5165_v42  ;;  %8379 = vmatprep.subr.bf16.mxu1 %v12148_v10 }
 0x5c1   :  { %v11626_v61 = vpop.f32.mrf.mxu1 }
 0x5c2   :  { %8350 = vmatmul.mubr.msk.bf16.vlgmr.msra.gmra.mxu0 %vm4919_vm5, %v5234_v30  ;;  %v5685_v40 = vpack.c.bf16 %v11626_v61, %v11626_v61  ;;  %v8790_v61 = vld [vmem:[%s11979_s9 + $0x1d8] sm:$0xff]  }
 0x5c3   :  { %8366 = vmatpush3.bf16.msra.mxu0 %v8742_v33  ;;  %8380 = vmatpush3.bf16.msra.mxu1 %v8743_v63  ;;  %v5178_v16 = vpop.f32.mrf.mxu1  ;;  %v8784_v33 = vld [vmem:[%s11979_s9 + $0x190] sm:$0xff]   ;;  %v8785_v63 = vld [vmem:[%s11979_s9 + $0x1a8] sm:$0xff]  }
 0x5c4   :  { %8367 = vmatprep.subr.bf16.mxu0 %v12148_v10  ;;  %8381 = vmatprep.subr.bf16.mxu1 %v12148_v10  ;;  %v5531_v15 = vpack.c.bf16 %v5178_v16, %v5178_v16  ;;  %v8793_v16 = vld [vmem:[%s11979_s9 + $0x1e8] sm:$0xff]  }
 0x5c5   :  { %8373 = vmatprep.mubr.msk.bf16.mxu0 %vm8824_vm0, %v12148_v10  ;;  %v8332_v59 = vpop.f32.mrf.mxu1 }
 0x5c6   :  { %v5762_v22 = vpack.c.bf16 %v8332_v59, %v8332_v59 }
 0x5c7   :  { %8368 = vmatpush3.bf16.msra.mxu0 %v8744_v54  ;;  %8382 = vmatpush3.bf16.msra.mxu1 %v8745_v24  ;;  %v5181_v49 = vpop.f32.mrf.mxu1  ;;  %v8786_v54 = vld [vmem:[%s11979_s9 + $0x188] sm:$0xff]   ;;  %v8787_v24 = vld [vmem:[%s11979_s9 + $0x1a0] sm:$0xff]  }
 0x5c8   :  { %8369 = vmatprep.subr.bf16.mxu0 %v12148_v10  ;;  %8383 = vmatprep.subr.bf16.mxu1 %v12148_v10  ;;  %v5608_v43 = vpack.c.bf16 %v5181_v49, %v5181_v49 }
 0x5c9   :  { %v11704_v14 = vpop.f32.mrf.mxu1 }
 0x5ca   :  { %v5993_v42 = vpack.c.bf16 %v11704_v14, %v11704_v14 }
 0x5cb   :  { %8370 = vmatpush3.bf16.msra.mxu0 %v8746_v45  ;;  %8384 = vmatpush3.bf16.msra.mxu1 %v8747_v48  ;;  %v5194_v5 = vpop.f32.mrf.mxu1 }
 0x5cc   :  { %8371 = vmatprep.subr.bf16.mxu0 %v12148_v10  ;;  %8401 = vmatprep.subr.bf16.mxu1 %v12148_v10  ;;  %v5839_v26 = vpack.c.bf16 %v5194_v5, %v5194_v5 }
 0x5cd   :  { %v8336_v39 = vpop.f32.mrf.mxu1 }
 0x5ce   :  { %8386 = vmatmul.mubr.msk.bf16.vlgmr.msra.gmra.mxu1 %vm4919_vm5, %v5454_v9  ;;  %v6070_v18 = vpack.c.bf16 %v8336_v39, %v8336_v39  ;;  %v8791_v9 = vld [vmem:[%s11979_s9 + $0x1f0] sm:$0xff]  }
 0x5cf   :  { %8372 = vmatpush3.bf16.msra.mxu0 %v8748_v17  ;;  %8402 = vmatpush3.bf16.msra.mxu1 %v8749_v11  ;;  %v5197_v13 = vpop.f32.mrf.mxu1  ;;  %v8788_v17 = vld [vmem:[%s11979_s9 + $0x180] sm:$0xff]   ;;  %v8789_v11 = vld [vmem:[%s11979_s9 + $0x1f8] sm:$0xff]  }
 0x5d0   :  { %8389 = vmatprep.subr.bf16.mxu0 %v12148_v10  ;;  %8403 = vmatprep.subr.bf16.mxu1 %v12148_v10  ;;  %v5916_v44 = vpack.c.bf16 %v5197_v13, %v5197_v13 }
 0x5d1   :  { %8409 = vmatprep.mubr.msk.bf16.mxu1 %vm8824_vm0, %v12148_v10  ;;  %v11784_v21 = vpop.f32.mrf.mxu1 }
 0x5d2   :  { %8374 = vmatmul.mubr.msk.bf16.vlgmr.msra.gmra.mxu0 %vm4919_vm5, %v5377_v27  ;;  %v8794_v27 = vld [vmem:[%s11979_s9 + $0x1c8] sm:$0xff]  }
 0x5d3   :  { %8390 = vmatpush3.bf16.msra.mxu0 %v8750_v60  ;;  %8404 = vmatpush3.bf16.msra.mxu1 %v8751_v32  ;;  %v5210_v29 = vpop.f32.mrf.mxu1  ;;  %v8792_v32 = vld [vmem:[%s11979_s9 + $0x1d0] sm:$0xff]  }
 0x5d4   :  { %8391 = vmatprep.subr.bf16.mxu0 %v12148_v10  ;;  %8405 = vmatprep.subr.bf16.mxu1 %v12148_v10  ;;  %v6147_v60 = vpack.c.bf16 %v5210_v29, %v5210_v29 }
 0x5d5   :  { %8397 = vmatprep.mubr.msk.bf16.mxu0 %vm8824_vm0, %v12148_v10  ;;  %v8340_v30 = vpop.f32.mrf.mxu1 }
 0x5d6   :  { %v6378_v59 = vpack.c.bf16 %v8340_v30, %v8340_v30 }
 0x5d7   :  { %8392 = vmatpush3.bf16.msra.mxu0 %v8752_v56  ;;  %8406 = vmatpush3.bf16.msra.mxu1 %v8753_v1  ;;  %v5213_v45 = vpop.f32.mrf.mxu1  ;;  %v8795_v56 = vld [vmem:[%s11979_s9 + $0x1e0] sm:$0xff]  }
 0x5d8   :  { %8393 = vmatprep.subr.bf16.mxu0 %v12148_v10  ;;  %8407 = vmatprep.subr.bf16.mxu1 %v12148_v10  ;;  %v6224_v48 = vpack.c.bf16 %v5213_v45, %v5213_v45  ;;  %v8796_v1 = vld [vmem:[%s11979_s9 + $0x1c0] sm:$0xff]  }
 0x5db   :  { %8394 = vmatpush3.bf16.msra.mxu0 %v8754_v52  ;;  %8408 = vmatpush3.bf16.msra.mxu1 %v8755_v38  ;;  %v6301_v52 = vpack.c.bf16 %v11784_v21, %v11784_v21 }
 0x5dc   :  { %8395 = vmatprep.subr.bf16.mxu0 %v12148_v10  ;;  %8425 = vmatprep.subr.bf16.mxu1 %v12148_v10 }
 0x5de   :  { %8410 = vmatmul.mubr.msk.bf16.vlgmr.msra.gmra.mxu1 %vm4919_vm5, %v5608_v43 }
 0x5df   :  { %8396 = vmatpush3.bf16.msra.mxu0 %v8756_v31  ;;  %8426 = vmatpush3.bf16.msra.mxu1 %v8757_v53 }
 0x5e0   :  { %8413 = vmatprep.subr.bf16.mxu0 %v12148_v10  ;;  %8427 = vmatprep.subr.bf16.mxu1 %v12148_v10 }
 0x5e1   :  { %8433 = vmatprep.mubr.msk.bf16.mxu1 %vm8824_vm0, %v12148_v10 }
 0x5e2   :  { %8398 = vmatmul.mubr.msk.bf16.vlgmr.msra.gmra.mxu0 %vm4919_vm5, %v5531_v15 }
 0x5e3   :  { %8414 = vmatpush3.bf16.msra.mxu0 %v8758_v25  ;;  %8428 = vmatpush3.bf16.msra.mxu1 %v8759_v0 }
 0x5e4   :  { %8415 = vmatprep.subr.bf16.mxu0 %v12148_v10  ;;  %8429 = vmatprep.subr.bf16.mxu1 %v12148_v10 }
 0x5e5   :  { %8421 = vmatprep.mubr.msk.bf16.mxu0 %vm8824_vm0, %v12148_v10 }
 0x5e7   :  { %8416 = vmatpush3.bf16.msra.mxu0 %v8760_v58  ;;  %8430 = vmatpush3.bf16.msra.mxu1 %v8761_v51 }
 0x5e8   :  { %8417 = vmatprep.subr.bf16.mxu0 %v12148_v10  ;;  %8431 = vmatprep.subr.bf16.mxu1 %v12148_v10 }
 0x5eb   :  { %8418 = vmatpush3.bf16.msra.mxu0 %v8762_v28  ;;  %8432 = vmatpush3.bf16.msra.mxu1 %v8763_v4 }
 0x5ec   :  { %8419 = vmatprep.subr.bf16.mxu0 %v12148_v10  ;;  %8449 = vmatprep.subr.bf16.mxu1 %v12148_v10 }
 0x5ee   :  { %8434 = vmatmul.mubr.msk.bf16.vlgmr.msra.gmra.mxu1 %vm4919_vm5, %v5762_v22 }
 0x5ef   :  { %8420 = vmatpush3.bf16.msra.mxu0 %v8764_v8  ;;  %8450 = vmatpush3.bf16.msra.mxu1 %v8765_v62 }
 0x5f0   :  { %8437 = vmatprep.subr.bf16.mxu0 %v12148_v10  ;;  %8451 = vmatprep.subr.bf16.mxu1 %v12148_v10 }
 0x5f1   :  { %8457 = vmatprep.mubr.msk.bf16.mxu1 %vm8824_vm0, %v12148_v10 }
 0x5f2   :  { %8422 = vmatmul.mubr.msk.bf16.vlgmr.msra.gmra.mxu0 %vm4919_vm5, %v5685_v40 }
 0x5f3   :  { %8438 = vmatpush3.bf16.msra.mxu0 %v8766_v3  ;;  %8452 = vmatpush3.bf16.msra.mxu1 %v8767_v23 }
 0x5f4   :  { %8439 = vmatprep.subr.bf16.mxu0 %v12148_v10  ;;  %8453 = vmatprep.subr.bf16.mxu1 %v12148_v10 }
 0x5f5   :  { %8445 = vmatprep.mubr.msk.bf16.mxu0 %vm8824_vm0, %v12148_v10 }
 0x5f7   :  { %8440 = vmatpush3.bf16.msra.mxu0 %v8768_v37  ;;  %8454 = vmatpush3.bf16.msra.mxu1 %v8769_v50 }
 0x5f8   :  { %8441 = vmatprep.subr.bf16.mxu0 %v12148_v10  ;;  %8455 = vmatprep.subr.bf16.mxu1 %v12148_v10 }
 0x5fb   :  { %8442 = vmatpush3.bf16.msra.mxu0 %v8770_v46  ;;  %8456 = vmatpush3.bf16.msra.mxu1 %v8771_v12 }
 0x5fc   :  { %8443 = vmatprep.subr.bf16.mxu0 %v12148_v10  ;;  %8473 = vmatprep.subr.bf16.mxu1 %v12148_v10 }
 0x5fe   :  { %8458 = vmatmul.mubr.msk.bf16.vlgmr.msra.gmra.mxu1 %vm4919_vm5, %v5916_v44 }
 0x5ff   :  { %8444 = vmatpush3.bf16.msra.mxu0 %v8772_v47  ;;  %8474 = vmatpush3.bf16.msra.mxu1 %v8773_v2 }
 0x600   :  { %8461 = vmatprep.subr.bf16.mxu0 %v12148_v10  ;;  %8475 = vmatprep.subr.bf16.mxu1 %v12148_v10 }
 0x601   :  { %8481 = vmatprep.mubr.msk.bf16.mxu1 %vm8824_vm0, %v12148_v10 }
 0x602   :  { %8446 = vmatmul.mubr.msk.bf16.vlgmr.msra.gmra.mxu0 %vm4919_vm5, %v5839_v26 }
 0x603   :  { %8462 = vmatpush3.bf16.msra.mxu0 %v8774_v41  ;;  %8476 = vmatpush3.bf16.msra.mxu1 %v8775_v57 }
 0x604   :  { %8463 = vmatprep.subr.bf16.mxu0 %v12148_v10  ;;  %8477 = vmatprep.subr.bf16.mxu1 %v12148_v10 }
 0x605   :  { %8469 = vmatprep.mubr.msk.bf16.mxu0 %vm8824_vm0, %v12148_v10 }
 0x607   :  { %8464 = vmatpush3.bf16.msra.mxu0 %v8776_v34  ;;  %8478 = vmatpush3.bf16.msra.mxu1 %v8777_v35 }
 0x608   :  { %8465 = vmatprep.subr.bf16.mxu0 %v12148_v10  ;;  %8479 = vmatprep.subr.bf16.mxu1 %v12148_v10 }
 0x60b   :  { %8466 = vmatpush3.bf16.msra.mxu0 %v8778_v55  ;;  %8480 = vmatpush3.bf16.msra.mxu1 %v8779_v20 }
 0x60c   :  { %8467 = vmatprep.subr.bf16.mxu0 %v12148_v10  ;;  %8497 = vmatprep.subr.bf16.mxu1 %v12148_v10 }
 0x60e   :  { %8482 = vmatmul.mubr.msk.bf16.vlgmr.msra.gmra.mxu1 %vm4919_vm5, %v6070_v18 }
 0x60f   :  { %8468 = vmatpush3.bf16.msra.mxu0 %v8780_v19  ;;  %8498 = vmatpush3.bf16.msra.mxu1 %v8781_v7 }
 0x610   :  { %8485 = vmatprep.subr.bf16.mxu0 %v12148_v10  ;;  %8499 = vmatprep.subr.bf16.mxu1 %v12148_v10 }
 0x611   :  { %8505 = vmatprep.mubr.msk.bf16.mxu1 %vm8824_vm0, %v12148_v10 }
 0x612   :  { %8470 = vmatmul.mubr.msk.bf16.vlgmr.msra.gmra.mxu0 %vm4919_vm5, %v5993_v42 }
 0x613   :  { %8486 = vmatpush3.bf16.msra.mxu0 %v8782_v6  ;;  %8500 = vmatpush3.bf16.msra.mxu1 %v8783_v36 }
 0x614   :  { %8487 = vmatprep.subr.bf16.mxu0 %v12148_v10  ;;  %8501 = vmatprep.subr.bf16.mxu1 %v12148_v10 }
 0x615   :  { %8493 = vmatprep.mubr.msk.bf16.mxu0 %vm8824_vm0, %v12148_v10 }
 0x617   :  { %8488 = vmatpush3.bf16.msra.mxu0 %v8784_v33  ;;  %8502 = vmatpush3.bf16.msra.mxu1 %v8785_v63 }
 0x618   :  { %8489 = vmatprep.subr.bf16.mxu0 %v12148_v10  ;;  %8503 = vmatprep.subr.bf16.mxu1 %v12148_v10 }
 0x61b   :  { %8490 = vmatpush3.bf16.msra.mxu0 %v8786_v54  ;;  %8504 = vmatpush3.bf16.msra.mxu1 %v8787_v24 }
 0x61c   :  { %8491 = vmatprep.subr.bf16.mxu0 %v12148_v10  ;;  %8521 = vmatprep.subr.bf16.mxu1 %v12148_v10 }
 0x61e   :  { %8506 = vmatmul.mubr.msk.bf16.vlgmr.msra.gmra.mxu1 %vm4919_vm5, %v6224_v48 }
 0x61f   :  { %8492 = vmatpush3.bf16.msra.mxu0 %v8788_v17  ;;  %8522 = vmatpush3.bf16.msra.mxu1 %v8789_v11 }
 0x620   :  { %8509 = vmatprep.subr.bf16.mxu0 %v12148_v10  ;;  %8523 = vmatprep.subr.bf16.mxu1 %v12148_v10 }
 0x621   :  { %8529 = vmatprep.mubr.msk.bf16.mxu1 %vm8824_vm0, %v12148_v10 }
 0x622   :  { %8494 = vmatmul.mubr.msk.bf16.vlgmr.msra.gmra.mxu0 %vm4919_vm5, %v6147_v60 }
 0x623   :  { %8510 = vmatpush3.bf16.msra.mxu0 %v8790_v61  ;;  %8524 = vmatpush3.bf16.msra.mxu1 %v8791_v9 }
 0x624   :  { %8511 = vmatprep.subr.bf16.mxu0 %v12148_v10  ;;  %8525 = vmatprep.subr.bf16.mxu1 %v12148_v10 }
 0x625   :  { %8517 = vmatprep.mubr.msk.bf16.mxu0 %vm8824_vm0, %v12148_v10 }
 0x627   :  { %8512 = vmatpush3.bf16.msra.mxu0 %v8792_v32  ;;  %8526 = vmatpush3.bf16.msra.mxu1 %v8793_v16 }
 0x628   :  { %8513 = vmatprep.subr.bf16.mxu0 %v12148_v10  ;;  %8527 = vmatprep.subr.bf16.mxu1 %v12148_v10 }
 0x62b   :  { %8514 = vmatpush3.bf16.msra.mxu0 %v8794_v27  ;;  %8528 = vmatpush3.bf16.msra.mxu1 %v8795_v56 }
 0x62c   :  { %8515 = vmatprep.subr.bf16.mxu0 %v12148_v10  ;;  %8558 = vmatprep.subr.bf16.mxu1 %v12148_v10 }
 0x62e   :  { %8530 = vmatmul.mubr.msk.bf16.vlgmr.msra.gmra.mxu1 %vm4919_vm5, %v6378_v59 }
 0x62f   :  { %8516 = vmatpush3.bf16.msra.mxu0 %v8796_v1  ;;  %8566 = vmatprep.mubr.msk.bf16.mxu1 %vm8824_vm0, %v12148_v10 }
 0x630   :  { %8533 = vmatprep.subr.mxu0 %v12148_v10 }
 0x632   :  { %8518 = vmatmul.mubr.msk.bf16.vlgmr.msra.gmra.mxu0 %vm4919_vm5, %v6301_v52 }
 0x633   :  { %8535 = vmatprep.mubr.msk.f32.mxu0 %vm8824_vm0, %v12148_v10 }
 0x67e   :  { %v5371_v38 = vpop.f32.mrf.mxu1 }
 0x680   :  { %v8363_v49 = vpop.f32.mrf.mxu1 }
 0x682   :  { %v5304_v43 = vpop.f32.mrf.mxu0  ;;  %v5374_v31 = vpop.f32.mrf.mxu1 }
 0x683   :  { %v5372_v53 = vadd.f32 %v5371_v38, %v5304_v43 }
 0x684   :  { %v8351_v25 = vpop.f32.mrf.mxu0  ;;  %v8364_v0 = vpop.f32.mrf.mxu1 }
 0x686   :  { %v5307_v15 = vpop.f32.mrf.mxu0 }
 0x688   :  { %v8352_v58 = vpop.f32.mrf.mxu0 }
 0x68e   :  { %v5524_v51 = vpop.f32.mrf.mxu1 }
 0x690   :  { %v8387_v28 = vpop.f32.mrf.mxu1 }
 0x692   :  { %v5447_v4 = vpop.f32.mrf.mxu0  ;;  %v5527_v8 = vpop.f32.mrf.mxu1 }
 0x693   :  { %v5453_v62 = vadd.f32 %v5447_v4, %v5372_v53 }
 0x694   :  { %v8375_v14 = vpop.f32.mrf.mxu0  ;;  %v8388_v22 = vpop.f32.mrf.mxu1 }
 0x695   :  { %v5530_v3 = vadd.f32 %v5524_v51, %v5453_v62 }
 0x696   :  { %v5450_v23 = vpop.f32.mrf.mxu0 }
 0x698   :  { %v8376_v5 = vpop.f32.mrf.mxu0 }
 0x69e   :  { %v5678_v40 = vpop.f32.mrf.mxu1 }
 0x6a0   :  { %v8411_v37 = vpop.f32.mrf.mxu1 }
 0x6a2   :  { %v5601_v50 = vpop.f32.mrf.mxu0  ;;  %v5681_v39 = vpop.f32.mrf.mxu1 }
 0x6a3   :  { %v5607_v46 = vadd.f32 %v5601_v50, %v5530_v3 }
 0x6a4   :  { %v8399_v12 = vpop.f32.mrf.mxu0  ;;  %v8412_v13 = vpop.f32.mrf.mxu1 }
 0x6a5   :  { %v5684_v44 = vadd.f32 %v5678_v40, %v5607_v46 }
 0x6a6   :  { %v5604_v47 = vpop.f32.mrf.mxu0 }
 0x6a8   :  { %v8400_v2 = vpop.f32.mrf.mxu0 }
 0x6ae   :  { %v5832_v41 = vpop.f32.mrf.mxu1 }
 0x6b0   :  { %v8435_v57 = vpop.f32.mrf.mxu1 }
 0x6b2   :  { %v5755_v26 = vpop.f32.mrf.mxu0  ;;  %v5835_v34 = vpop.f32.mrf.mxu1 }
 0x6b3   :  { %v5761_v61 = vadd.f32 %v5755_v26, %v5684_v44 }
 0x6b4   :  { %v8423_v35 = vpop.f32.mrf.mxu0  ;;  %v8436_v55 = vpop.f32.mrf.mxu1 }
 0x6b5   :  { %v5838_v60 = vadd.f32 %v5832_v41, %v5761_v61  ;;  %v6491_v35 = vlaneseq  ;;  %v8803_v61 = vld [vmem:[%s11982_s13 + $0x8] sm:$0xff]  }
 0x6b6   :  { %v5758_v20 = vpop.f32.mrf.mxu0 }
 0x6b7   :  { %v11872_v55 = vshrl.u32 %v6491_v35, 7 }
 0x6b8   :  { %v8424_v19 = vpop.f32.mrf.mxu0 }
 0x6b9   :  { %v6497_v20 = vadd.s32 1, %v11872_v55  ;;  %v6494_v19 = vand.u32 127, %v6491_v35 }
 0x6be   :  { %v5986_v7 = vpop.f32.mrf.mxu1 }
 0x6c0   :  { %v8459_v21 = vpop.f32.mrf.mxu1 }
 0x6c1   :  { %v6498_v21 = vmul.u32 4, %v6497_v20 }
 0x6c2   :  { %v5909_v18 = vpop.f32.mrf.mxu0  ;;  %v5989_v6 = vpop.f32.mrf.mxu1 }
 0x6c3   :  { %v5915_v16 = vadd.f32 %v5909_v18, %v5838_v60  ;;  %v7302_v6 = vld [vmem:[%s11983_s10] ss:$0 sm:$0xff]  ;;  %vm6499_vm8 = vcmp.lt.s32.totalorder %v6494_v19, %v6498_v21  ;;  %v8825_v60 = vmov 0  }
 0x6c4   :  { %v8447_v36 = vpop.f32.mrf.mxu0  ;;  %v8460_v29 = vpop.f32.mrf.mxu1  ;;  %8587 = vset.pattern.permute.xlu0 %v8825_v60 }
 0x6c5   :  { %v5992_v52 = vadd.f32 %v5986_v7, %v5915_v16  ;;  %v6495_v7 = vmul.u32 4, %v11872_v55  ;;  %v7303_v29 = vld [vmem:[%s11984_s11] ss:$0 sm:$0xff]  ;;  %v8805_v16 = vld [vmem:[%s11986_s16 + $0x18] sm:$0xff]  }
 0x6c6   :  { %v5912_v42 = vpop.f32.mrf.mxu0  ;;  %8559 = vmatpush3.bf16.msra.mxu1 %v8805_v16 }
 0x6c7   :  { %vm6496_vm7 = vcmp.ge.s32.totalorder %v6494_v19, %v6495_v7  ;;  %8560 = vmatprep.subr.bf16.mxu1 %v12148_v10 }
 0x6c8   :  { %v8448_v33 = vpop.f32.mrf.mxu0  ;;  %vm6500_vm9 = vmand %vm6496_vm7, %vm6499_vm8 }
 0x6ce   :  { %v6140_v63 = vpop.f32.mrf.mxu1 }
 0x6d0   :  { %v8483_v30 = vpop.f32.mrf.mxu1 }
 0x6d1   :  { %v6501_v30 = vsel %vm6500_vm9, 0.25, %v12148_v10 }
 0x6d2   :  { %v6063_v54 = vpop.f32.mrf.mxu0  ;;  %v6143_v24 = vpop.f32.mrf.mxu1 }
 0x6d3   :  { %v6069_v49 = vadd.f32 %v6063_v54, %v5992_v52  ;;  %v8797_v54 = vld [vmem:[%s11982_s13 + $0x38] sm:$0xff]   ;;  %v8798_v24 = vld [vmem:[%s11982_s13 + $0x30] sm:$0xff]  }
 0x6d4   :  { %v8471_v45 = vpop.f32.mrf.mxu0  ;;  %v8484_v48 = vpop.f32.mrf.mxu1  ;;  %v8806_v52 = vld [vmem:[%s11986_s16 + $0x10] sm:$0xff]  }
 0x6d5   :  { %v6146_v31 = vadd.f32 %v6140_v63, %v6069_v49  ;;  %v8799_v45 = vld [vmem:[%s11982_s13 + $0x28] sm:$0xff]   ;;  %v8800_v48 = vld [vmem:[%s11982_s13 + $0x20] sm:$0xff]   ;;  %8561 = vmatpush3.bf16.msra.mxu1 %v8806_v52 }
 0x6d6   :  { %v6066_v17 = vpop.f32.mrf.mxu0  ;;  %8562 = vmatprep.subr.bf16.mxu1 %v12148_v10  ;;  %v8808_v49 = vld [vmem:[%s11986_s16] sm:$0xff]  }
 0x6d7   :  { %v8801_v17 = vld [vmem:[%s11982_s13 + $0x18] sm:$0xff]  }
 0x6d8   :  { %v8472_v11 = vpop.f32.mrf.mxu0 }
 0x6d9   :  { %v8802_v11 = vld [vmem:[%s11982_s13 + $0x10] sm:$0xff]  }
 0x6de   :  { %v6294_v9 = vpop.f32.mrf.mxu1 }
 0x6e0   :  { %v8507_v32 = vpop.f32.mrf.mxu1 }
 0x6e1   :  { %v6593_v32 = vld [vmem:[%s11985_s12] sm:$0x3] }
 0x6e2   :  { %v6217_v27 = vpop.f32.mrf.mxu0  ;;  %v6297_v56 = vpop.f32.mrf.mxu1  ;;  %6597 = vperm.xlu0 %8587, %v6593_v32  }
 0x6e3   :  { %v6223_v53 = vadd.f32 %v6217_v27, %v6146_v31  ;;  %v8826_v27 = vmov 1   ;;  %v6602_v31 = vsub.s32 0, %v11872_v55 }
 0x6e4   :  { %v8495_v1 = vpop.f32.mrf.mxu0  ;;  %v8508_v59 = vpop.f32.mrf.mxu1 }
 0x6e5   :  { %v6300_v15 = vadd.f32 %v6294_v9, %v6223_v53  ;;  %v8804_v9 = vld [vmem:[%s11982_s13] sm:$0xff]   ;;  %v6699_v53 = vsub.s32 1, %v11872_v55 }
 0x6e6   :  { %v6220_v38 = vpop.f32.mrf.mxu0  ;;  %8588 = vset.pattern.permute.xlu0 %v8826_v27 }
 0x6e7   :  { %6694 = vperm.xlu0 %8588, %v6593_v32   ;;  %v8807_v38 = vld [vmem:[%s11986_s16 + $0x8] sm:$0xff]  }
 0x6e8   :  { %v8496_v43 = vpop.f32.mrf.mxu0  ;;  %8563 = vmatpush3.bf16.msra.mxu1 %v8807_v38 }
 0x6e9   :  { %8564 = vmatprep.subr.bf16.mxu1 %v12148_v10 }
 0x6ec   :  { %8565 = vmatpush3.bf16.msra.mxu1 %v8808_v49 }
 0x6ed   :  { %8570 = vmatprep.subr.bf16.mxu1 %v12148_v10 }
 0x6ee   :  { %v6448_v25 = vpop.f32.mrf.mxu1 }
 0x6f0   :  { %v8531_v0 = vpop.f32.mrf.mxu1 }
 0x6f2   :  { %v6371_v58 = vpop.f32.mrf.mxu0  ;;  %v6451_v51 = vpop.f32.mrf.mxu1 }
 0x6f3   :  { %v6377_v28 = vadd.f32 %v6371_v58, %v6300_v15 }
 0x6f4   :  { %v8519_v4 = vpop.f32.mrf.mxu0  ;;  %v8532_v8 = vpop.f32.mrf.mxu1 }
 0x6f5   :  { %v6454_v62 = vadd.f32 %v6448_v25, %v6377_v28  ;;  %v6594_v25 = vld [vmem:[%s11988_s14] sm:$0x3] }
 0x6f6   :  { %v6374_v14 = vpop.f32.mrf.mxu0  ;;  %v6603_v0 = vrot.slane %v6594_v25, %v6602_v31  ;;  %v6700_v15 = vrot.slane %v6594_v25, %v6699_v53 }
 0x6f7   :  { %v6455_v22 = vrot.slane %v6454_v62, 4 }
 0x6f8   :  { %v8520_v3 = vpop.f32.mrf.mxu0 }
 0x6f9   :  { %v6456_v23 = vadd.f32 %v6455_v22, %v6454_v62 }
 0x6fb   :  { %v6457_v5 = vrot.slane %v6456_v23, 2 }
 0x6fd   :  { %v6458_v40 = vadd.f32 %v6457_v5, %v6456_v23 }
 0x6ff   :  { %v6459_v37 = vrot.slane %v6458_v40, 1 }
 0x701   :  { %v6460_v50 = vadd.f32 %v6459_v37, %v6458_v40  ;;  %v8809_v37 = vld [vmem:[%s11987_s18 + $0x18] sm:$0xff]  }
 0x703   :  { %v6461_v39 = vmul.f32 0.125, %v6460_v50 }
 0x705   :  { %v6462_v46 = vsub.f32 %v6454_v62, %v6461_v39  ;;  %v7313_v62 = vld [vmem:[%s11989_s15] ss:$0 sm:$0xff]  ;;  %v8810_v39 = vld [vmem:[%s11987_s18 + $0x10] sm:$0xff]  }
 0x707   :  { %v6463_v12 = vmul.f32 %v6462_v46, %v6462_v46 }
 0x709   :  { %v6464_v13 = vrot.slane %v6463_v12, 4 }
 0x70b   :  { %v6465_v44 = vadd.f32 %v6464_v13, %v6463_v12  ;;  %v8812_v12 = vld [vmem:[%s11987_s18] sm:$0xff]   ;;  %v25_v13 = vstv %s11990_s19 }
 0x70c   :  { %26 = vst [vmem:[#allocation2] sm:$0x1] %v25_v13 }
 0x70d   :  { %v6466_v47 = vrot.slane %v6465_v44, 2 }
 0x70f   :  { %v6467_v2 = vadd.f32 %v6466_v47, %v6465_v44  ;;  %v7314_v44 = vld [vmem:[%s11991_s17] ss:$0 sm:$0xff] }
 0x711   :  { %v6468_v41 = vrot.slane %v6467_v2, 1 }
 0x713   :  { %v6469_v57 = vadd.f32 %v6468_v41, %v6467_v2 }
 0x715   :  { %v6470_v26 = vmul.f32 0.125, %v6469_v57 }
 0x717   :  { %v6471_v34 = vadd.f32 1e-05, %v6470_v26 }
 0x719   :  { %8817 = vrsqrt.f32 %v6471_v34 }
 0x726   :  { %v8818_v18 = vpop.eup %8817 }
 0x727   :  { %v6475_v36 = vmul.f32 %v8818_v18, %v6462_v46  ;;  %v8811_v46 = vld [vmem:[%s11987_s18 + $0x8] sm:$0xff]  }
 0x729   :  { %v6482_v42 = vmul.f32 %v7302_v6, %v6475_v36 }
 0x72b   :  { %v6489_v33 = vadd.f32 %v7303_v29, %v6482_v42 }
 0x72d   :  { %v6490_v63 = vmax.f32 %v6489_v33, 0.0 }
 0x72f   :  { %8534 = vmatpush3.msra.mxu0 %v6490_v63 }
 0x730   :  { %8536 = vmatmul.mubr.msk.f32.vlgmr.msra.gmra.mxu0 %vm6502_vm10, %v6501_v30  ;;  %8538 = vmatprep.subr.bf16.mxu0 %v12148_v10 }
 0x731   :  { %8539 = vmatpush3.bf16.msra.mxu0 %v8797_v54  ;;  %8554 = vmatprep.mubr.msk.bf16.mxu0 %vm8824_vm0, %v12148_v10 }
 0x732   :  { %8540 = vmatprep.subr.bf16.mxu0 %v12148_v10 }
 0x735   :  { %8541 = vmatpush3.bf16.msra.mxu0 %v8798_v24 }
 0x736   :  { %8542 = vmatprep.subr.bf16.mxu0 %v12148_v10 }
 0x739   :  { %8543 = vmatpush3.bf16.msra.mxu0 %v8799_v45 }
 0x73a   :  { %8544 = vmatprep.subr.bf16.mxu0 %v12148_v10 }
 0x73d   :  { %8545 = vmatpush3.bf16.msra.mxu0 %v8800_v48 }
 0x73e   :  { %8546 = vmatprep.subr.bf16.mxu0 %v12148_v10 }
 0x741   :  { %8547 = vmatpush3.bf16.msra.mxu0 %v8801_v17 }
 0x742   :  { %8548 = vmatprep.subr.bf16.mxu0 %v12148_v10 }
 0x745   :  { %8549 = vmatpush3.bf16.msra.mxu0 %v8802_v11 }
 0x746   :  { %8550 = vmatprep.subr.bf16.mxu0 %v12148_v10 }
 0x749   :  { %8551 = vmatpush3.bf16.msra.mxu0 %v8803_v61 }
 0x74a   :  { %8552 = vmatprep.subr.bf16.mxu0 %v12148_v10 }
 0x74d   :  { %8553 = vmatpush3.bf16.msra.mxu0 %v8804_v9 }
 0x75d   :  { %v6598_v43 = vpop.permute.xlu0 %6597 }
 0x75e   :  { %v6604_v51 = vmul.f32 %v6603_v0, %v6598_v43 }
 0x762   :  { %v6695_v58 = vpop.permute.xlu0 %6694 }
 0x763   :  { %v6701_v28 = vmul.f32 %v6700_v15, %v6695_v58 }
 0x7f0   :  { %v6572_v56 = vpop.f32.mrf.mxu0 }
 0x7f1   :  { %v6576_v1 = vpack.c.bf16 %v6572_v56, %v6572_v56 }
 0x7f2   :  { %v8537_v59 = vpop.f32.mrf.mxu0 }
 0x7f3   :  { %8555 = vmatmul.mubr.bf16.vlgmr.msra.gmra.mxu0 %v6576_v1 }
 0x8b3   :  { %v6687_v4 = vpop.f32.mrf.mxu0 }
 0x8b4   :  { %v6688_v8 = vadd.f32 %v6687_v4, %v6604_v51 }
 0x8b5   :  { %v8556_v14 = vpop.f32.mrf.mxu0 }
 0x8b6   :  { %v6702_v22 = vadd.f32 %v6701_v28, %v6688_v8 }
 0x8b7   :  { %v6690_v3 = vpop.f32.mrf.mxu0 }
 0x8b8   :  { %v6710_v23 = vadd.f32 %v7313_v62, %v6702_v22 }
 0x8b9   :  { %v8557_v5 = vpop.f32.mrf.mxu0 }
 0x8ba   :  { %v6711_v40 = vmax.f32 %v6710_v23, 0.0 }
 0x8bc   :  { %v6712_v50 = vpack.c.bf16 %v6711_v40, %v6711_v40 }
 0x8be   :  { %8567 = vmatmul.mubr.msk.bf16.vlgmr.msra.gmra.mxu1 %vm4919_vm5, %v6712_v50 }
 0x8bf   :  { %8571 = vmatpush3.bf16.msra.mxu1 %v8809_v37  ;;  %8578 = vmatprep.mubr.msk.bf16.mxu1 %vm8824_vm0, %v12148_v10 }
 0x8c0   :  { %8572 = vmatprep.subr.bf16.mxu1 %v12148_v10 }
 0x8c3   :  { %8573 = vmatpush3.bf16.msra.mxu1 %v8810_v39 }
 0x8c4   :  { %8574 = vmatprep.subr.bf16.mxu1 %v12148_v10 }
 0x8c7   :  { %8575 = vmatpush3.bf16.msra.mxu1 %v8811_v46 }
 0x8c8   :  { %8576 = vmatprep.subr.bf16.mxu1 %v12148_v10  ;;  %v7320_v10 = vld [vmem:[#allocation2] ss:$0 sm:$0xff] }
 0x8cb   :  { %8577 = vmatpush3.bf16.msra.mxu1 %v8812_v12 }
 0x97e   :  { %v6789_v47 = vpop.f32.mrf.mxu1 }
 0x97f   :  { %v6790_v2 = vadd.f32 %v7314_v44, %v6789_v47 }
 0x980   :  { %v8568_v41 = vpop.f32.mrf.mxu1 }
 0x981   :  { %v6795_v57 = vmax.f32 %v6790_v2, 0.0 }
 0x982   :  { %v6792_v26 = vpop.f32.mrf.mxu1 }
 0x983   :  { %v6796_v34 = vpack.c.bf16 %v6795_v57, %v6795_v57 }
 0x984   :  { %v8569_v35 = vpop.f32.mrf.mxu1 }
 0x985   :  { %8579 = vmatmul.mubr.msk.bf16.vlgmr.msra.gmra.mxu1 %vm4919_vm5, %v6796_v34 }
 0xa45   :  { %v6873_v55 = vpop.f32.mrf.mxu1 }
 0xa46   :  { %v6874_v20 = vadd.f32 %v7320_v10, %v6873_v55 }
 0xa47   :  { %v8580_v19 = vpop.f32.mrf.mxu1 }
 0xa48   :  { %6880 = vst.msk [vmem:[%s11992_s20] sm:$0x3] %vm6879_vm11, %v6874_v20 }
 0xa49   :  { %v6876_v7 = vpop.f32.mrf.mxu1 }
 0xa4b   :  { %v8581_v21 = vpop.f32.mrf.mxu1 }

</bundles_post_ra>
